<compile_context>
chip_gen: v6e
topology: v6e:2x2x1
jax: 0.10.0
libtpu: 0.0.40
codegen_flags: <defaults>
</compile_context>

<pallas_src>
import math
import functools

import jax
import jax.numpy as jnp
from jax.experimental import pallas as pl
from jax.experimental.pallas import tpu as pltpu

# ---- module hyperparameters (small, consistent with the PyTorch __init__) ----
NUM_HEADS = 4
HIDDEN = 32            # hidden_channels
OUT_CH = 32            # out_channels (== hidden so the FFN residual is valid)
HEAD_DIM = HIDDEN // NUM_HEADS
KERNEL_SIZE = 3        # FFN conv kernel size (non-causal "same" padding)
WINDOW = 4             # relative_window_size
NUM_TAPS = 2 * WINDOW + 1
LN_EPS = 1e-5
NEG = -100000.0

B = 2
L = 16

_PREC = jax.lax.Precision.HIGHEST   # local, per-dot; no global config side effect


# ----------------------------- Pallas kernel ---------------------------------
def _layer_norm(t, g, b, eps):
    mu = jnp.mean(t, axis=-1, keepdims=True)
    var = jnp.mean((t - mu) ** 2, axis=-1, keepdims=True)
    return (t - mu) * jax.lax.rsqrt(var + eps) * g + b


def transformer_block_kernel(
    xm_ref, kmask_ref, wbig_ref, wffn_ref, embs_ref, vec_ref,
    out_ref,
    *, length, hidden, num_heads, head_dim, window, ffn_ks, eps,
):
    Lk = length
    C = hidden
    H = num_heads
    d = head_dim
    taps = 2 * window + 1
    HL = H * Lk
    scale = 1.0 / math.sqrt(d)
    f32 = jnp.float32

    # ---- unpack packed operands ---------------------------------------------
    x = xm_ref[:, :C]                       # (L, C)
    mcol = xm_ref[:, C:C + 1]               # (L, 1)   query-position mask
    krow = kmask_ref[...].reshape(1, Lk)    # (1, L)   key-position mask

    wqkv = wbig_ref[:C, :3 * C]             # (C, 3C)
    wo = wbig_ref[:C, 3 * C:4 * C]          # (C, C)
    bqkv = wbig_ref[C:C + 1, :3 * C]        # (1, 3C)
    w1 = wffn_ref[:, :C]                    # (ks*C, C)
    w2 = wffn_ref[:, C:2 * C]               # (ks*C, C)
    vec = vec_ref[...]                      # (7, C)
    bo, b1, b2 = vec[0:1, :], vec[1:2, :], vec[2:3, :]
    g1, be1, g2, be2 = vec[3:4, :], vec[4:5, :], vec[5:6, :], vec[6:7, :]
    embs = embs_ref[...]                    # (2*H*L, d)
    ek = embs[:HL, :].reshape(H, Lk, d)     # rel-key taps, zero rows >= taps
    ev = embs[HL:, :].reshape(H, Lk, d)     # rel-value taps, zero rows >= taps

    # ---- fused q/k/v projection: one (L, C) @ (C, 3C) MXU matmul ------------
    qkv = jnp.dot(x, wqkv, precision=_PREC, preferred_element_type=f32) + bqkv
    q = qkv[:, 0:C] * scale                 # fold 1/sqrt(d) into q once
    k = qkv[:, C:2 * C]
    v = qkv[:, 2 * C:3 * C]

    # ---- stack heads along sublanes: (H, L, d) -------------------------------
    q3 = jnp.concatenate([q[:, h * d:(h + 1) * d] for h in range(H)],
                         axis=0).reshape(H, Lk, d)
    k3 = jnp.concatenate([k[:, h * d:(h + 1) * d] for h in range(H)],
                         axis=0).reshape(H, Lk, d)
    v3 = jnp.concatenate([v[:, h * d:(h + 1) * d] for h in range(H)],
                         axis=0).reshape(H, Lk, d)

    # ---- scores + relative-key tap values: two batched MXU contractions -----
    score = jnp.einsum('hid,hjd->hij', q3, k3, precision=_PREC,
                       preferred_element_type=f32).reshape(HL, Lk)
    vt = jnp.einsum('hid,htd->hit', q3, ek, precision=_PREC,
                    preferred_element_type=f32).reshape(HL, Lk)

    # ---- banded relative-key bias, applied ONCE on the stacked slab ---------
    # score[i, j] += q_i . emb_k[h, j-i+W] for |j-i| <= W.
    # Only `delta` is kept; per-tap compares are regenerated at point of use.
    col = jax.lax.broadcasted_iota(jnp.int32, (HL, Lk), 1)
    i_base = jax.lax.broadcasted_iota(jnp.int32, (Lk, 1), 0)
    i_col = jnp.concatenate([i_base] * H, axis=0)               # (HL, 1)
    delta = col - i_col                                         # j - i
    for t in range(taps):
        score = score + jnp.where(delta == (t - window), vt[:, t:t + 1], 0.0)

    # ---- attention mask (masked_fill SET semantics, built in-kernel) --------
    valid = jnp.broadcast_to(krow, (HL, Lk)) * jnp.concatenate([mcol] * H, axis=0)
    score = jnp.where(valid == 0.0, NEG, score)

    # ---- softmax (exact normalization keeps the reference check tight) ------
    score = score - jnp.max(score, axis=-1, keepdims=True)
    p = jnp.exp(score)
    p = p / jnp.sum(p, axis=-1, keepdims=True)

    # ---- value contraction + relative-value term -----------------------------
    res = jnp.einsum('hij,hjd->hid', p.reshape(H, Lk, Lk), v3, precision=_PREC,
                     preferred_element_type=f32).reshape(HL, d)

    # rw[i, t] = p[i, i+t-W] (zero out of range); rel_v = rw @ emb_v (per head)
    rw = jnp.zeros((HL, Lk), f32)
    for t in range(taps):
        sel = delta == (t - window)
        d_t = jnp.sum(jnp.where(sel, p, 0.0), axis=-1, keepdims=True)
        rw = rw + jnp.where(col == t, d_t, 0.0)
    relv = jnp.einsum('hit,htd->hid', rw.reshape(H, Lk, Lk), ev, precision=_PREC,
                      preferred_element_type=f32).reshape(HL, d)

    # ---- merge heads back onto lanes; ONE output-projection matmul ----------
    res_t = res + relv                                          # (H*L, d)
    attn_cat = jnp.concatenate([res_t[h * Lk:(h + 1) * Lk, :] for h in range(H)],
                               axis=1)                          # (L, H*d)
    attn_out = jnp.dot(attn_cat, wo, precision=_PREC,
                       preferred_element_type=f32) + bo

    x1 = _layer_norm(x + attn_out, g1, be1, eps)

    # ---- FFN: fused-tap same-padded conv1d -> relu -> conv1d, masked --------
    # TODO(synk): dropout layers are treated as identity (inference mode).
    pad = ffn_ks // 2
    # boundary-validity masks hoisted out of conv1d_same, shared by both layers
    bmask = {}
    for tau in range(ffn_ks):
        off = tau - pad
        if off != 0:
            bmask[off] = ((i_base + off >= 0) & (i_base + off < Lk)).astype(f32)

    def conv1d_same(t_in, w, bias_row):
        pieces = []
        for tau in range(ffn_ks):
            off = tau - pad
            if off == 0:
                pieces.append(t_in)
            else:
                sh = pltpu.roll(t_in, shift=(-off) % Lk, axis=0)
                pieces.append(sh * bmask[off])
        cat = jnp.concatenate(pieces, axis=-1)                  # (L, ks*C)
        return jnp.dot(cat, w, precision=_PREC,
                       preferred_element_type=f32) + bias_row

    h1 = jnp.maximum(conv1d_same(x1 * mcol, w1, b1), 0.0)
    ffn_out = conv1d_same(h1 * mcol, w2, b2) * mcol

    out_ref[...] = _layer_norm(x1 + ffn_out, g2, be2, eps)


# ------------------------------- wrapper --------------------------------------
def _full_spec(shape):
    n = len(shape)
    return pl.BlockSpec(shape, lambda b, _n=n: (0,) * _n)


def relative_attention_transformer_block(x_bcl, x_mask_b1l, params):
    B_, C, L_ = x_bcl.shape
    assert C == HIDDEN and L_ >= NUM_TAPS

    # channels-last; per-row mask column rides along with x (one operand)
    x2d = jnp.transpose(x_bcl, (0, 2, 1)).reshape(B_ * L_, C)
    mcol = jnp.transpose(x_mask_b1l, (0, 2, 1)).reshape(B_ * L_, 1)
    xm = jnp.concatenate([x2d, mcol], axis=1)                    # (B*L, C+1)
    kmask = x_mask_b1l.astype(jnp.float32)                       # (B, 1, L)

    # fused q/k/v + output-projection weights in one slab; qkv bias as a row
    wqkv = jnp.concatenate([params['wq'], params['wk'], params['wv']], axis=1)
    bqkv = jnp.concatenate([params['bq'], params['bk'], params['bv']])[None, :]
    wbig = jnp.concatenate(
        [jnp.concatenate([wqkv, params['wo']], axis=1),
         jnp.concatenate([bqkv, jnp.zeros((1, C), jnp.float32)], axis=1)],
        axis=0)                                                  # (C+1, 4C)

    # FFN taps stacked along the input-channel axis; both layers side by side
    wffn = jnp.concatenate([params['w1'].reshape(KERNEL_SIZE * C, HIDDEN),
                            params['w2'].reshape(KERNEL_SIZE * HIDDEN, OUT_CH)],
                           axis=1)                               # (ks*C, 2C)

    # relative tap tables zero-padded to L rows per head (no in-kernel slicing)
    def pad_taps(e):
        z = jnp.zeros((NUM_HEADS, L_, HEAD_DIM), jnp.float32)
        return z.at[:, :NUM_TAPS, :].set(e).reshape(NUM_HEADS * L_, HEAD_DIM)
    embs = jnp.concatenate([pad_taps(params['emb_k']), pad_taps(params['emb_v'])],
                           axis=0)                               # (2*H*L, d)

    # the seven per-channel vectors packed into one operand
    vecs = jnp.stack([params['bo'], params['b1'], params['b2'],
                      params['g1'], params['be1'], params['g2'], params['be2']],
                     axis=0)                                     # (7, C)

    kern = functools.partial(
        transformer_block_kernel,
        length=L_, hidden=C, num_heads=NUM_HEADS, head_dim=HEAD_DIM,
        window=WINDOW, ffn_ks=KERNEL_SIZE, eps=LN_EPS)

    out2d = pl.pallas_call(
        kern,
        out_shape=jax.ShapeDtypeStruct((B_ * L_, OUT_CH), jnp.float32),
        grid_spec=pltpu.PrefetchScalarGridSpec(
            num_scalar_prefetch=0,
            grid=(B_,),                        # batch-parallel (megacore on v7x)
            in_specs=[
                pl.BlockSpec((L_, C + 1), lambda b: (b, 0)),      # [x | mask col]
                pl.BlockSpec((1, 1, L_), lambda b: (b, 0, 0)),    # key-position mask
                _full_spec((C + 1, 4 * C)),                       # [Wqkv | Wo ; bqkv]
                _full_spec((KERNEL_SIZE * C, 2 * C)),             # [W1 | W2] taps
                _full_spec((2 * NUM_HEADS * L_, HEAD_DIM)),       # [emb_k ; emb_v]
                _full_spec((7, C)),                               # packed vectors
            ],
            out_specs=pl.BlockSpec((L_, OUT_CH), lambda b: (b, 0)),
        ),
        compiler_params=pltpu.CompilerParams(
            dimension_semantics=("parallel",)),
    )(xm, kmask, wbig, wffn, embs, vecs)
    return jnp.transpose(out2d.reshape(B_, L_, OUT_CH), (0, 2, 1))  # (B, C, L)


# ----------------------- pure-JAX reference (torch semantics) -----------------
def _used_relative_embeddings(emb, length):
    # mirrors RelativeMultiHeadAttention._get_relative_embeddings
    start = max(0, WINDOW - length + 1)
    pad_len = max(0, length - WINDOW - 1)
    padded = jnp.pad(emb, ((0, 0), (pad_len, pad_len), (0, 0)))
    return padded[:, start:start + 2 * length - 1, :]


def reference_forward(x, x_mask, params):
    Bx, C, Lx = x.shape
    H, D = NUM_HEADS, HEAD_DIM
    scale = 1.0 / math.sqrt(D)

    def conv1x1(t, w, b):
        return jnp.einsum('bcl,cd->bdl', t, w) + b[None, :, None]

    q = conv1x1(x, params['wq'], params['bq'])
    k = conv1x1(x, params['wk'], params['bk'])
    v = conv1x1(x, params['wv'], params['bv'])

    def split(t):
        return jnp.transpose(t.reshape(Bx, H, D, Lx), (0, 1, 3, 2))
    qh, kh, vh = split(q), split(k), split(v)

    score = jnp.einsum('bhld,bhmd->bhlm', qh, kh) * scale

    ek = _used_relative_embeddings(params['emb_k'], Lx)
    s_rel = jnp.einsum('bhld,hrd->bhlr', qh, ek)
    s_rel = jnp.pad(s_rel, ((0, 0), (0, 0), (0, 0), (0, 1)))
    s_rel = s_rel.reshape(Bx, H, Lx * 2 * Lx)
    s_rel = jnp.pad(s_rel, ((0, 0), (0, 0), (0, Lx - 1)))
    s_rel = s_rel.reshape(Bx, H, Lx + 1, 2 * Lx - 1)[:, :, :Lx, Lx - 1:]
    score = score + s_rel * scale

    attn_mask = x_mask[:, :, None, :] * x_mask[:, :, :, None]
    score = jnp.where(attn_mask == 0, NEG, score)
    p = jax.nn.softmax(score, axis=-1)
    res = jnp.einsum('bhlm,bhmd->bhld', p, vh)

    rw = jnp.pad(p, ((0, 0), (0, 0), (0, 0), (0, Lx - 1)))
    rw = rw.reshape(Bx, H, Lx * (2 * Lx - 1))
    rw = jnp.pad(rw, ((0, 0), (0, 0), (Lx, 0)))
    rw = rw.reshape(Bx, H, Lx, 2 * Lx)[:, :, :, 1:]
    ev = _used_relative_embeddings(params['emb_v'], Lx)
    res = res + jnp.einsum('bhlr,hrd->bhld', rw, ev)

    res = jnp.transpose(res, (0, 1, 3, 2)).reshape(Bx, C, Lx)
    attn_out = conv1x1(res, params['wo'], params['bo'])

    def layer_norm(t, g, b):
        mu = jnp.mean(t, axis=1, keepdims=True)
        var = jnp.mean((t - mu) ** 2, axis=1, keepdims=True)
        return (t - mu) / jnp.sqrt(var + LN_EPS) * g[None, :, None] + b[None, :, None]

    x1 = layer_norm(x + attn_out, params['g1'], params['be1'])

    pad = KERNEL_SIZE // 2
    def conv_same(t, w, b):
        tp = jnp.pad(t, ((0, 0), (0, 0), (pad, pad)))
        acc = b[None, :, None]
        for tau in range(KERNEL_SIZE):
            acc = acc + jnp.einsum('bcl,cd->bdl', tp[:, :, tau:tau + Lx], w[tau])
        return acc

    h1 = conv_same(x1 * x_mask, params['w1'], params['b1'])
    h1 = jnp.maximum(h1, 0.0)
    h2 = conv_same(h1 * x_mask, params['w2'], params['b2'])
    ffn_out = h2 * x_mask

    return layer_norm(x1 + ffn_out, params['g2'], params['be2'])


# ---------------------------------- main --------------------------------------
if __name__ == "__main__":
    key = jax.random.PRNGKey(0)
    ks = jax.random.split(key, 20)
    C = HIDDEN
    rel_std = HEAD_DIM ** (-0.5)

    params = {
        'wq': jax.random.normal(ks[0], (C, C), jnp.float32) * 0.2,
        'bq': jax.random.normal(ks[1], (C,), jnp.float32) * 0.05,
        'wk': jax.random.normal(ks[2], (C, C), jnp.float32) * 0.2,
        'bk': jax.random.normal(ks[3], (C,), jnp.float32) * 0.05,
        'wv': jax.random.normal(ks[4], (C, C), jnp.float32) * 0.2,
        'bv': jax.random.normal(ks[5], (C,), jnp.float32) * 0.05,
        'wo': jax.random.normal(ks[6], (C, C), jnp.float32) * 0.2,
        'bo': jax.random.normal(ks[7], (C,), jnp.float32) * 0.05,
        'emb_k': jax.random.normal(ks[8], (NUM_HEADS, NUM_TAPS, HEAD_DIM),
                                   jnp.float32) * rel_std,
        'emb_v': jax.random.normal(ks[9], (NUM_HEADS, NUM_TAPS, HEAD_DIM),
                                   jnp.float32) * rel_std,
        'w1': jax.random.normal(ks[10], (KERNEL_SIZE, C, HIDDEN), jnp.float32) * 0.2,
        'b1': jax.random.normal(ks[11], (HIDDEN,), jnp.float32) * 0.05,
        'w2': jax.random.normal(ks[12], (KERNEL_SIZE, HIDDEN, OUT_CH), jnp.float32) * 0.2,
        'b2': jax.random.normal(ks[13], (OUT_CH,), jnp.float32) * 0.05,
        'g1': jnp.ones((HIDDEN,), jnp.float32),
        'be1': jnp.zeros((HIDDEN,), jnp.float32),
        'g2': jnp.ones((OUT_CH,), jnp.float32),
        'be2': jnp.zeros((OUT_CH,), jnp.float32),
    }

    x = jax.random.normal(ks[14], (B, C, L), jnp.float32)
    lengths = jnp.array([L, 12])
    x_mask = (jnp.arange(L)[None, :] < lengths[:, None]
              ).astype(jnp.float32)[:, None, :]          # (B, 1, L)

    out = relative_attention_transformer_block(x, x_mask, params)
    out = jax.block_until_ready(out)

    # Reference evaluated with exact (f32) matmuls; the kernel uses the same
    # per-dot precision and an exact softmax divide, so the tolerance is tight.
    with jax.default_matmul_precision("highest"):
        ref = reference_forward(x, x_mask, params)
    err = float(jnp.max(jnp.abs(out - ref)))
    assert err < 1e-4, f"kernel/reference mismatch: max abs err {err}"
    print("KERNEL_OK")
</pallas_src>

<mosaic_0001>
module attributes {stable_mosaic.version = 11 : i64} {
  func.func @transformer_block_kernel(%arg0: i32, %arg1: memref<16x33xf32, #tpu.memory_space<vmem>>, %arg2: memref<1x1x16xf32, #tpu.memory_space<vmem>>, %arg3: memref<33x128xf32, #tpu.memory_space<vmem>>, %arg4: memref<96x64xf32, #tpu.memory_space<vmem>>, %arg5: memref<128x8xf32, #tpu.memory_space<vmem>>, %arg6: memref<7x32xf32, #tpu.memory_space<vmem>>, %arg7: memref<16x32xf32, #tpu.memory_space<vmem>>) attributes {dimension_semantics = [#tpu.dimension_semantics<parallel>], iteration_bounds = array<i64: 2>, scalar_prefetch = 0 : i64, scratch_operands = 0 : i64, tpu.core_type = #tpu.core_type<tc>, window_params = [{transform_indices = @transform_0, window_bounds = array<i64: 16, 33>}, {transform_indices = @transform_1, window_bounds = array<i64: 1, 1, 16>}, {pipeline_mode = #tpu.pipeline_mode<synchronous>, transform_indices = @transform_2, window_bounds = array<i64: 33, 128>}, {pipeline_mode = #tpu.pipeline_mode<synchronous>, transform_indices = @transform_3, window_bounds = array<i64: 96, 64>}, {pipeline_mode = #tpu.pipeline_mode<synchronous>, transform_indices = @transform_4, window_bounds = array<i64: 128, 8>}, {pipeline_mode = #tpu.pipeline_mode<synchronous>, transform_indices = @transform_5, window_bounds = array<i64: 7, 32>}, {transform_indices = @transform_6, window_bounds = array<i64: 16, 32>}]} {
    %c0 = arith.constant 0 : index
    %c0_0 = arith.constant 0 : index
    %0 = vector.load %arg1[%c0, %c0_0] : memref<16x33xf32, #tpu.memory_space<vmem>>, vector<16x32xf32>
    %c0_1 = arith.constant 0 : index
    %c32 = arith.constant 32 : index
    %1 = vector.load %arg1[%c0_1, %c32] : memref<16x33xf32, #tpu.memory_space<vmem>>, vector<16x1xf32>
    %c0_2 = arith.constant 0 : index
    %c0_3 = arith.constant 0 : index
    %c0_4 = arith.constant 0 : index
    %2 = vector.load %arg2[%c0_2, %c0_3, %c0_4] : memref<1x1x16xf32, #tpu.memory_space<vmem>>, vector<1x1x16xf32>
    %3 = vector.shape_cast %2 : vector<1x1x16xf32> to vector<1x16xf32>
    %c0_5 = arith.constant 0 : index
    %c0_6 = arith.constant 0 : index
    %4 = vector.load %arg3[%c0_5, %c0_6] : memref<33x128xf32, #tpu.memory_space<vmem>>, vector<32x96xf32>
    %c0_7 = arith.constant 0 : index
    %c96 = arith.constant 96 : index
    %5 = vector.load %arg3[%c0_7, %c96] : memref<33x128xf32, #tpu.memory_space<vmem>>, vector<32x32xf32>
    %c32_8 = arith.constant 32 : index
    %c0_9 = arith.constant 0 : index
    %6 = vector.load %arg3[%c32_8, %c0_9] : memref<33x128xf32, #tpu.memory_space<vmem>>, vector<1x96xf32>
    %c0_10 = arith.constant 0 : index
    %c0_11 = arith.constant 0 : index
    %7 = vector.load %arg4[%c0_10, %c0_11] : memref<96x64xf32, #tpu.memory_space<vmem>>, vector<96x32xf32>
    %c0_12 = arith.constant 0 : index
    %c32_13 = arith.constant 32 : index
    %8 = vector.load %arg4[%c0_12, %c32_13] : memref<96x64xf32, #tpu.memory_space<vmem>>, vector<96x32xf32>
    %c0_14 = arith.constant 0 : index
    %c0_15 = arith.constant 0 : index
    %9 = vector.load %arg6[%c0_14, %c0_15] : memref<7x32xf32, #tpu.memory_space<vmem>>, vector<7x32xf32>
    %10 = vector.extract_strided_slice %9 {offsets = [0, 0], sizes = [1, 32], strides = [1, 1]} : vector<7x32xf32> to vector<1x32xf32>
    %11 = vector.extract_strided_slice %9 {offsets = [1, 0], sizes = [1, 32], strides = [1, 1]} : vector<7x32xf32> to vector<1x32xf32>
    %12 = vector.extract_strided_slice %9 {offsets = [2, 0], sizes = [1, 32], strides = [1, 1]} : vector<7x32xf32> to vector<1x32xf32>
    %13 = vector.extract_strided_slice %9 {offsets = [3, 0], sizes = [1, 32], strides = [1, 1]} : vector<7x32xf32> to vector<1x32xf32>
    %14 = vector.extract_strided_slice %9 {offsets = [4, 0], sizes = [1, 32], strides = [1, 1]} : vector<7x32xf32> to vector<1x32xf32>
    %15 = vector.extract_strided_slice %9 {offsets = [5, 0], sizes = [1, 32], strides = [1, 1]} : vector<7x32xf32> to vector<1x32xf32>
    %16 = vector.extract_strided_slice %9 {offsets = [6, 0], sizes = [1, 32], strides = [1, 1]} : vector<7x32xf32> to vector<1x32xf32>
    %c0_16 = arith.constant 0 : index
    %c0_17 = arith.constant 0 : index
    %17 = vector.load %arg5[%c0_16, %c0_17] : memref<128x8xf32, #tpu.memory_space<vmem>>, vector<128x8xf32>
    %18 = vector.extract_strided_slice %17 {offsets = [0, 0], sizes = [64, 8], strides = [1, 1]} : vector<128x8xf32> to vector<64x8xf32>
    %19 = vector.shape_cast %18 : vector<64x8xf32> to vector<4x16x8xf32>
    %20 = vector.extract_strided_slice %17 {offsets = [64, 0], sizes = [64, 8], strides = [1, 1]} : vector<128x8xf32> to vector<64x8xf32>
    %21 = vector.shape_cast %20 : vector<64x8xf32> to vector<4x16x8xf32>
    %cst = arith.constant dense<0.000000e+00> : vector<16x96xf32>
    %22 = tpu.matmul %0, %4, %cst {dimension_numbers = #tpu.dot_dimension_numbers<[1], [0], [0], [1], [0, 0, 1, 1], [], []>, precision = #tpu.contract_precision<fp32>} : vector<16x32xf32>, vector<32x96xf32>, vector<16x96xf32> -> vector<16x96xf32>
    %23 = vector.broadcast %6 : vector<1x96xf32> to vector<16x96xf32>
    %24 = arith.addf %22, %23 : vector<16x96xf32>
    %25 = vector.extract_strided_slice %24 {offsets = [0, 0], sizes = [16, 32], strides = [1, 1]} : vector<16x96xf32> to vector<16x32xf32>
    %cst_18 = arith.constant 0.353553385 : f32
    %26 = vector.broadcast %cst_18 : f32 to vector<16x32xf32>
    %27 = arith.mulf %25, %26 : vector<16x32xf32>
    %28 = vector.extract_strided_slice %24 {offsets = [0, 32], sizes = [16, 32], strides = [1, 1]} : vector<16x96xf32> to vector<16x32xf32>
    %29 = vector.extract_strided_slice %24 {offsets = [0, 64], sizes = [16, 32], strides = [1, 1]} : vector<16x96xf32> to vector<16x32xf32>
    %30 = vector.extract_strided_slice %27 {offsets = [0, 0], sizes = [16, 8], strides = [1, 1]} : vector<16x32xf32> to vector<16x8xf32>
    %31 = vector.extract_strided_slice %27 {offsets = [0, 8], sizes = [16, 8], strides = [1, 1]} : vector<16x32xf32> to vector<16x8xf32>
    %32 = vector.extract_strided_slice %27 {offsets = [0, 16], sizes = [16, 8], strides = [1, 1]} : vector<16x32xf32> to vector<16x8xf32>
    %33 = vector.extract_strided_slice %27 {offsets = [0, 24], sizes = [16, 8], strides = [1, 1]} : vector<16x32xf32> to vector<16x8xf32>
    %34 = tpu.concatenate %30, %31, %32, %33 in 0 : vector<16x8xf32>, vector<16x8xf32>, vector<16x8xf32>, vector<16x8xf32> -> vector<64x8xf32>
    %35 = vector.shape_cast %34 : vector<64x8xf32> to vector<4x16x8xf32>
    %36 = vector.extract_strided_slice %28 {offsets = [0, 0], sizes = [16, 8], strides = [1, 1]} : vector<16x32xf32> to vector<16x8xf32>
    %37 = vector.extract_strided_slice %28 {offsets = [0, 8], sizes = [16, 8], strides = [1, 1]} : vector<16x32xf32> to vector<16x8xf32>
    %38 = vector.extract_strided_slice %28 {offsets = [0, 16], sizes = [16, 8], strides = [1, 1]} : vector<16x32xf32> to vector<16x8xf32>
    %39 = vector.extract_strided_slice %28 {offsets = [0, 24], sizes = [16, 8], strides = [1, 1]} : vector<16x32xf32> to vector<16x8xf32>
    %40 = tpu.concatenate %36, %37, %38, %39 in 0 : vector<16x8xf32>, vector<16x8xf32>, vector<16x8xf32>, vector<16x8xf32> -> vector<64x8xf32>
    %41 = vector.shape_cast %40 : vector<64x8xf32> to vector<4x16x8xf32>
    %42 = vector.extract_strided_slice %29 {offsets = [0, 0], sizes = [16, 8], strides = [1, 1]} : vector<16x32xf32> to vector<16x8xf32>
    %43 = vector.extract_strided_slice %29 {offsets = [0, 8], sizes = [16, 8], strides = [1, 1]} : vector<16x32xf32> to vector<16x8xf32>
    %44 = vector.extract_strided_slice %29 {offsets = [0, 16], sizes = [16, 8], strides = [1, 1]} : vector<16x32xf32> to vector<16x8xf32>
    %45 = vector.extract_strided_slice %29 {offsets = [0, 24], sizes = [16, 8], strides = [1, 1]} : vector<16x32xf32> to vector<16x8xf32>
    %46 = tpu.concatenate %42, %43, %44, %45 in 0 : vector<16x8xf32>, vector<16x8xf32>, vector<16x8xf32>, vector<16x8xf32> -> vector<64x8xf32>
    %47 = vector.shape_cast %46 : vector<64x8xf32> to vector<4x16x8xf32>
    "tpu.trace_start"() <{level = 10 : i32, message = "hid,hjd->hij"}> : () -> ()
    %cst_19 = arith.constant dense<0.000000e+00> : vector<4x16x16xf32>
    %48 = tpu.matmul %35, %41, %cst_19 {dimension_numbers = #tpu.dot_dimension_numbers<[2], [2], [1], [1], [0, 0, 0, 1, 1, 1], [0], [0]>, precision = #tpu.contract_precision<fp32>} : vector<4x16x8xf32>, vector<4x16x8xf32>, vector<4x16x16xf32> -> vector<4x16x16xf32>
    "tpu.trace_stop"() : () -> ()
    %49 = vector.shape_cast %48 : vector<4x16x16xf32> to vector<64x16xf32>
    "tpu.trace_start"() <{level = 10 : i32, message = "hid,htd->hit"}> : () -> ()
    %cst_20 = arith.constant dense<0.000000e+00> : vector<4x16x16xf32>
    %50 = tpu.matmul %35, %19, %cst_20 {dimension_numbers = #tpu.dot_dimension_numbers<[2], [2], [1], [1], [0, 0, 0, 1, 1, 1], [0], [0]>, precision = #tpu.contract_precision<fp32>} : vector<4x16x8xf32>, vector<4x16x8xf32>, vector<4x16x16xf32> -> vector<4x16x16xf32>
    "tpu.trace_stop"() : () -> ()
    %51 = vector.shape_cast %50 : vector<4x16x16xf32> to vector<64x16xf32>
    %52 = tpu.iota {dimensions = array<i32: 1>} : vector<64x16xi32>
    %53 = tpu.iota {dimensions = array<i32: 0>} : vector<16x1xi32>
    %54 = tpu.concatenate %53, %53, %53, %53 in 0 : vector<16x1xi32>, vector<16x1xi32>, vector<16x1xi32>, vector<16x1xi32> -> vector<64x1xi32>
    %55 = vector.broadcast %54 : vector<64x1xi32> to vector<64x16xi32>
    %56 = arith.subi %52, %55 : vector<64x16xi32>
    %c-4_i32 = arith.constant -4 : i32
    %57 = vector.broadcast %c-4_i32 : i32 to vector<64x16xi32>
    %58 = arith.cmpi eq, %56, %57 : vector<64x16xi32>
    %59 = vector.extract_strided_slice %51 {offsets = [0, 0], sizes = [64, 1], strides = [1, 1]} : vector<64x16xf32> to vector<64x1xf32>
    %cst_21 = arith.constant 0.000000e+00 : f32
    %60 = vector.shape_cast %59 : vector<64x1xf32> to vector<64x1xf32>
    %61 = vector.broadcast %60 : vector<64x1xf32> to vector<64x16xf32>
    %62 = vector.broadcast %cst_21 : f32 to vector<64x16xf32>
    %63 = arith.select %58, %61, %62 : vector<64x16xi1>, vector<64x16xf32>
    %64 = arith.addf %49, %63 : vector<64x16xf32>
    %c-3_i32 = arith.constant -3 : i32
    %65 = vector.broadcast %c-3_i32 : i32 to vector<64x16xi32>
    %66 = arith.cmpi eq, %56, %65 : vector<64x16xi32>
    %67 = vector.extract_strided_slice %51 {offsets = [0, 1], sizes = [64, 1], strides = [1, 1]} : vector<64x16xf32> to vector<64x1xf32>
    %cst_22 = arith.constant 0.000000e+00 : f32
    %68 = vector.shape_cast %67 : vector<64x1xf32> to vector<64x1xf32>
    %69 = vector.broadcast %68 : vector<64x1xf32> to vector<64x16xf32>
    %70 = vector.broadcast %cst_22 : f32 to vector<64x16xf32>
    %71 = arith.select %66, %69, %70 : vector<64x16xi1>, vector<64x16xf32>
    %72 = arith.addf %64, %71 : vector<64x16xf32>
    %c-2_i32 = arith.constant -2 : i32
    %73 = vector.broadcast %c-2_i32 : i32 to vector<64x16xi32>
    %74 = arith.cmpi eq, %56, %73 : vector<64x16xi32>
    %75 = vector.extract_strided_slice %51 {offsets = [0, 2], sizes = [64, 1], strides = [1, 1]} : vector<64x16xf32> to vector<64x1xf32>
    %cst_23 = arith.constant 0.000000e+00 : f32
    %76 = vector.shape_cast %75 : vector<64x1xf32> to vector<64x1xf32>
    %77 = vector.broadcast %76 : vector<64x1xf32> to vector<64x16xf32>
    %78 = vector.broadcast %cst_23 : f32 to vector<64x16xf32>
    %79 = arith.select %74, %77, %78 : vector<64x16xi1>, vector<64x16xf32>
    %80 = arith.addf %72, %79 : vector<64x16xf32>
    %c-1_i32 = arith.constant -1 : i32
    %81 = vector.broadcast %c-1_i32 : i32 to vector<64x16xi32>
    %82 = arith.cmpi eq, %56, %81 : vector<64x16xi32>
    %83 = vector.extract_strided_slice %51 {offsets = [0, 3], sizes = [64, 1], strides = [1, 1]} : vector<64x16xf32> to vector<64x1xf32>
    %cst_24 = arith.constant 0.000000e+00 : f32
    %84 = vector.shape_cast %83 : vector<64x1xf32> to vector<64x1xf32>
    %85 = vector.broadcast %84 : vector<64x1xf32> to vector<64x16xf32>
    %86 = vector.broadcast %cst_24 : f32 to vector<64x16xf32>
    %87 = arith.select %82, %85, %86 : vector<64x16xi1>, vector<64x16xf32>
    %88 = arith.addf %80, %87 : vector<64x16xf32>
    %c0_i32 = arith.constant 0 : i32
    %89 = vector.broadcast %c0_i32 : i32 to vector<64x16xi32>
    %90 = arith.cmpi eq, %56, %89 : vector<64x16xi32>
    %91 = vector.extract_strided_slice %51 {offsets = [0, 4], sizes = [64, 1], strides = [1, 1]} : vector<64x16xf32> to vector<64x1xf32>
    %cst_25 = arith.constant 0.000000e+00 : f32
    %92 = vector.shape_cast %91 : vector<64x1xf32> to vector<64x1xf32>
    %93 = vector.broadcast %92 : vector<64x1xf32> to vector<64x16xf32>
    %94 = vector.broadcast %cst_25 : f32 to vector<64x16xf32>
    %95 = arith.select %90, %93, %94 : vector<64x16xi1>, vector<64x16xf32>
    %96 = arith.addf %88, %95 : vector<64x16xf32>
    %c1_i32 = arith.constant 1 : i32
    %97 = vector.broadcast %c1_i32 : i32 to vector<64x16xi32>
    %98 = arith.cmpi eq, %56, %97 : vector<64x16xi32>
    %99 = vector.extract_strided_slice %51 {offsets = [0, 5], sizes = [64, 1], strides = [1, 1]} : vector<64x16xf32> to vector<64x1xf32>
    %cst_26 = arith.constant 0.000000e+00 : f32
    %100 = vector.shape_cast %99 : vector<64x1xf32> to vector<64x1xf32>
    %101 = vector.broadcast %100 : vector<64x1xf32> to vector<64x16xf32>
    %102 = vector.broadcast %cst_26 : f32 to vector<64x16xf32>
    %103 = arith.select %98, %101, %102 : vector<64x16xi1>, vector<64x16xf32>
    %104 = arith.addf %96, %103 : vector<64x16xf32>
    %c2_i32 = arith.constant 2 : i32
    %105 = vector.broadcast %c2_i32 : i32 to vector<64x16xi32>
    %106 = arith.cmpi eq, %56, %105 : vector<64x16xi32>
    %107 = vector.extract_strided_slice %51 {offsets = [0, 6], sizes = [64, 1], strides = [1, 1]} : vector<64x16xf32> to vector<64x1xf32>
    %cst_27 = arith.constant 0.000000e+00 : f32
    %108 = vector.shape_cast %107 : vector<64x1xf32> to vector<64x1xf32>
    %109 = vector.broadcast %108 : vector<64x1xf32> to vector<64x16xf32>
    %110 = vector.broadcast %cst_27 : f32 to vector<64x16xf32>
    %111 = arith.select %106, %109, %110 : vector<64x16xi1>, vector<64x16xf32>
    %112 = arith.addf %104, %111 : vector<64x16xf32>
    %c3_i32 = arith.constant 3 : i32
    %113 = vector.broadcast %c3_i32 : i32 to vector<64x16xi32>
    %114 = arith.cmpi eq, %56, %113 : vector<64x16xi32>
    %115 = vector.extract_strided_slice %51 {offsets = [0, 7], sizes = [64, 1], strides = [1, 1]} : vector<64x16xf32> to vector<64x1xf32>
    %cst_28 = arith.constant 0.000000e+00 : f32
    %116 = vector.shape_cast %115 : vector<64x1xf32> to vector<64x1xf32>
    %117 = vector.broadcast %116 : vector<64x1xf32> to vector<64x16xf32>
    %118 = vector.broadcast %cst_28 : f32 to vector<64x16xf32>
    %119 = arith.select %114, %117, %118 : vector<64x16xi1>, vector<64x16xf32>
    %120 = arith.addf %112, %119 : vector<64x16xf32>
    %c4_i32 = arith.constant 4 : i32
    %121 = vector.broadcast %c4_i32 : i32 to vector<64x16xi32>
    %122 = arith.cmpi eq, %56, %121 : vector<64x16xi32>
    %123 = vector.extract_strided_slice %51 {offsets = [0, 8], sizes = [64, 1], strides = [1, 1]} : vector<64x16xf32> to vector<64x1xf32>
    %cst_29 = arith.constant 0.000000e+00 : f32
    %124 = vector.shape_cast %123 : vector<64x1xf32> to vector<64x1xf32>
    %125 = vector.broadcast %124 : vector<64x1xf32> to vector<64x16xf32>
    %126 = vector.broadcast %cst_29 : f32 to vector<64x16xf32>
    %127 = arith.select %122, %125, %126 : vector<64x16xi1>, vector<64x16xf32>
    %128 = arith.addf %120, %127 : vector<64x16xf32>
    %129 = vector.shape_cast %3 : vector<1x16xf32> to vector<1x16xf32>
    %130 = vector.broadcast %129 : vector<1x16xf32> to vector<64x16xf32>
    %131 = tpu.concatenate %1, %1, %1, %1 in 0 : vector<16x1xf32>, vector<16x1xf32>, vector<16x1xf32>, vector<16x1xf32> -> vector<64x1xf32>
    %132 = vector.broadcast %131 : vector<64x1xf32> to vector<64x16xf32>
    %133 = arith.mulf %130, %132 : vector<64x16xf32>
    %cst_30 = arith.constant 0.000000e+00 : f32
    %134 = vector.broadcast %cst_30 : f32 to vector<64x16xf32>
    %135 = arith.cmpf oeq, %133, %134 : vector<64x16xf32>
    %cst_31 = arith.constant -1.000000e+05 : f32
    %136 = vector.broadcast %cst_31 : f32 to vector<64x16xf32>
    %137 = arith.select %135, %136, %128 : vector<64x16xi1>, vector<64x16xf32>
    %cst_32 = arith.constant dense<0xFF800000> : vector<64xf32>
    %138 = vector.multi_reduction <maximumf>, %137, %cst_32 [1] : vector<64x16xf32> to vector<64xf32>
    %139 = vector.shape_cast %138 : vector<64xf32> to vector<64x1xf32>
    %140 = vector.broadcast %139 : vector<64x1xf32> to vector<64x16xf32>
    %141 = arith.subf %137, %140 : vector<64x16xf32>
    %142 = math.exp %141 : vector<64x16xf32>
    %cst_33 = arith.constant dense<0.000000e+00> : vector<64xf32>
    %143 = vector.multi_reduction <add>, %142, %cst_33 [1] : vector<64x16xf32> to vector<64xf32>
    %144 = vector.shape_cast %143 : vector<64xf32> to vector<64x1xf32>
    %145 = vector.broadcast %144 : vector<64x1xf32> to vector<64x16xf32>
    %146 = arith.divf %142, %145 : vector<64x16xf32>
    %147 = vector.shape_cast %146 : vector<64x16xf32> to vector<4x16x16xf32>
    "tpu.trace_start"() <{level = 10 : i32, message = "hij,hjd->hid"}> : () -> ()
    %cst_34 = arith.constant dense<0.000000e+00> : vector<4x16x8xf32>
    %148 = tpu.matmul %147, %47, %cst_34 {dimension_numbers = #tpu.dot_dimension_numbers<[2], [1], [1], [2], [0, 0, 0, 1, 1, 2], [0], [0]>, precision = #tpu.contract_precision<fp32>} : vector<4x16x16xf32>, vector<4x16x8xf32>, vector<4x16x8xf32> -> vector<4x16x8xf32>
    "tpu.trace_stop"() : () -> ()
    %149 = vector.shape_cast %148 : vector<4x16x8xf32> to vector<64x8xf32>
    %cst_35 = arith.constant 0.000000e+00 : f32
    %150 = vector.broadcast %cst_35 : f32 to vector<64x16xf32>
    %c-4_i32_36 = arith.constant -4 : i32
    %151 = vector.broadcast %c-4_i32_36 : i32 to vector<64x16xi32>
    %152 = arith.cmpi eq, %56, %151 : vector<64x16xi32>
    %cst_37 = arith.constant 0.000000e+00 : f32
    %153 = vector.broadcast %cst_37 : f32 to vector<64x16xf32>
    %154 = arith.select %152, %146, %153 : vector<64x16xi1>, vector<64x16xf32>
    %cst_38 = arith.constant dense<0.000000e+00> : vector<64xf32>
    %155 = vector.multi_reduction <add>, %154, %cst_38 [1] : vector<64x16xf32> to vector<64xf32>
    %156 = vector.shape_cast %155 : vector<64xf32> to vector<64x1xf32>
    %c0_i32_39 = arith.constant 0 : i32
    %157 = vector.broadcast %c0_i32_39 : i32 to vector<64x16xi32>
    %158 = arith.cmpi eq, %52, %157 : vector<64x16xi32>
    %cst_40 = arith.constant 0.000000e+00 : f32
    %159 = vector.shape_cast %156 : vector<64x1xf32> to vector<64x1xf32>
    %160 = vector.broadcast %159 : vector<64x1xf32> to vector<64x16xf32>
    %161 = vector.broadcast %cst_40 : f32 to vector<64x16xf32>
    %162 = arith.select %158, %160, %161 : vector<64x16xi1>, vector<64x16xf32>
    %163 = arith.addf %150, %162 : vector<64x16xf32>
    %c-3_i32_41 = arith.constant -3 : i32
    %164 = vector.broadcast %c-3_i32_41 : i32 to vector<64x16xi32>
    %165 = arith.cmpi eq, %56, %164 : vector<64x16xi32>
    %cst_42 = arith.constant 0.000000e+00 : f32
    %166 = vector.broadcast %cst_42 : f32 to vector<64x16xf32>
    %167 = arith.select %165, %146, %166 : vector<64x16xi1>, vector<64x16xf32>
    %cst_43 = arith.constant dense<0.000000e+00> : vector<64xf32>
    %168 = vector.multi_reduction <add>, %167, %cst_43 [1] : vector<64x16xf32> to vector<64xf32>
    %169 = vector.shape_cast %168 : vector<64xf32> to vector<64x1xf32>
    %c1_i32_44 = arith.constant 1 : i32
    %170 = vector.broadcast %c1_i32_44 : i32 to vector<64x16xi32>
    %171 = arith.cmpi eq, %52, %170 : vector<64x16xi32>
    %cst_45 = arith.constant 0.000000e+00 : f32
    %172 = vector.shape_cast %169 : vector<64x1xf32> to vector<64x1xf32>
    %173 = vector.broadcast %172 : vector<64x1xf32> to vector<64x16xf32>
    %174 = vector.broadcast %cst_45 : f32 to vector<64x16xf32>
    %175 = arith.select %171, %173, %174 : vector<64x16xi1>, vector<64x16xf32>
    %176 = arith.addf %163, %175 : vector<64x16xf32>
    %c-2_i32_46 = arith.constant -2 : i32
    %177 = vector.broadcast %c-2_i32_46 : i32 to vector<64x16xi32>
    %178 = arith.cmpi eq, %56, %177 : vector<64x16xi32>
    %cst_47 = arith.constant 0.000000e+00 : f32
    %179 = vector.broadcast %cst_47 : f32 to vector<64x16xf32>
    %180 = arith.select %178, %146, %179 : vector<64x16xi1>, vector<64x16xf32>
    %cst_48 = arith.constant dense<0.000000e+00> : vector<64xf32>
    %181 = vector.multi_reduction <add>, %180, %cst_48 [1] : vector<64x16xf32> to vector<64xf32>
    %182 = vector.shape_cast %181 : vector<64xf32> to vector<64x1xf32>
    %c2_i32_49 = arith.constant 2 : i32
    %183 = vector.broadcast %c2_i32_49 : i32 to vector<64x16xi32>
    %184 = arith.cmpi eq, %52, %183 : vector<64x16xi32>
    %cst_50 = arith.constant 0.000000e+00 : f32
    %185 = vector.shape_cast %182 : vector<64x1xf32> to vector<64x1xf32>
    %186 = vector.broadcast %185 : vector<64x1xf32> to vector<64x16xf32>
    %187 = vector.broadcast %cst_50 : f32 to vector<64x16xf32>
    %188 = arith.select %184, %186, %187 : vector<64x16xi1>, vector<64x16xf32>
    %189 = arith.addf %176, %188 : vector<64x16xf32>
    %c-1_i32_51 = arith.constant -1 : i32
    %190 = vector.broadcast %c-1_i32_51 : i32 to vector<64x16xi32>
    %191 = arith.cmpi eq, %56, %190 : vector<64x16xi32>
    %cst_52 = arith.constant 0.000000e+00 : f32
    %192 = vector.broadcast %cst_52 : f32 to vector<64x16xf32>
    %193 = arith.select %191, %146, %192 : vector<64x16xi1>, vector<64x16xf32>
    %cst_53 = arith.constant dense<0.000000e+00> : vector<64xf32>
    %194 = vector.multi_reduction <add>, %193, %cst_53 [1] : vector<64x16xf32> to vector<64xf32>
    %195 = vector.shape_cast %194 : vector<64xf32> to vector<64x1xf32>
    %c3_i32_54 = arith.constant 3 : i32
    %196 = vector.broadcast %c3_i32_54 : i32 to vector<64x16xi32>
    %197 = arith.cmpi eq, %52, %196 : vector<64x16xi32>
    %cst_55 = arith.constant 0.000000e+00 : f32
    %198 = vector.shape_cast %195 : vector<64x1xf32> to vector<64x1xf32>
    %199 = vector.broadcast %198 : vector<64x1xf32> to vector<64x16xf32>
    %200 = vector.broadcast %cst_55 : f32 to vector<64x16xf32>
    %201 = arith.select %197, %199, %200 : vector<64x16xi1>, vector<64x16xf32>
    %202 = arith.addf %189, %201 : vector<64x16xf32>
    %c0_i32_56 = arith.constant 0 : i32
    %203 = vector.broadcast %c0_i32_56 : i32 to vector<64x16xi32>
    %204 = arith.cmpi eq, %56, %203 : vector<64x16xi32>
    %cst_57 = arith.constant 0.000000e+00 : f32
    %205 = vector.broadcast %cst_57 : f32 to vector<64x16xf32>
    %206 = arith.select %204, %146, %205 : vector<64x16xi1>, vector<64x16xf32>
    %cst_58 = arith.constant dense<0.000000e+00> : vector<64xf32>
    %207 = vector.multi_reduction <add>, %206, %cst_58 [1] : vector<64x16xf32> to vector<64xf32>
    %208 = vector.shape_cast %207 : vector<64xf32> to vector<64x1xf32>
    %c4_i32_59 = arith.constant 4 : i32
    %209 = vector.broadcast %c4_i32_59 : i32 to vector<64x16xi32>
    %210 = arith.cmpi eq, %52, %209 : vector<64x16xi32>
    %cst_60 = arith.constant 0.000000e+00 : f32
    %211 = vector.shape_cast %208 : vector<64x1xf32> to vector<64x1xf32>
    %212 = vector.broadcast %211 : vector<64x1xf32> to vector<64x16xf32>
    %213 = vector.broadcast %cst_60 : f32 to vector<64x16xf32>
    %214 = arith.select %210, %212, %213 : vector<64x16xi1>, vector<64x16xf32>
    %215 = arith.addf %202, %214 : vector<64x16xf32>
    %c1_i32_61 = arith.constant 1 : i32
    %216 = vector.broadcast %c1_i32_61 : i32 to vector<64x16xi32>
    %217 = arith.cmpi eq, %56, %216 : vector<64x16xi32>
    %cst_62 = arith.constant 0.000000e+00 : f32
    %218 = vector.broadcast %cst_62 : f32 to vector<64x16xf32>
    %219 = arith.select %217, %146, %218 : vector<64x16xi1>, vector<64x16xf32>
    %cst_63 = arith.constant dense<0.000000e+00> : vector<64xf32>
    %220 = vector.multi_reduction <add>, %219, %cst_63 [1] : vector<64x16xf32> to vector<64xf32>
    %221 = vector.shape_cast %220 : vector<64xf32> to vector<64x1xf32>
    %c5_i32 = arith.constant 5 : i32
    %222 = vector.broadcast %c5_i32 : i32 to vector<64x16xi32>
    %223 = arith.cmpi eq, %52, %222 : vector<64x16xi32>
    %cst_64 = arith.constant 0.000000e+00 : f32
    %224 = vector.shape_cast %221 : vector<64x1xf32> to vector<64x1xf32>
    %225 = vector.broadcast %224 : vector<64x1xf32> to vector<64x16xf32>
    %226 = vector.broadcast %cst_64 : f32 to vector<64x16xf32>
    %227 = arith.select %223, %225, %226 : vector<64x16xi1>, vector<64x16xf32>
    %228 = arith.addf %215, %227 : vector<64x16xf32>
    %c2_i32_65 = arith.constant 2 : i32
    %229 = vector.broadcast %c2_i32_65 : i32 to vector<64x16xi32>
    %230 = arith.cmpi eq, %56, %229 : vector<64x16xi32>
    %cst_66 = arith.constant 0.000000e+00 : f32
    %231 = vector.broadcast %cst_66 : f32 to vector<64x16xf32>
    %232 = arith.select %230, %146, %231 : vector<64x16xi1>, vector<64x16xf32>
    %cst_67 = arith.constant dense<0.000000e+00> : vector<64xf32>
    %233 = vector.multi_reduction <add>, %232, %cst_67 [1] : vector<64x16xf32> to vector<64xf32>
    %234 = vector.shape_cast %233 : vector<64xf32> to vector<64x1xf32>
    %c6_i32 = arith.constant 6 : i32
    %235 = vector.broadcast %c6_i32 : i32 to vector<64x16xi32>
    %236 = arith.cmpi eq, %52, %235 : vector<64x16xi32>
    %cst_68 = arith.constant 0.000000e+00 : f32
    %237 = vector.shape_cast %234 : vector<64x1xf32> to vector<64x1xf32>
    %238 = vector.broadcast %237 : vector<64x1xf32> to vector<64x16xf32>
    %239 = vector.broadcast %cst_68 : f32 to vector<64x16xf32>
    %240 = arith.select %236, %238, %239 : vector<64x16xi1>, vector<64x16xf32>
    %241 = arith.addf %228, %240 : vector<64x16xf32>
    %c3_i32_69 = arith.constant 3 : i32
    %242 = vector.broadcast %c3_i32_69 : i32 to vector<64x16xi32>
    %243 = arith.cmpi eq, %56, %242 : vector<64x16xi32>
    %cst_70 = arith.constant 0.000000e+00 : f32
    %244 = vector.broadcast %cst_70 : f32 to vector<64x16xf32>
    %245 = arith.select %243, %146, %244 : vector<64x16xi1>, vector<64x16xf32>
    %cst_71 = arith.constant dense<0.000000e+00> : vector<64xf32>
    %246 = vector.multi_reduction <add>, %245, %cst_71 [1] : vector<64x16xf32> to vector<64xf32>
    %247 = vector.shape_cast %246 : vector<64xf32> to vector<64x1xf32>
    %c7_i32 = arith.constant 7 : i32
    %248 = vector.broadcast %c7_i32 : i32 to vector<64x16xi32>
    %249 = arith.cmpi eq, %52, %248 : vector<64x16xi32>
    %cst_72 = arith.constant 0.000000e+00 : f32
    %250 = vector.shape_cast %247 : vector<64x1xf32> to vector<64x1xf32>
    %251 = vector.broadcast %250 : vector<64x1xf32> to vector<64x16xf32>
    %252 = vector.broadcast %cst_72 : f32 to vector<64x16xf32>
    %253 = arith.select %249, %251, %252 : vector<64x16xi1>, vector<64x16xf32>
    %254 = arith.addf %241, %253 : vector<64x16xf32>
    %c4_i32_73 = arith.constant 4 : i32
    %255 = vector.broadcast %c4_i32_73 : i32 to vector<64x16xi32>
    %256 = arith.cmpi eq, %56, %255 : vector<64x16xi32>
    %cst_74 = arith.constant 0.000000e+00 : f32
    %257 = vector.broadcast %cst_74 : f32 to vector<64x16xf32>
    %258 = arith.select %256, %146, %257 : vector<64x16xi1>, vector<64x16xf32>
    %cst_75 = arith.constant dense<0.000000e+00> : vector<64xf32>
    %259 = vector.multi_reduction <add>, %258, %cst_75 [1] : vector<64x16xf32> to vector<64xf32>
    %260 = vector.shape_cast %259 : vector<64xf32> to vector<64x1xf32>
    %c8_i32 = arith.constant 8 : i32
    %261 = vector.broadcast %c8_i32 : i32 to vector<64x16xi32>
    %262 = arith.cmpi eq, %52, %261 : vector<64x16xi32>
    %cst_76 = arith.constant 0.000000e+00 : f32
    %263 = vector.shape_cast %260 : vector<64x1xf32> to vector<64x1xf32>
    %264 = vector.broadcast %263 : vector<64x1xf32> to vector<64x16xf32>
    %265 = vector.broadcast %cst_76 : f32 to vector<64x16xf32>
    %266 = arith.select %262, %264, %265 : vector<64x16xi1>, vector<64x16xf32>
    %267 = arith.addf %254, %266 : vector<64x16xf32>
    %268 = vector.shape_cast %267 : vector<64x16xf32> to vector<4x16x16xf32>
    "tpu.trace_start"() <{level = 10 : i32, message = "hit,htd->hid"}> : () -> ()
    %cst_77 = arith.constant dense<0.000000e+00> : vector<4x16x8xf32>
    %269 = tpu.matmul %268, %21, %cst_77 {dimension_numbers = #tpu.dot_dimension_numbers<[2], [1], [1], [2], [0, 0, 0, 1, 1, 2], [0], [0]>, precision = #tpu.contract_precision<fp32>} : vector<4x16x16xf32>, vector<4x16x8xf32>, vector<4x16x8xf32> -> vector<4x16x8xf32>
    "tpu.trace_stop"() : () -> ()
    %270 = vector.shape_cast %269 : vector<4x16x8xf32> to vector<64x8xf32>
    %271 = arith.addf %149, %270 : vector<64x8xf32>
    %272 = vector.extract_strided_slice %271 {offsets = [0, 0], sizes = [16, 8], strides = [1, 1]} : vector<64x8xf32> to vector<16x8xf32>
    %273 = vector.extract_strided_slice %271 {offsets = [16, 0], sizes = [16, 8], strides = [1, 1]} : vector<64x8xf32> to vector<16x8xf32>
    %274 = vector.extract_strided_slice %271 {offsets = [32, 0], sizes = [16, 8], strides = [1, 1]} : vector<64x8xf32> to vector<16x8xf32>
    %275 = vector.extract_strided_slice %271 {offsets = [48, 0], sizes = [16, 8], strides = [1, 1]} : vector<64x8xf32> to vector<16x8xf32>
    %276 = tpu.concatenate %272, %273, %274, %275 in 1 : vector<16x8xf32>, vector<16x8xf32>, vector<16x8xf32>, vector<16x8xf32> -> vector<16x32xf32>
    %cst_78 = arith.constant dense<0.000000e+00> : vector<16x32xf32>
    %277 = tpu.matmul %276, %5, %cst_78 {dimension_numbers = #tpu.dot_dimension_numbers<[1], [0], [0], [1], [0, 0, 1, 1], [], []>, precision = #tpu.contract_precision<fp32>} : vector<16x32xf32>, vector<32x32xf32>, vector<16x32xf32> -> vector<16x32xf32>
    %278 = vector.broadcast %10 : vector<1x32xf32> to vector<16x32xf32>
    %279 = arith.addf %277, %278 : vector<16x32xf32>
    %280 = arith.addf %0, %279 : vector<16x32xf32>
    %cst_79 = arith.constant dense<0.000000e+00> : vector<16xf32>
    %281 = vector.multi_reduction <add>, %280, %cst_79 [1] : vector<16x32xf32> to vector<16xf32>
    %282 = vector.shape_cast %281 : vector<16xf32> to vector<16x1xf32>
    %cst_80 = arith.constant 3.200000e+01 : f32
    %283 = vector.broadcast %cst_80 : f32 to vector<16x1xf32>
    %284 = arith.divf %282, %283 : vector<16x1xf32>
    %285 = vector.broadcast %284 : vector<16x1xf32> to vector<16x32xf32>
    %286 = arith.subf %280, %285 : vector<16x32xf32>
    %287 = arith.mulf %286, %286 : vector<16x32xf32>
    %cst_81 = arith.constant dense<0.000000e+00> : vector<16xf32>
    %288 = vector.multi_reduction <add>, %287, %cst_81 [1] : vector<16x32xf32> to vector<16xf32>
    %289 = vector.shape_cast %288 : vector<16xf32> to vector<16x1xf32>
    %cst_82 = arith.constant 3.200000e+01 : f32
    %290 = vector.broadcast %cst_82 : f32 to vector<16x1xf32>
    %291 = arith.divf %289, %290 : vector<16x1xf32>
    %292 = vector.broadcast %284 : vector<16x1xf32> to vector<16x32xf32>
    %293 = arith.subf %280, %292 : vector<16x32xf32>
    %cst_83 = arith.constant 9.99999974E-6 : f32
    %294 = vector.broadcast %cst_83 : f32 to vector<16x1xf32>
    %295 = arith.addf %291, %294 : vector<16x1xf32>
    %296 = math.rsqrt %295 : vector<16x1xf32>
    %297 = vector.broadcast %296 : vector<16x1xf32> to vector<16x32xf32>
    %298 = arith.mulf %293, %297 : vector<16x32xf32>
    %299 = vector.broadcast %13 : vector<1x32xf32> to vector<16x32xf32>
    %300 = arith.mulf %298, %299 : vector<16x32xf32>
    %301 = vector.broadcast %14 : vector<1x32xf32> to vector<16x32xf32>
    %302 = arith.addf %300, %301 : vector<16x32xf32>
    %c-1_i32_84 = arith.constant -1 : i32
    %303 = vector.broadcast %c-1_i32_84 : i32 to vector<16x1xi32>
    %304 = arith.addi %53, %303 : vector<16x1xi32>
    %c0_i32_85 = arith.constant 0 : i32
    %305 = vector.broadcast %c0_i32_85 : i32 to vector<16x1xi32>
    %306 = arith.cmpi sge, %304, %305 : vector<16x1xi32>
    %c-1_i32_86 = arith.constant -1 : i32
    %307 = vector.broadcast %c-1_i32_86 : i32 to vector<16x1xi32>
    %308 = arith.addi %53, %307 : vector<16x1xi32>
    %c16_i32 = arith.constant 16 : i32
    %309 = vector.broadcast %c16_i32 : i32 to vector<16x1xi32>
    %310 = arith.cmpi slt, %308, %309 : vector<16x1xi32>
    %311 = arith.andi %306, %310 : vector<16x1xi1>
    %312 = arith.extui %311 : vector<16x1xi1> to vector<16x1xi32>
    %313 = arith.sitofp %312 : vector<16x1xi32> to vector<16x1xf32>
    %c1_i32_87 = arith.constant 1 : i32
    %314 = vector.broadcast %c1_i32_87 : i32 to vector<16x1xi32>
    %315 = arith.addi %53, %314 : vector<16x1xi32>
    %c0_i32_88 = arith.constant 0 : i32
    %316 = vector.broadcast %c0_i32_88 : i32 to vector<16x1xi32>
    %317 = arith.cmpi sge, %315, %316 : vector<16x1xi32>
    %c1_i32_89 = arith.constant 1 : i32
    %318 = vector.broadcast %c1_i32_89 : i32 to vector<16x1xi32>
    %319 = arith.addi %53, %318 : vector<16x1xi32>
    %c16_i32_90 = arith.constant 16 : i32
    %320 = vector.broadcast %c16_i32_90 : i32 to vector<16x1xi32>
    %321 = arith.cmpi slt, %319, %320 : vector<16x1xi32>
    %322 = arith.andi %317, %321 : vector<16x1xi1>
    %323 = arith.extui %322 : vector<16x1xi1> to vector<16x1xi32>
    %324 = arith.sitofp %323 : vector<16x1xi32> to vector<16x1xf32>
    %325 = vector.broadcast %1 : vector<16x1xf32> to vector<16x32xf32>
    %326 = arith.mulf %302, %325 : vector<16x32xf32>
    %c1_i32_91 = arith.constant 1 : i32
    %327 = tpu.dynamic_rotate %326 by %c1_i32_91 dim 0 : vector<16x32xf32>, i32 -> vector<16x32xf32>
    %328 = vector.broadcast %313 : vector<16x1xf32> to vector<16x32xf32>
    %329 = arith.mulf %327, %328 : vector<16x32xf32>
    %c15_i32 = arith.constant 15 : i32
    %330 = tpu.dynamic_rotate %326 by %c15_i32 dim 0 : vector<16x32xf32>, i32 -> vector<16x32xf32>
    %331 = vector.broadcast %324 : vector<16x1xf32> to vector<16x32xf32>
    %332 = arith.mulf %330, %331 : vector<16x32xf32>
    %333 = tpu.concatenate %329, %326, %332 in 1 : vector<16x32xf32>, vector<16x32xf32>, vector<16x32xf32> -> vector<16x96xf32>
    %cst_92 = arith.constant dense<0.000000e+00> : vector<16x32xf32>
    %334 = tpu.matmul %333, %7, %cst_92 {dimension_numbers = #tpu.dot_dimension_numbers<[1], [0], [0], [1], [0, 0, 1, 1], [], []>, precision = #tpu.contract_precision<fp32>} : vector<16x96xf32>, vector<96x32xf32>, vector<16x32xf32> -> vector<16x32xf32>
    %335 = vector.broadcast %11 : vector<1x32xf32> to vector<16x32xf32>
    %336 = arith.addf %334, %335 : vector<16x32xf32>
    %cst_93 = arith.constant 0.000000e+00 : f32
    %337 = vector.broadcast %cst_93 : f32 to vector<16x32xf32>
    %338 = arith.maximumf %336, %337 : vector<16x32xf32>
    %339 = vector.broadcast %1 : vector<16x1xf32> to vector<16x32xf32>
    %340 = arith.mulf %338, %339 : vector<16x32xf32>
    %c1_i32_94 = arith.constant 1 : i32
    %341 = tpu.dynamic_rotate %340 by %c1_i32_94 dim 0 : vector<16x32xf32>, i32 -> vector<16x32xf32>
    %342 = vector.broadcast %313 : vector<16x1xf32> to vector<16x32xf32>
    %343 = arith.mulf %341, %342 : vector<16x32xf32>
    %c15_i32_95 = arith.constant 15 : i32
    %344 = tpu.dynamic_rotate %340 by %c15_i32_95 dim 0 : vector<16x32xf32>, i32 -> vector<16x32xf32>
    %345 = vector.broadcast %324 : vector<16x1xf32> to vector<16x32xf32>
    %346 = arith.mulf %344, %345 : vector<16x32xf32>
    %347 = tpu.concatenate %343, %340, %346 in 1 : vector<16x32xf32>, vector<16x32xf32>, vector<16x32xf32> -> vector<16x96xf32>
    %cst_96 = arith.constant dense<0.000000e+00> : vector<16x32xf32>
    %348 = tpu.matmul %347, %8, %cst_96 {dimension_numbers = #tpu.dot_dimension_numbers<[1], [0], [0], [1], [0, 0, 1, 1], [], []>, precision = #tpu.contract_precision<fp32>} : vector<16x96xf32>, vector<96x32xf32>, vector<16x32xf32> -> vector<16x32xf32>
    %349 = vector.broadcast %12 : vector<1x32xf32> to vector<16x32xf32>
    %350 = arith.addf %348, %349 : vector<16x32xf32>
    %351 = vector.broadcast %1 : vector<16x1xf32> to vector<16x32xf32>
    %352 = arith.mulf %350, %351 : vector<16x32xf32>
    %353 = arith.addf %302, %352 : vector<16x32xf32>
    %cst_97 = arith.constant dense<0.000000e+00> : vector<16xf32>
    %354 = vector.multi_reduction <add>, %353, %cst_97 [1] : vector<16x32xf32> to vector<16xf32>
    %355 = vector.shape_cast %354 : vector<16xf32> to vector<16x1xf32>
    %cst_98 = arith.constant 3.200000e+01 : f32
    %356 = vector.broadcast %cst_98 : f32 to vector<16x1xf32>
    %357 = arith.divf %355, %356 : vector<16x1xf32>
    %358 = vector.broadcast %357 : vector<16x1xf32> to vector<16x32xf32>
    %359 = arith.subf %353, %358 : vector<16x32xf32>
    %360 = arith.mulf %359, %359 : vector<16x32xf32>
    %cst_99 = arith.constant dense<0.000000e+00> : vector<16xf32>
    %361 = vector.multi_reduction <add>, %360, %cst_99 [1] : vector<16x32xf32> to vector<16xf32>
    %362 = vector.shape_cast %361 : vector<16xf32> to vector<16x1xf32>
    %cst_100 = arith.constant 3.200000e+01 : f32
    %363 = vector.broadcast %cst_100 : f32 to vector<16x1xf32>
    %364 = arith.divf %362, %363 : vector<16x1xf32>
    %365 = vector.broadcast %357 : vector<16x1xf32> to vector<16x32xf32>
    %366 = arith.subf %353, %365 : vector<16x32xf32>
    %cst_101 = arith.constant 9.99999974E-6 : f32
    %367 = vector.broadcast %cst_101 : f32 to vector<16x1xf32>
    %368 = arith.addf %364, %367 : vector<16x1xf32>
    %369 = math.rsqrt %368 : vector<16x1xf32>
    %370 = vector.broadcast %369 : vector<16x1xf32> to vector<16x32xf32>
    %371 = arith.mulf %366, %370 : vector<16x32xf32>
    %372 = vector.broadcast %15 : vector<1x32xf32> to vector<16x32xf32>
    %373 = arith.mulf %371, %372 : vector<16x32xf32>
    %374 = vector.broadcast %16 : vector<1x32xf32> to vector<16x32xf32>
    %375 = arith.addf %373, %374 : vector<16x32xf32>
    %c0_102 = arith.constant 0 : index
    %c0_103 = arith.constant 0 : index
    %376 = vector.load %arg7[%c0_102, %c0_103] : memref<16x32xf32, #tpu.memory_space<vmem>>, vector<16x32xf32>
    tpu.vector_store %arg7[%c0_102, %c0_103], %375 {strides = array<i32>} : memref<16x32xf32, #tpu.memory_space<vmem>>, vector<16x32xf32>,
    return
  }
  func.func @transform_0(%arg0: i32) -> (i32, i32) {
    %c0_i32 = arith.constant 0 : i32
    %c0_i32_0 = arith.constant 0 : i32
    return %arg0, %c0_i32 : i32, i32
  }
  func.func @transform_1(%arg0: i32) -> (i32, i32, i32) {
    %c0_i32 = arith.constant 0 : i32
    %c0_i32_0 = arith.constant 0 : i32
    %c0_i32_1 = arith.constant 0 : i32
    return %arg0, %c0_i32, %c0_i32_0 : i32, i32, i32
  }
  func.func @transform_2(%arg0: i32) -> (i32, i32) {
    %c0_i32 = arith.constant 0 : i32
    %c0_i32_0 = arith.constant 0 : i32
    %c0_i32_1 = arith.constant 0 : i32
    return %c0_i32, %c0_i32_0 : i32, i32
  }
  func.func @transform_3(%arg0: i32) -> (i32, i32) {
    %c0_i32 = arith.constant 0 : i32
    %c0_i32_0 = arith.constant 0 : i32
    %c0_i32_1 = arith.constant 0 : i32
    return %c0_i32, %c0_i32_0 : i32, i32
  }
  func.func @transform_4(%arg0: i32) -> (i32, i32) {
    %c0_i32 = arith.constant 0 : i32
    %c0_i32_0 = arith.constant 0 : i32
    %c0_i32_1 = arith.constant 0 : i32
    return %c0_i32, %c0_i32_0 : i32, i32
  }
  func.func @transform_5(%arg0: i32) -> (i32, i32) {
    %c0_i32 = arith.constant 0 : i32
    %c0_i32_0 = arith.constant 0 : i32
    %c0_i32_1 = arith.constant 0 : i32
    return %c0_i32, %c0_i32_0 : i32, i32
  }
  func.func @transform_6(%arg0: i32) -> (i32, i32) {
    %c0_i32 = arith.constant 0 : i32
    %c0_i32_0 = arith.constant 0 : i32
    return %arg0, %c0_i32 : i32, i32
  }
}

</mosaic_0001>

<bundles_post_ra>
// kernel: tpu_custom_call.1
= control target key start
LH: loop header
LB: loop body
LE: loop exit
PB: predicated region body
PF: predicated region fallthrough
CT: control target
= control target key end

     0   :  { %11 = vsyncpa [#allocation3], 0  ;;  %s17399_s0 = inlined_call_operand.vmem [shape: f32[32,33], index: 0, kind: input, shape index: {}]   ;;  %s17400_s1 = inlined_call_operand.vmem [shape: f32[2,1,16], index: 1, kind: input, shape index: {}]   ;;  %s17401_s2 = inlined_call_operand.vmem [shape: f32[33,128], index: 2, kind: input, shape index: {}]   ;;  %s17402_s3 = inlined_call_operand.vmem [shape: f32[96,64], index: 3, kind: input, shape index: {}]   ;;  %s17403_s4 = inlined_call_operand.vmem [shape: f32[128,8], index: 4, kind: input, shape index: {}]   ;;  %s17404_s5 = inlined_call_operand.vmem [shape: f32[7,32], index: 5, kind: input, shape index: {}]   ;;  %s17405_s6 = inlined_call_operand.hbm [shape: f32[32,32], index: 6, kind: output, shape index: {}]  }
   0x1   :  { %13 = vsyncpa [#allocation3 + $0x1], 0  ;;  %s14340_s21 = smov 0   ;;  %s14342_s22 = smov 0  }
   0x2   :  { %s14344_s23 = smov 0   ;;  %s14346_s24 = smov 0  }
   0x3 LB: > { %s14361_s25 = sadd.s32 4294967295, %s14281_s24   ;;  %s12270_s26 = sadd.s32 4294967294, %s14281_s24   ;;  %s14281_s24 = sphi %s14346_s24, %s17515_s24   ;;  %s14277_s23 = sphi %s14344_s23, %s17514_s23   ;;  %s14273_s22 = sphi %s14342_s22, %s17513_s22   ;;  %s14269_s21 = sphi %s14340_s21, %s17512_s21  }
   0x4   : > { %s14365_s27 = sadd.s32 1, %s14281_s24   ;;  %s162_s28 = sadd.s32 1, %s14277_s23 }
   0x5   : > { %s159_s29 = ssub.s32 %s14281_s24, %s14365_s27  ;;  %p172_p0 = scmp.ne.s32.totalorder %s14277_s23, %s14273_s22 }
   0x6   : > { %p160_p1 = scmp.eq.s32.totalorder %s159_s29, 0  ;;  %p173_p2 = scmp.eq.s32.totalorder %s14361_s25, 1 }
   0x7   : > { %p178_p3 = scmp.ne.s32.totalorder %s14273_s22, %s14269_s21  ;;  %p179_p4 = scmp.eq.s32.totalorder %s12270_s26, 1 }
   0x8   : > { %s14376_s30 = scalar_select %p160_p1, %s14277_s23, %s162_s28  }
   0x9   : > { %p14378_p5 = por %p173_p2, %p172_p0  ;;  %p14382_p6 = por %p179_p4, %p178_p3 }
   0xa   : > { %p12273_p7 = scmp.ge.s32.totalorder %s14281_s24, 1  ;;  %p224_p8 = scmp.lt.s32.totalorder %s14281_s24, 3 }
   0xc   : > { %p225_p9 = pnand %p12273_p7, %p224_p8 }
   0xe   : > { %228 = sbr.rel (%p225_p9) target bundleno = 3649 (0xe41), region = 44 }
  0x13   : > { %v273_v0 = vld [vmem:[%s17401_s2 + $0x18] sm:$0xff]  ;;  %v272_v1 = vld [vmem:[%s17401_s2 + $0x10] sm:$0xff]  ;;  %v271_v2 = vld [vmem:[%s17401_s2 + $0x8] sm:$0xff]  ;;  %s12275_s15 = sshll.u32 %s14361_s25, 1  ;;  %vm17406_vm0 = vcmask 261120   ;;  %s14283_s9 = smov 112  }
  0x14   : > { %v14398_v3 = vand.u32 4294901760, %v273_v0  ;;  %v14400_v4 = vand.u32 4294901760, %v272_v1  ;;  %v14402_v5 = vand.u32 4294901760, %v271_v2  ;;  %v270_v6 = vld [vmem:[%s17401_s2] sm:$0xff]  ;;  %p258_p10 = scmp.lt.s32.totalorder %s12275_s15, 3  ;;  %s14284_s10 = smov 120  }
  0x15   : > { %v14407_v7 = vand.u32 4294901760, %v270_v6  ;;  %v12277_v39 = vld [vmem:[%s17401_s2 + $0x20] ss:$0 sm:$0xff]  ;;  %vm17407_vm1 = vcmask 64512   ;;  %s14285_s11 = smov 96   ;;  %s14287_s12 = smov 104  }
  0x16   : > { %12911 = vmatprep.subr.mxu0 %v14398_v3  ;;  %v430_v8 = vsub.f32 %v273_v0, %v14398_v3  ;;  %v437_v9 = vsub.f32 %v272_v1, %v14400_v4  ;;  %v444_v10 = vsub.f32 %v271_v2, %v14402_v5  ;;  %s17517_s15 = smov (!%p258_p10, %s12275_s15), 3  ;;  %s14288_s13 = smov 64   ;;  %vm5459_vm13 = vcmask 130048  }
  0x17   : > { %12912 = vmatpush3.msra.mxu0 %v14398_v3  ;;  %v451_v11 = vsub.f32 %v270_v6, %v14407_v7  ;;  %s12276_s18 = sshll.u32 %s17517_s15, 3  ;;  %p263_p11 = scmp.lt.s32.totalorder %s14361_s25, 1 }
  0x18   : > { %v14415_v12 = vand.u32 4294901760, %v430_v8  ;;  %12913 = vmatprep.subr.mxu0 %v14400_v4  ;;  %v14418_v13 = vand.u32 4294901760, %v437_v9  ;;  %v14420_v14 = vand.u32 4294901760, %v444_v10  ;;  %s14428_s26 = scalar_lea.vmem %s17399_s0, %s12276_s18  ;;  %s14298_s16 = smov 32  }
  0x19   : > { %12914 = vmatpush3.msra.mxu0 %v14400_v4  ;;  %v14423_v15 = vand.u32 4294901760, %v451_v11  ;;  %v14435_v19 = vld [vmem:[%s14428_s26] sm:$0xff]  ;;  %v14438_v20 = vld [vmem:[%s14428_s26 + $0x8] sm:$0xff]  ;;  %s264_s18 = scalar_select %p263_p11, %s14361_s25, 1 }
  0x1a   : > { %v432_v16 = vsub.f32 %v430_v8, %v14415_v12  ;;  %v439_v17 = vsub.f32 %v437_v9, %v14418_v13  ;;  %12915 = vmatprep.subr.mxu0 %v14402_v5  ;;  %v446_v18 = vsub.f32 %v444_v10, %v14420_v14  ;;  %v310_v21 = vsel %vm17406_vm0, %v14435_v19, 0  ;;  %s14300_s29 = smov 16   ;;  %s12286_s19 = sshll.u32 %s14361_s25, 8 }
  0x1b   : > { %12916 = vmatpush3.msra.mxu0 %v14402_v5  ;;  %v313_v22 = vsel %vm17406_vm0, %v14438_v20, 0  ;;  %v453_v25 = vsub.f32 %v451_v11, %v14423_v15  ;;  %v384_v26 = vand.u32 4294901760, %v310_v21  ;;  %s265_s28 = scalar_lea.vmem %s17400_s1, %s264_s18  ;;  %s14303_s15 = smov [#allocation2]  }
  0x1c   : > { %v433_v23 = vand.u32 4294901760, %v432_v16  ;;  %v440_v24 = vand.u32 4294901760, %v439_v17  ;;  %12917 = vmatprep.subr.mxu0 %v14407_v7  ;;  %v394_v27 = vand.u32 4294901760, %v313_v22  ;;  %v447_v28 = vand.u32 4294901760, %v446_v18 }
  0x1d   : > { %12918 = vmatpush3.msra.mxu0 %v14407_v7  ;;  %v385_v29 = vsub.f32 %v310_v21, %v384_v26  ;;  %12930 = vmatprep.mubr.f32.mxu1 %v384_v26  ;;  %v454_v31 = vand.u32 4294901760, %v453_v25 }
  0x1e   : > { %12922 = vmatprep.subr.mxu1 %v433_v23  ;;  %12933 = vmatprep.subr.mxu0 %v430_v8  ;;  %v395_v30 = vsub.f32 %v313_v22, %v394_v27 }
  0x1f   : > { %12923 = vmatpush3.msra.mxu1 %v433_v23  ;;  %v386_v32 = vand.u32 4294901760, %v385_v29 }
  0x20   : > { %12924 = vmatprep.subr.mxu1 %v440_v24  ;;  %v396_v33 = vand.u32 4294901760, %v395_v30 }
  0x21   : > { %12925 = vmatpush3.msra.mxu1 %v440_v24  ;;  %v387_v34 = vsub.f32 %v385_v29, %v386_v32 }
  0x22   : > { %12926 = vmatprep.subr.mxu1 %v447_v28  ;;  %v397_v35 = vsub.f32 %v395_v30, %v396_v33 }
  0x23   : > { %12927 = vmatpush3.msra.mxu1 %v447_v28  ;;  %v388_v36 = vand.u32 4294901760, %v387_v34  ;;  %v4962_v34 = vlaneseq }
  0x24   : > { %12928 = vmatprep.subr.mxu1 %v454_v31  ;;  %v398_v37 = vand.u32 4294901760, %v397_v35 }
  0x25   : > { %12929 = vmatpush3.msra.mxu1 %v454_v31  ;;  %12919 = vmatprep.mubr.f32.mxu0 %v388_v36 }
  0x26   : > { %12944 = vmatprep.subr.mxu1 %v14398_v3  ;;  %12920 = vmatmul.mubr.f32.vlgmr.msra.gmra.mxu0 %v398_v37  ;;  %v14571_v37 = vshrl.u32 %v4962_v34, 7 }
  0x27   : > { %12931 = vmatmul.mubr.f32.vlgmr.msra.gmra.mxu1 %v394_v27  ;;  %12934 = vmatpush3.msra.mxu0 %v430_v8 }
  0x28   : > { %12945 = vmatpush3.msra.mxu1 %v14398_v3  ;;  %12935 = vmatprep.subr.mxu0 %v437_v9 }
  0x29   : > { %12946 = vmatprep.subr.mxu1 %v14400_v4  ;;  %12936 = vmatpush3.msra.mxu0 %v437_v9 }
  0x2a   : > { %12947 = vmatpush3.msra.mxu1 %v14400_v4  ;;  %12937 = vmatprep.subr.mxu0 %v444_v10 }
  0x2b   : > { %12948 = vmatprep.subr.mxu1 %v14402_v5  ;;  %12938 = vmatpush3.msra.mxu0 %v444_v10 }
  0x2c   : > { %12949 = vmatpush3.msra.mxu1 %v14402_v5  ;;  %12939 = vmatprep.subr.mxu0 %v451_v11 }
  0x2d   : > { %12950 = vmatprep.subr.mxu1 %v14407_v7  ;;  %12940 = vmatpush3.msra.mxu0 %v451_v11 }
  0x2e   : > { %12941 = vmatprep.mubr.f32.mxu0 %v385_v29  ;;  %12951 = vmatpush3.msra.mxu1 %v14407_v7 }
  0x2f   : > { %12942 = vmatmul.mubr.f32.vlgmr.msra.gmra.mxu0 %v395_v30  ;;  %12952 = vmatprep.mubr.f32.mxu1 %v386_v32 }
  0x30   : > { %12955 = vmatprep.subr.mxu0 %v14415_v12  ;;  %12966 = vmatprep.subr.mxu1 %v14398_v3 }
  0x31   : > { %12953 = vmatmul.mubr.f32.vlgmr.msra.gmra.mxu1 %v396_v33  ;;  %12956 = vmatpush3.msra.mxu0 %v14415_v12 }
  0x32   : > { %12967 = vmatpush3.msra.mxu1 %v14398_v3  ;;  %12957 = vmatprep.subr.mxu0 %v14418_v13 }
  0x33   : > { %12968 = vmatprep.subr.mxu1 %v14400_v4  ;;  %12958 = vmatpush3.msra.mxu0 %v14418_v13 }
  0x34   : > { %12969 = vmatpush3.msra.mxu1 %v14400_v4  ;;  %12959 = vmatprep.subr.mxu0 %v14420_v14 }
  0x35   : > { %12970 = vmatprep.subr.mxu1 %v14402_v5  ;;  %12960 = vmatpush3.msra.mxu0 %v14420_v14 }
  0x36   : > { %12971 = vmatpush3.msra.mxu1 %v14402_v5  ;;  %12961 = vmatprep.subr.mxu0 %v14423_v15  ;;  %v14286_v5 = vmov 0  }
  0x37   : > { %12972 = vmatprep.subr.mxu1 %v14407_v7  ;;  %12962 = vmatpush3.msra.mxu0 %v14423_v15 }
  0x38   : > { %12963 = vmatprep.mubr.f32.mxu0 %v384_v26  ;;  %12973 = vmatpush3.msra.mxu1 %v14407_v7 }
  0x39   : > { %12974 = vmatprep.mubr.f32.mxu1 %v384_v26  ;;  %12964 = vmatmul.mubr.f32.vlgmr.msra.gmra.mxu0 %v394_v27 }
  0x3a   : > { %12975 = vmatmul.mubr.f32.vlgmr.msra.gmra.mxu1 %v394_v27  ;;  %14099 = vset.pattern.permute.xlu0 %v14286_v5 }
  0x3b   : > { %14100 = vset.pattern.permute.xlu1 %v14286_v5 }
  0xe6   : > { %v12921_v38 = vpop.f32.mrf.mxu0 }
  0xe7   : > { %v12932_v40 = vpop.f32.mrf.mxu1  ;;  %v401_v42 = vadd.f32 %v12921_v38, %v12277_v39  ;;  %v14576_v38 = vadd.s32 8, %v14571_v37 }
  0xe8   : > { %v390_v41 = vpop.f32.mrf.mxu0 }
  0xe9   : > { %v391_v44 = vadd.f32 %v12277_v39, %v390_v41  ;;  %v491_v45 = vpop.f32.mrf.mxu1  ;;  %v498_v46 = vadd.f32 %v12932_v40, %v401_v42  ;;  %v14289_v39 = vmov 32  }
  0xeb   : > { %v492_v49 = vadd.f32 %v491_v45, %v391_v44 }
  0xef   : > { %v12943_v43 = vpop.f32.mrf.mxu0 }
  0xf0   : > { %v585_v50 = vadd.f32 %v12943_v43, %v498_v46 }
  0xf1   : > { %v12954_v47 = vpop.f32.mrf.mxu1  ;;  %v577_v48 = vpop.f32.mrf.mxu0 }
  0xf2   : > { %v578_v51 = vadd.f32 %v577_v48, %v492_v49  ;;  %v670_v53 = vadd.f32 %v12954_v47, %v585_v50 }
  0xf3   : > { %v661_v52 = vpop.f32.mrf.mxu1 }
  0xf4   : > { %v662_v56 = vadd.f32 %v661_v52, %v578_v51 }
  0xf9   : > { %v12965_v54 = vpop.f32.mrf.mxu0 }
  0xfa   : > { %v12976_v55 = vpop.f32.mrf.mxu1  ;;  %v759_v57 = vadd.f32 %v12965_v54, %v670_v53 }
  0xfb   : > { %v752_v58 = vpop.f32.mrf.mxu0 }
  0xfc   : > { %v14475_v59 = vadd.f32 %v12976_v55, %v759_v57  ;;  %v753_v60 = vadd.f32 %v752_v58, %v662_v56  ;;  %v833_v61 = vpop.f32.mrf.mxu1 }
  0xfe   : > { %v14477_v62 = vadd.f32 %v833_v61, %v753_v60  ;;  %867 = vrot.lane.b32.xlu1 %v14475_v59, %s14283_s9  ;;  %863 = vrot.lane.b32.xlu0 %v14475_v59, %s14284_s10  ;;  %v844_v7 = vmul.f32 0.35355338, %v14475_v59 }
 0x100   : > { %v14484_v63 = vmul.f32 0.35355338, %v14477_v62  ;;  %v880_v8 = vsel %vm17407_vm1, %v844_v7, 0 }
 0x101   : > { %v14524_v11 = vand.u32 4294901760, %v880_v8 }
 0x102   : > { %865 = vrot.lane.b32.xlu1 %v14477_v62, %s14283_s9  ;;  %861 = vrot.lane.b32.xlu0 %v14477_v62, %s14284_s10  ;;  %v878_v0 = vsel %vm17407_vm1, %v14484_v63, 0 }
 0x103   : > { %v14492_v1 = vand.u32 4294901760, %v878_v0  ;;  %v14535_v14 = vsub.f32 %v880_v8, %v14524_v11 }
 0x105   : > { %12988 = vmatprep.mubr.f32.mxu1 %v14492_v1  ;;  %v14496_v2 = vsub.f32 %v878_v0, %v14492_v1  ;;  %v14545_v23 = vand.u32 4294901760, %v14535_v14 }
 0x106   : > { %873 = vrot.lane.b32.xlu1 %v14477_v62, %s14285_s11  ;;  %875 = vrot.lane.b32.xlu0 %v14475_v59, %s14285_s11 }
 0x107   : > { %v14503_v3 = vand.u32 4294901760, %v14496_v2  ;;  %v966_v26 = vsub.f32 %v14535_v14, %v14545_v23 }
 0x109   : > { %v956_v4 = vsub.f32 %v14496_v2, %v14503_v3  ;;  %v14561_v32 = vand.u32 4294901760, %v966_v26 }
 0x10a   : > { %869 = vrot.lane.b32.xlu1 %v14477_v62, %s14287_s12  ;;  %871 = vrot.lane.b32.xlu0 %v14475_v59, %s14287_s12 }
 0x10b   : > { %v14513_v6 = vand.u32 4294901760, %v956_v4 }
 0x10d   : > { %12981 = vmatprep.mubr.f32.mxu0 %v14513_v6 }
 0x170   : > { %v14518_v9 = vpop.permute.xlu1 %867  ;;  %v14520_v10 = vpop.permute.xlu0 %863 }
 0x171   : > { %1390 = vrot.lane.b32.xlu0 %v14520_v10, %s14285_s11 }
 0x174   : > { %v14526_v12 = vpop.permute.xlu1 %865  ;;  %v14528_v13 = vpop.permute.xlu0 %861 }
 0x175   : > { %1388 = vrot.lane.b32.xlu1 %v14528_v13, %s14285_s11  ;;  %847 = vrot.lane.b32.xlu0 %v14484_v63, %s14284_s10 }
 0x178   : > { %v874_v15 = vpop.permute.xlu1 %873  ;;  %v876_v16 = vpop.permute.xlu0 %875 }
 0x179   : > { %v882_v17 = vsel %vm17407_vm1, %v874_v15, 0  ;;  %v884_v18 = vsel %vm17407_vm1, %v876_v16, 0  ;;  %849 = vrot.lane.b32.xlu1 %v844_v7, %s14284_s10  ;;  %1904 = vrot.lane.b32.xlu0 %v14518_v9, %s14285_s11 }
 0x17a   : > { %v14542_v21 = vand.u32 4294901760, %v882_v17  ;;  %v915_v22 = vand.u32 4294901760, %v884_v18 }
 0x17c   : > { %v1010_v24 = vsub.f32 %v882_v17, %v14542_v21  ;;  %v1003_v25 = vsub.f32 %v884_v18, %v915_v22  ;;  %12977 = vmatprep.subr.mxu0 %v915_v22  ;;  %v14555_v30 = vpop.permute.xlu0 %871  ;;  %v14563_v35 = vpop.permute.xlu1 %869 }
 0x17d   : > { %1902 = vrot.lane.b32.xlu1 %v14526_v12, %s14285_s11  ;;  %12978 = vmatpush3.xpose.msra.mxu0 %v915_v22 }
 0x17e   : > { %851 = vrot.lane.b32.xlu0 %v14484_v63, %s14283_s9  ;;  %12979 = vmatprep.subr.mxu0 %v14542_v21  ;;  %v1004_v27 = vand.u32 4294901760, %v1003_v25  ;;  %v1011_v28 = vand.u32 4294901760, %v1010_v24 }
 0x180   : > { %v1005_v29 = vsub.f32 %v1003_v25, %v1004_v27  ;;  %v1012_v31 = vsub.f32 %v1010_v24, %v1011_v28 }
 0x181   : > { %853 = vrot.lane.b32.xlu1 %v844_v7, %s14283_s9  ;;  %12980 = vmatpush3.xpose.msra.mxu0 %v14542_v21 }
 0x182   : > { %2418 = vrot.lane.b32.xlu0 %v14555_v30, %s14285_s11  ;;  %12991 = vmatprep.subr.mxu0 %v1003_v25  ;;  %v1006_v33 = vand.u32 4294901760, %v1005_v29  ;;  %v1013_v36 = vand.u32 4294901760, %v1012_v31 }
 0x184   : > { %12982 = vmatmul.mubr.f32.vlgmr.msra.gmra.mxu0 %v14561_v32  ;;  %12984 = vmatprep.subr.mxu1 %v1006_v33 }
 0x185   : > { %2416 = vrot.lane.b32.xlu1 %v14563_v35, %s14285_s11  ;;  %12985 = vmatpush3.xpose.msra.mxu1 %v1006_v33 }
 0x186   : > { %855 = vrot.lane.b32.xlu0 %v14484_v63, %s14287_s12  ;;  %12992 = vmatpush3.xpose.msra.mxu0 %v1003_v25 }
 0x187   : > { %12995 = vmatprep.mubr.f32.mxu0 %v14496_v2  ;;  %12986 = vmatprep.subr.mxu1 %v1013_v36 }
 0x188   : > { %12993 = vmatprep.subr.mxu0 %v1010_v24 }
 0x189   : > { %857 = vrot.lane.b32.xlu1 %v844_v7, %s14287_s12  ;;  %12987 = vmatpush3.xpose.msra.mxu1 %v1013_v36  ;;  %s14301_s12 = smov 24  }
 0x18a   : > { %4968 = vperm.xlu0 %14099, %v14571_v37   ;;  %12994 = vmatpush3.xpose.msra.mxu0 %v1010_v24 }
 0x18b   : > { %12998 = vmatprep.subr.mxu1 %v915_v22  ;;  %13005 = vmatprep.subr.mxu0 %v1004_v27 }
 0x18c   : > { %12989 = vmatmul.mubr.f32.vlgmr.msra.gmra.mxu1 %v14524_v11 }
 0x18d   : > { %12996 = vmatmul.mubr.f32.vlgmr.msra.gmra.mxu0 %v14535_v14  ;;  %4971 = vperm.xlu1 %14100, %v14576_v38  }
 0x18e   : > { %5548 = vrot.lane.b32.xlu0 %v14477_v62, %s14288_s13  ;;  %12999 = vmatpush3.xpose.msra.mxu1 %v915_v22 }
 0x18f   : > { %13002 = vmatprep.mubr.f32.mxu1 %v14503_v3  ;;  %13006 = vmatpush3.xpose.msra.mxu0 %v1004_v27 }
 0x190   : > { %13009 = vmatprep.mubr.f32.mxu0 %v14492_v1  ;;  %13000 = vmatprep.subr.mxu1 %v14542_v21 }
 0x191   : > { %13007 = vmatprep.subr.mxu0 %v1011_v28  ;;  %14101 = vset.pattern.permute.xlu1 %v14289_v39 }
 0x192   : > { %6578 = vrot.lane.b32.xlu0 %v14518_v9, %s14288_s13  ;;  %13001 = vmatpush3.xpose.msra.mxu1 %v14542_v21 }
 0x193   : > { %13008 = vmatpush3.xpose.msra.mxu0 %v1011_v28  ;;  %5440 = vperm.xlu1 %14101, %v14435_v19  }
 0x194   : > { %13012 = vmatprep.subr.mxu1 %v915_v22 }
 0x195   : > { %13003 = vmatmul.mubr.f32.vlgmr.msra.gmra.mxu1 %v14545_v23 }
 0x196   : > { %13010 = vmatmul.mubr.f32.vlgmr.msra.gmra.mxu0 %v14524_v11  ;;  %13013 = vmatpush3.xpose.msra.mxu1 %v915_v22 }
 0x197   : > { %13016 = vmatprep.mubr.f32.mxu1 %v14492_v1  ;;  %5444 = vperm.xlu1 %14101, %v14438_v20  }
 0x198   : > { %13014 = vmatprep.subr.mxu1 %v14542_v21 }
 0x19a   : > { %13015 = vmatpush3.xpose.msra.mxu1 %v14542_v21 }
 0x19b   : > { %5550 = vrot.lane.b32.xlu1 %v14475_v59, %s14288_s13 }
 0x19d   : > { %13017 = vmatmul.mubr.f32.vlgmr.msra.gmra.mxu1 %v14524_v11 }
 0x19f   : > { %6064 = vrot.lane.b32.xlu1 %v14520_v10, %s14288_s13 }
 0x1a3   : > { %6062 = vrot.lane.b32.xlu1 %v14528_v13, %s14288_s13 }
 0x1e3   : > { %v1391_v19 = vpop.permute.xlu0 %1390 }
 0x1e4   : > { %v1398_v40 = vsel %vm17407_vm1, %v1391_v19, 0 }
 0x1e5   : > { %v14606_v41 = vand.u32 4294901760, %v1398_v40 }
 0x1e7   : > { %v1517_v20 = vsub.f32 %v1398_v40, %v14606_v41  ;;  %v1389_v42 = vpop.permute.xlu1 %1388  ;;  %v848_v43 = vpop.permute.xlu0 %847  ;;  %13019 = vmatprep.subr.mxu0 %v14606_v41 }
 0x1e8   : > { %v1396_v44 = vsel %vm17407_vm1, %v1389_v42, 0  ;;  %v1392_v45 = vsel %vm17407_vm1, %v848_v43, 0  ;;  %13020 = vmatpush3.xpose.msra.mxu0 %v14606_v41 }
 0x1e9   : > { %v14613_v46 = vand.u32 4294901760, %v1396_v44  ;;  %v14615_v47 = vand.u32 4294901760, %v1392_v45  ;;  %v1518_v48 = vand.u32 4294901760, %v1517_v20 }
 0x1eb   : > { %v1524_v49 = vsub.f32 %v1396_v44, %v14613_v46  ;;  %v14619_v50 = vsub.f32 %v1392_v45, %v14615_v47  ;;  %v850_v51 = vpop.permute.xlu1 %849  ;;  %v1905_v52 = vpop.permute.xlu0 %1904  ;;  %13021 = vmatprep.subr.mxu0 %v14613_v46  ;;  %13030 = vmatprep.mubr.f32.mxu1 %v14615_v47  ;;  %v1519_v53 = vsub.f32 %v1517_v20, %v1518_v48 }
 0x1ec   : > { %v1394_v54 = vsel %vm17407_vm1, %v850_v51, 0  ;;  %13022 = vmatpush3.xpose.msra.mxu0 %v14613_v46  ;;  %v1912_v7 = vsel %vm17407_vm1, %v1905_v52, 0 }
 0x1ed   : > { %v14625_v55 = vand.u32 4294901760, %v1394_v54  ;;  %13033 = vmatprep.subr.mxu0 %v1517_v20  ;;  %v1520_v56 = vand.u32 4294901760, %v1519_v53  ;;  %v14628_v57 = vand.u32 4294901760, %v14619_v50  ;;  %v1525_v58 = vand.u32 4294901760, %v1524_v49 }
 0x1ee   : > { %v14645_v13 = vand.u32 4294901760, %v1912_v7 }
 0x1ef   : > { %v14631_v59 = vsub.f32 %v1394_v54, %v14625_v55  ;;  %13026 = vmatprep.subr.mxu1 %v1520_v56  ;;  %v1470_v60 = vsub.f32 %v14619_v50, %v14628_v57  ;;  %v1526_v62 = vsub.f32 %v1524_v49, %v1525_v58  ;;  %v1903_v0 = vpop.permute.xlu1 %1902 }
 0x1f0   : > { %v852_v61 = vpop.permute.xlu0 %851  ;;  %13027 = vmatpush3.xpose.msra.mxu1 %v1520_v56  ;;  %v1910_v16 = vsel %vm17407_vm1, %v1903_v0, 0  ;;  %v2031_v21 = vsub.f32 %v1912_v7, %v14645_v13 }
 0x1f1   : > { %v14636_v63 = vand.u32 4294901760, %v14631_v59  ;;  %v14638_v4 = vand.u32 4294901760, %v1470_v60  ;;  %v1527_v8 = vand.u32 4294901760, %v1526_v62  ;;  %v1906_v9 = vsel %vm17407_vm1, %v852_v61, 0 }
 0x1f2   : > { %v14650_v17 = vand.u32 4294901760, %v1906_v9  ;;  %v14656_v22 = vand.u32 4294901760, %v1910_v16  ;;  %v14669_v28 = vand.u32 4294901760, %v2031_v21 }
 0x1f3   : > { %13023 = vmatprep.mubr.f32.mxu0 %v14638_v4  ;;  %v1480_v10 = vsub.f32 %v14631_v59, %v14636_v63  ;;  %13028 = vmatprep.subr.mxu1 %v1527_v8  ;;  %v854_v18 = vpop.permute.xlu1 %853 }
 0x1f4   : > { %13029 = vmatpush3.xpose.msra.mxu1 %v1527_v8  ;;  %v14660_v24 = vsub.f32 %v1906_v9, %v14650_v17  ;;  %v1908_v25 = vsel %vm17407_vm1, %v854_v18, 0  ;;  %v2038_v26 = vsub.f32 %v1910_v16, %v14656_v22  ;;  %v2033_v33 = vsub.f32 %v2031_v21, %v14669_v28  ;;  %v2419_v19 = vpop.permute.xlu0 %2418 }
 0x1f5   : > { %v14647_v15 = vand.u32 4294901760, %v1480_v10  ;;  %13040 = vmatprep.subr.mxu1 %v14606_v41  ;;  %v14667_v27 = vand.u32 4294901760, %v1908_v25 }
 0x1f6   : > { %v14673_v29 = vand.u32 4294901760, %v14660_v24  ;;  %v14683_v36 = vand.u32 4294901760, %v2038_v26  ;;  %v2034_v42 = vand.u32 4294901760, %v2033_v33 }
 0x1f7   : > { %13024 = vmatmul.mubr.f32.vlgmr.msra.gmra.mxu0 %v14647_v15  ;;  %13031 = vmatmul.mubr.f32.vlgmr.msra.gmra.mxu1 %v14625_v55  ;;  %v14679_v31 = vsub.f32 %v1908_v25, %v14667_v27  ;;  %v2417_v45 = vpop.permute.xlu1 %2416 }
 0x1f8   : > { %13034 = vmatpush3.xpose.msra.mxu0 %v1517_v20  ;;  %13037 = vmatprep.mubr.f32.mxu0 %v14619_v50  ;;  %v1984_v40 = vsub.f32 %v14660_v24, %v14673_v29  ;;  %v2040_v43 = vsub.f32 %v2038_v26, %v14683_v36  ;;  %v2424_v54 = vsel %vm17407_vm1, %v2417_v45, 0 }
 0x1f9   : > { %13035 = vmatprep.subr.mxu0 %v1524_v49  ;;  %13041 = vmatpush3.xpose.msra.mxu1 %v14606_v41  ;;  %v14691_v20 = vand.u32 4294901760, %v14679_v31  ;;  %v14720_v61 = vand.u32 4294901760, %v2424_v54 }
 0x1fa   : > { %13044 = vmatprep.mubr.f32.mxu1 %v14628_v57  ;;  %13042 = vmatprep.subr.mxu1 %v14613_v46  ;;  %v14696_v44 = vand.u32 4294901760, %v1984_v40 }
 0x1fb   : > { %v2552_v7 = vsub.f32 %v2424_v54, %v14720_v61 }
 0x1fc   : > { %13036 = vmatpush3.xpose.msra.mxu0 %v1524_v49  ;;  %v1994_v49 = vsub.f32 %v14679_v31, %v14691_v20 }
 0x1fd   : > { %13047 = vmatprep.subr.mxu0 %v1518_v48  ;;  %13043 = vmatpush3.xpose.msra.mxu1 %v14613_v46 }
 0x1fe   : > { %13054 = vmatprep.subr.mxu1 %v14606_v41  ;;  %v14711_v53 = vand.u32 4294901760, %v1994_v49 }
 0x1ff   : > { %13038 = vmatmul.mubr.f32.vlgmr.msra.gmra.mxu0 %v14631_v59 }
 0x200   : > { %13048 = vmatpush3.xpose.msra.mxu0 %v1518_v48  ;;  %13051 = vmatprep.mubr.f32.mxu0 %v14615_v47  ;;  %v2041_v48 = vand.u32 4294901760, %v2040_v43 }
 0x201   : > { %13045 = vmatmul.mubr.f32.vlgmr.msra.gmra.mxu1 %v14636_v63  ;;  %13049 = vmatprep.subr.mxu0 %v1525_v58 }
 0x202   : > { %13055 = vmatpush3.xpose.msra.mxu1 %v14606_v41  ;;  %13058 = vmatprep.mubr.f32.mxu1 %v14615_v47  ;;  %v856_v41 = vpop.permute.xlu0 %855 }
 0x203   : > { %13056 = vmatprep.subr.mxu1 %v14613_v46  ;;  %v2420_v51 = vsel %vm17407_vm1, %v856_v41, 0 }
 0x204   : > { %13050 = vmatpush3.xpose.msra.mxu0 %v1525_v58  ;;  %v14714_v56 = vand.u32 4294901760, %v2420_v51  ;;  %v858_v58 = vpop.permute.xlu1 %857 }
 0x205   : > { %13061 = vmatprep.subr.mxu0 %v14645_v13  ;;  %v2422_v0 = vsel %vm17407_vm1, %v858_v58, 0 }
 0x206   : > { %13057 = vmatpush3.xpose.msra.mxu1 %v14613_v46  ;;  %v2426_v46 = vsel %vm17407_vm1, %v2419_v19, 0  ;;  %v14724_v62 = vsub.f32 %v2420_v51, %v14714_v56  ;;  %v14731_v8 = vand.u32 4294901760, %v2422_v0 }
 0x207   : > { %13068 = vmatprep.subr.mxu1 %v2034_v42  ;;  %13052 = vmatmul.mubr.f32.vlgmr.msra.gmra.mxu0 %v14625_v55  ;;  %v14709_v52 = vand.u32 4294901760, %v2426_v46 }
 0x208   : > { %13062 = vmatpush3.xpose.msra.mxu0 %v14645_v13  ;;  %13065 = vmatprep.mubr.f32.mxu0 %v14696_v44  ;;  %v14736_v10 = vand.u32 4294901760, %v14724_v62  ;;  %v14743_v16 = vsub.f32 %v2422_v0, %v14731_v8 }
 0x209   : > { %13059 = vmatmul.mubr.f32.vlgmr.msra.gmra.mxu1 %v14625_v55  ;;  %13063 = vmatprep.subr.mxu0 %v14656_v22  ;;  %v2545_v60 = vsub.f32 %v2426_v46, %v14709_v52 }
 0x20a   : > { %13069 = vmatpush3.xpose.msra.mxu1 %v2034_v42  ;;  %13072 = vmatprep.mubr.f32.mxu1 %v14650_v17  ;;  %v2498_v25 = vsub.f32 %v14724_v62, %v14736_v10 }
 0x20b   : > { %13070 = vmatprep.subr.mxu1 %v2041_v48  ;;  %v2546_v9 = vand.u32 4294901760, %v2545_v60 }
 0x20c   : > { %13064 = vmatpush3.xpose.msra.mxu0 %v14656_v22  ;;  %v14761_v19 = vand.u32 4294901760, %v2498_v25 }
 0x20d   : > { %13075 = vmatprep.subr.mxu0 %v2031_v21  ;;  %v2547_v18 = vsub.f32 %v2545_v60, %v2546_v9 }
 0x20e   : > { %13071 = vmatpush3.xpose.msra.mxu1 %v2041_v48 }
 0x20f   : > { %13082 = vmatprep.subr.mxu1 %v14645_v13  ;;  %13066 = vmatmul.mubr.f32.vlgmr.msra.gmra.mxu0 %v14711_v53 }
 0x210   : > { %13076 = vmatpush3.xpose.msra.mxu0 %v2031_v21  ;;  %13079 = vmatprep.mubr.f32.mxu0 %v14660_v24  ;;  %v2553_v21 = vand.u32 4294901760, %v2552_v7 }
 0x211   : > { %13073 = vmatmul.mubr.f32.vlgmr.msra.gmra.mxu1 %v14667_v27  ;;  %13077 = vmatprep.subr.mxu0 %v2038_v26 }
 0x212   : > { %13083 = vmatpush3.xpose.msra.mxu1 %v14645_v13  ;;  %13086 = vmatprep.mubr.f32.mxu1 %v14673_v29  ;;  %v2554_v33 = vsub.f32 %v2552_v7, %v2553_v21 }
 0x213   : > { %13084 = vmatprep.subr.mxu1 %v14656_v22 }
 0x214   : > { %13078 = vmatpush3.xpose.msra.mxu0 %v2038_v26  ;;  %v14754_v26 = vand.u32 4294901760, %v14743_v16  ;;  %v2555_v40 = vand.u32 4294901760, %v2554_v33 }
 0x215   : > { %13089 = vmatprep.subr.mxu0 %v14669_v28 }
 0x216   : > { %13085 = vmatpush3.xpose.msra.mxu1 %v14656_v22  ;;  %v2508_v42 = vsub.f32 %v14743_v16, %v14754_v26 }
 0x217   : > { %13096 = vmatprep.subr.mxu1 %v14645_v13  ;;  %13080 = vmatmul.mubr.f32.vlgmr.msra.gmra.mxu0 %v14679_v31 }
 0x218   : > { %13090 = vmatpush3.xpose.msra.mxu0 %v14669_v28  ;;  %13093 = vmatprep.mubr.f32.mxu0 %v14650_v17  ;;  %v2548_v28 = vand.u32 4294901760, %v2547_v18  ;;  %v14779_v45 = vand.u32 4294901760, %v2508_v42  ;;  %v290_v18 = vld [vmem:[%s17403_s4 + $0x10] sm:$0xff] }
 0x219   : > { %13087 = vmatmul.mubr.f32.vlgmr.msra.gmra.mxu1 %v14691_v20  ;;  %13091 = vmatprep.subr.mxu0 %v14683_v36 }
 0x21a   : > { %13097 = vmatpush3.xpose.msra.mxu1 %v14645_v13  ;;  %13100 = vmatprep.mubr.f32.mxu1 %v14650_v17  ;;  %v289_v13 = vld [vmem:[%s17403_s4 + $0x8] sm:$0xff] }
 0x21b   : > { %13098 = vmatprep.subr.mxu1 %v14656_v22 }
 0x21c   : > { %13092 = vmatpush3.xpose.msra.mxu0 %v14683_v36  ;;  %v2934_v36 = vsel %vm17407_vm1, %v289_v13, 0 }
 0x21d   : > { %13103 = vmatprep.subr.mxu0 %v14709_v52  ;;  %v14775_v43 = vand.u32 4294901760, %v2934_v36 }
 0x21e   : > { %13099 = vmatpush3.xpose.msra.mxu1 %v14656_v22  ;;  %v288_v22 = vld [vmem:[%s17403_s4] sm:$0xff] }
 0x21f   : > { %13110 = vmatprep.subr.mxu1 %v2548_v28  ;;  %13094 = vmatmul.mubr.f32.vlgmr.msra.gmra.mxu0 %v14667_v27  ;;  %v2931_v41 = vsel %vm17407_vm1, %v288_v22, 0  ;;  %v3053_v48 = vsub.f32 %v2934_v36, %v14775_v43 }
 0x220   : > { %13104 = vmatpush3.xpose.msra.mxu0 %v14709_v52  ;;  %13107 = vmatprep.mubr.f32.mxu0 %v14761_v19  ;;  %v14784_v49 = vand.u32 4294901760, %v2931_v41 }
 0x221   : > { %13101 = vmatmul.mubr.f32.vlgmr.msra.gmra.mxu1 %v14667_v27  ;;  %13105 = vmatprep.subr.mxu0 %v14720_v61  ;;  %v3054_v46 = vand.u32 4294901760, %v3053_v48 }
 0x222   : > { %13111 = vmatpush3.xpose.msra.mxu1 %v2548_v28  ;;  %13114 = vmatprep.mubr.f32.mxu1 %v14714_v56  ;;  %v3060_v51 = vsub.f32 %v2931_v41, %v14784_v49 }
 0x223   : > { %13112 = vmatprep.subr.mxu1 %v2555_v40  ;;  %v3055_v54 = vsub.f32 %v3053_v48, %v3054_v46 }
 0x224   : > { %13106 = vmatpush3.xpose.msra.mxu0 %v14720_v61  ;;  %v3061_v58 = vand.u32 4294901760, %v3060_v51 }
 0x225   : > { %13117 = vmatprep.subr.mxu0 %v2545_v60 }
 0x226   : > { %13113 = vmatpush3.xpose.msra.mxu1 %v2555_v40  ;;  %v3062_v0 = vsub.f32 %v3060_v51, %v3061_v58 }
 0x227   : > { %13124 = vmatprep.subr.mxu1 %v14709_v52  ;;  %13108 = vmatmul.mubr.f32.vlgmr.msra.gmra.mxu0 %v14779_v45 }
 0x228   : > { %13118 = vmatpush3.xpose.msra.mxu0 %v2545_v60  ;;  %13121 = vmatprep.mubr.f32.mxu0 %v14724_v62  ;;  %v3056_v60 = vand.u32 4294901760, %v3055_v54 }
 0x229   : > { %13115 = vmatmul.mubr.f32.vlgmr.msra.gmra.mxu1 %v14731_v8  ;;  %13119 = vmatprep.subr.mxu0 %v2552_v7 }
 0x22a   : > { %13125 = vmatpush3.xpose.msra.mxu1 %v14709_v52  ;;  %13128 = vmatprep.mubr.f32.mxu1 %v14736_v10 }
 0x22b   : > { %13126 = vmatprep.subr.mxu1 %v14720_v61 }
 0x22c   : > { %13120 = vmatpush3.xpose.msra.mxu0 %v2552_v7  ;;  %v291_v7 = vld [vmem:[%s17403_s4 + $0x18] sm:$0xff] }
 0x22d   : > { %13131 = vmatprep.subr.mxu0 %v2546_v9 }
 0x22e   : > { %13127 = vmatpush3.xpose.msra.mxu1 %v14720_v61 }
 0x22f   : > { %13138 = vmatprep.subr.mxu1 %v14709_v52  ;;  %13122 = vmatmul.mubr.f32.vlgmr.msra.gmra.mxu0 %v14743_v16 }
 0x230   : > { %13132 = vmatpush3.xpose.msra.mxu0 %v2546_v9  ;;  %13135 = vmatprep.mubr.f32.mxu0 %v14714_v56  ;;  %v3063_v9 = vand.u32 4294901760, %v3062_v0 }
 0x231   : > { %13129 = vmatmul.mubr.f32.vlgmr.msra.gmra.mxu1 %v14754_v26  ;;  %13133 = vmatprep.subr.mxu0 %v2553_v21 }
 0x232   : > { %13139 = vmatpush3.xpose.msra.mxu1 %v14709_v52  ;;  %13142 = vmatprep.mubr.f32.mxu1 %v14714_v56  ;;  %v3442_v52 = vsel %vm17407_vm1, %v291_v7, 0 }
 0x233   : > { %13140 = vmatprep.subr.mxu1 %v14720_v61 }
 0x234   : > { %13134 = vmatpush3.xpose.msra.mxu0 %v2553_v21 }
 0x235   : > { %13145 = vmatprep.subr.mxu0 %v14775_v43 }
 0x236   : > { %13141 = vmatpush3.xpose.msra.mxu1 %v14720_v61  ;;  %v14815_v61 = vand.u32 4294901760, %v3442_v52 }
 0x237   : > { %13136 = vmatmul.mubr.f32.vlgmr.msra.gmra.mxu0 %v14731_v8  ;;  %13152 = vmatprep.subr.mxu1 %v3056_v60 }
 0x238   : > { %13146 = vmatpush3.xpose.msra.mxu0 %v14775_v43  ;;  %13149 = vmatprep.mubr.f32.mxu0 %v14513_v6  ;;  %v3439_v6 = vsel %vm17407_vm1, %v290_v18, 0  ;;  %v14822_v21 = vsub.f32 %v3442_v52, %v14815_v61 }
 0x239   : > { %13143 = vmatmul.mubr.f32.vlgmr.msra.gmra.mxu1 %v14731_v8  ;;  %13147 = vmatprep.subr.mxu0 %v14784_v49  ;;  %v14824_v25 = vand.u32 4294901760, %v3439_v6 }
 0x23a   : > { %13153 = vmatpush3.xpose.msra.mxu1 %v3056_v60  ;;  %13156 = vmatprep.mubr.f32.mxu1 %v14492_v1 }
 0x23b   : > { %13154 = vmatprep.subr.mxu1 %v3063_v9  ;;  %v14835_v28 = vsub.f32 %v3439_v6, %v14824_v25 }
 0x23c   : > { %13148 = vmatpush3.xpose.msra.mxu0 %v14784_v49 }
 0x23d   : > { %13159 = vmatprep.subr.mxu0 %v3053_v48 }
 0x23e   : > { %13155 = vmatpush3.xpose.msra.mxu1 %v3063_v9 }
 0x23f   : > { %13150 = vmatmul.mubr.f32.vlgmr.msra.gmra.mxu0 %v14561_v32  ;;  %13166 = vmatprep.subr.mxu1 %v14775_v43  ;;  %v14832_v32 = vand.u32 4294901760, %v14822_v21 }
 0x240   : > { %13160 = vmatpush3.xpose.msra.mxu0 %v3053_v48  ;;  %13163 = vmatprep.mubr.f32.mxu0 %v14496_v2 }
 0x241   : > { %13157 = vmatmul.mubr.f32.vlgmr.msra.gmra.mxu1 %v14524_v11  ;;  %13161 = vmatprep.subr.mxu0 %v3060_v51  ;;  %v3563_v2 = vsub.f32 %v14822_v21, %v14832_v32 }
 0x242   : > { %13167 = vmatpush3.xpose.msra.mxu1 %v14775_v43  ;;  %13170 = vmatprep.mubr.f32.mxu1 %v14503_v3  ;;  %v14843_v3 = vand.u32 4294901760, %v14835_v28 }
 0x243   : > { %13168 = vmatprep.subr.mxu1 %v14784_v49 }
 0x244   : > { %13162 = vmatpush3.xpose.msra.mxu0 %v3060_v51  ;;  %v12983_v33 = vpop.f32.mrf.mxu0  ;;  %v3570_v13 = vsub.f32 %v14835_v28, %v14843_v3 }
 0x245   : > { %13173 = vmatprep.subr.mxu0 %v3054_v46 }
 0x246   : > { %13169 = vmatpush3.xpose.msra.mxu1 %v14784_v49  ;;  %v959_v36 = vpop.f32.mrf.mxu0  ;;  %v3571_v41 = vand.u32 4294901760, %v3570_v13 }
 0x247   : > { %13164 = vmatmul.mubr.f32.vlgmr.msra.gmra.mxu0 %v14535_v14  ;;  %13180 = vmatprep.subr.mxu1 %v14775_v43  ;;  %v3564_v14 = vand.u32 4294901760, %v3563_v2 }
 0x248   : > { %13174 = vmatpush3.xpose.msra.mxu0 %v3054_v46  ;;  %13177 = vmatprep.mubr.f32.mxu0 %v14492_v1 }
 0x249   : > { %13171 = vmatmul.mubr.f32.vlgmr.msra.gmra.mxu1 %v14545_v23  ;;  %13175 = vmatprep.subr.mxu0 %v3061_v58  ;;  %v293_v23 = vld [vmem:[%s17403_s4 + $0x28] sm:$0xff] }
 0x24a   : > { %13181 = vmatpush3.xpose.msra.mxu1 %v14775_v43  ;;  %13184 = vmatprep.mubr.f32.mxu1 %v14492_v1  ;;  %v3950_v48 = vsel %vm17407_vm1, %v293_v23, 0 }
 0x24b   : > { %13182 = vmatprep.subr.mxu1 %v14784_v49  ;;  %v14867_v51 = vand.u32 4294901760, %v3950_v48 }
 0x24c   : > { %13176 = vmatpush3.xpose.msra.mxu0 %v3061_v58  ;;  %v12990_v40 = vpop.f32.mrf.mxu1 }
 0x24d   : > { %v1057_v42 = vadd.f32 %v12990_v40, %v12983_v33  ;;  %13187 = vmatprep.subr.mxu0 %v14815_v61  ;;  %v12997_v22 = vpop.f32.mrf.mxu0  ;;  %v4069_v9 = vsub.f32 %v3950_v48, %v14867_v51 }
 0x24e   : > { %13183 = vmatpush3.xpose.msra.mxu1 %v14784_v49  ;;  %v1050_v43 = vpop.f32.mrf.mxu1  ;;  %v292_v49 = vld [vmem:[%s17403_s4 + $0x20] sm:$0xff] }
 0x24f   : > { %v1140_v1 = vadd.f32 %v12997_v22, %v1057_v42  ;;  %13178 = vmatmul.mubr.f32.vlgmr.msra.gmra.mxu0 %v14524_v11  ;;  %13194 = vmatprep.subr.mxu1 %v3564_v14  ;;  %v1051_v46 = vadd.f32 %v1050_v43, %v959_v36  ;;  %v1132_v54 = vpop.f32.mrf.mxu0 }
 0x250   : > { %13188 = vmatpush3.xpose.msra.mxu0 %v14815_v61  ;;  %13191 = vmatprep.mubr.f32.mxu0 %v14638_v4  ;;  %v3947_v4 = vsel %vm17407_vm1, %v292_v49, 0 }
 0x251   : > { %13185 = vmatmul.mubr.f32.vlgmr.msra.gmra.mxu1 %v14524_v11  ;;  %13189 = vmatprep.subr.mxu0 %v14824_v25  ;;  %v1133_v11 = vadd.f32 %v1132_v54, %v1051_v46  ;;  %v14875_v52 = vand.u32 4294901760, %v3947_v4 }
 0x252   : > { %13195 = vmatpush3.xpose.msra.mxu1 %v3564_v14  ;;  %13198 = vmatprep.mubr.f32.mxu1 %v14615_v47  ;;  %v14926_v14 = vpop.permute.xlu1 %4971 }
 0x253   : > { %13196 = vmatprep.subr.mxu1 %v3571_v41  ;;  %v4076_v2 = vsub.f32 %v3947_v4, %v14875_v52 }
 0x254   : > { %13190 = vmatpush3.xpose.msra.mxu0 %v14824_v25 }
 0x255   : > { %v13004_v58 = vpop.f32.mrf.mxu1  ;;  %13201 = vmatprep.subr.mxu0 %v14822_v21 }
 0x256   : > { %v1223_v60 = vadd.f32 %v13004_v58, %v1140_v1  ;;  %13197 = vmatpush3.xpose.msra.mxu1 %v3571_v41  ;;  %v13011_v0 = vpop.f32.mrf.mxu0  ;;  %v14934_v36 = vpop.permute.xlu1 %5440  ;;  %v14290_v41 = vmov 2  }
 0x257   : > { %v1214_v7 = vpop.f32.mrf.mxu1  ;;  %13192 = vmatmul.mubr.f32.vlgmr.msra.gmra.mxu0 %v14647_v15  ;;  %13208 = vmatprep.subr.mxu1 %v14815_v61  ;;  %v4070_v15 = vand.u32 4294901760, %v4069_v9  ;;  %17428 = vst [vmem:[#allocation5_spill] sm:$0xff] %v14934_v36 }
 0x258   : > { %v1306_v18 = vadd.f32 %v13011_v0, %v1223_v60  ;;  %v14877_v6 = vadd.f32 %v1214_v7, %v1133_v11  ;;  %13202 = vmatpush3.xpose.msra.mxu0 %v14822_v21  ;;  %13205 = vmatprep.mubr.f32.mxu0 %v14619_v50  ;;  %v15002_v48 = vpop.f32.mrf.mxu0 }
 0x259   : > { %13199 = vmatmul.mubr.f32.vlgmr.msra.gmra.mxu1 %v14625_v55  ;;  %13203 = vmatprep.subr.mxu0 %v14835_v28  ;;  %v4071_v50 = vsub.f32 %v4069_v9, %v4070_v15 }
 0x25a   : > { %13209 = vmatpush3.xpose.msra.mxu1 %v14815_v61  ;;  %13212 = vmatprep.mubr.f32.mxu1 %v14628_v57  ;;  %v4077_v57 = vand.u32 4294901760, %v4076_v2  ;;  %v14944_v23 = vpop.permute.xlu1 %5444 }
 0x25b   : > { %13210 = vmatprep.subr.mxu1 %v14824_v25  ;;  %17429 = vst [vmem:[#allocation6_spill] sm:$0xff] %v14944_v23  ;;  %14103 = vset.pattern.permute.xlu1 %v14290_v41 }
 0x25c   : > { %13204 = vmatpush3.xpose.msra.mxu0 %v14835_v28  ;;  %v4072_v28 = vand.u32 4294901760, %v4071_v50 }
 0x25d   : > { %v13018_v33 = vpop.f32.mrf.mxu1  ;;  %13215 = vmatprep.subr.mxu0 %v14832_v32 }
 0x25e   : > { %v14889_v21 = vadd.f32 %v13018_v33, %v1306_v18  ;;  %13211 = vmatpush3.xpose.msra.mxu1 %v14824_v25 }
 0x25f   : > { %13206 = vmatmul.mubr.f32.vlgmr.msra.gmra.mxu0 %v14631_v59  ;;  %13222 = vmatprep.subr.mxu1 %v14815_v61  ;;  %v4078_v59 = vsub.f32 %v4076_v2, %v4077_v57  ;;  %v15004_v49 = vpop.f32.mrf.mxu1 }
 0x260   : > { %13216 = vmatpush3.xpose.msra.mxu0 %v14832_v32  ;;  %13219 = vmatprep.mubr.f32.mxu0 %v14615_v47  ;;  %v295_v32 = vld [vmem:[%s17403_s4 + $0x38] sm:$0xff] }
 0x261   : > { %13213 = vmatmul.mubr.f32.vlgmr.msra.gmra.mxu1 %v14636_v63  ;;  %13217 = vmatprep.subr.mxu0 %v14843_v3  ;;  %v4079_v63 = vand.u32 4294901760, %v4078_v59 }
 0x262   : > { %13223 = vmatpush3.xpose.msra.mxu1 %v14815_v61  ;;  %13226 = vmatprep.mubr.f32.mxu1 %v14615_v47  ;;  %v4458_v47 = vsel %vm17407_vm1, %v295_v32, 0  ;;  %v294_v61 = vld [vmem:[%s17403_s4 + $0x30] sm:$0xff] }
 0x263   : > { %13224 = vmatprep.subr.mxu1 %v14824_v25 }
 0x264   : > { %13218 = vmatpush3.xpose.msra.mxu0 %v14843_v3 }
 0x265   : > { %13229 = vmatprep.subr.mxu0 %v14867_v51 }
 0x266   : > { %13225 = vmatpush3.xpose.msra.mxu1 %v14824_v25  ;;  %v14917_v25 = vand.u32 4294901760, %v4458_v47 }
 0x267   : > { %13220 = vmatmul.mubr.f32.vlgmr.msra.gmra.mxu0 %v14625_v55  ;;  %13236 = vmatprep.subr.mxu1 %v4072_v28 }
 0x268   : > { %13230 = vmatpush3.xpose.msra.mxu0 %v14867_v51  ;;  %13233 = vmatprep.mubr.f32.mxu0 %v14696_v44  ;;  %v4455_v44 = vsel %vm17407_vm1, %v294_v61, 0 }
 0x269   : > { %13227 = vmatmul.mubr.f32.vlgmr.msra.gmra.mxu1 %v14625_v55  ;;  %13231 = vmatprep.subr.mxu0 %v14875_v52  ;;  %v4577_v55 = vsub.f32 %v4458_v47, %v14917_v25  ;;  %v14924_v3 = vand.u32 4294901760, %v4455_v44 }
 0x26a   : > { %13237 = vmatpush3.xpose.msra.mxu1 %v4072_v28  ;;  %13240 = vmatprep.mubr.f32.mxu1 %v14650_v17 }
 0x26b   : > { %13238 = vmatprep.subr.mxu1 %v4079_v63  ;;  %v4584_v13 = vsub.f32 %v4455_v44, %v14924_v3 }
 0x26c   : > { %13232 = vmatpush3.xpose.msra.mxu0 %v14875_v52 }
 0x26d   : > { %13243 = vmatprep.subr.mxu0 %v4069_v9  ;;  %v4585_v40 = vand.u32 4294901760, %v4584_v13 }
 0x26e   : > { %13239 = vmatpush3.xpose.msra.mxu1 %v4079_v63 }
 0x26f   : > { %13234 = vmatmul.mubr.f32.vlgmr.msra.gmra.mxu0 %v14711_v53  ;;  %13250 = vmatprep.subr.mxu1 %v14867_v51  ;;  %v4578_v53 = vand.u32 4294901760, %v4577_v55  ;;  %v4586_v42 = vsub.f32 %v4584_v13, %v4585_v40 }
 0x270   : > { %13244 = vmatpush3.xpose.msra.mxu0 %v4069_v9  ;;  %13247 = vmatprep.mubr.f32.mxu0 %v14660_v24 }
 0x271   : > { %13241 = vmatmul.mubr.f32.vlgmr.msra.gmra.mxu1 %v14667_v27  ;;  %13245 = vmatprep.subr.mxu0 %v4076_v2  ;;  %v4579_v24 = vsub.f32 %v4577_v55, %v4578_v53 }
 0x272   : > { %13251 = vmatpush3.xpose.msra.mxu1 %v14867_v51  ;;  %13254 = vmatprep.mubr.f32.mxu1 %v14673_v29 }
 0x273   : > { %13252 = vmatprep.subr.mxu1 %v14875_v52  ;;  %v4580_v29 = vand.u32 4294901760, %v4579_v24 }
 0x274   : > { %13246 = vmatpush3.xpose.msra.mxu0 %v4076_v2 }
 0x275   : > { %13257 = vmatprep.subr.mxu0 %v4070_v15 }
 0x276   : > { %13253 = vmatpush3.xpose.msra.mxu1 %v14875_v52 }
 0x277   : > { %13248 = vmatmul.mubr.f32.vlgmr.msra.gmra.mxu0 %v14679_v31  ;;  %13264 = vmatprep.subr.mxu1 %v14867_v51  ;;  %v4587_v31 = vand.u32 4294901760, %v4586_v42 }
 0x278   : > { %13258 = vmatpush3.xpose.msra.mxu0 %v4070_v15  ;;  %13261 = vmatprep.mubr.f32.mxu0 %v14650_v17 }
 0x279   : > { %13255 = vmatmul.mubr.f32.vlgmr.msra.gmra.mxu1 %v14691_v20  ;;  %13259 = vmatprep.subr.mxu0 %v4077_v57  ;;  %v14949_v20 = vpop.permute.xlu0 %4968 }
 0x27a   : > { %13265 = vmatpush3.xpose.msra.mxu1 %v14867_v51  ;;  %13268 = vmatprep.mubr.f32.mxu1 %v14650_v17  ;;  %v5551_v17 = vpop.permute.xlu1 %5550 }
 0x27b   : > { %13266 = vmatprep.subr.mxu1 %v14875_v52  ;;  %v14957_v22 = vand.u32 4294901760, %v5551_v17 }
 0x27c   : > { %13260 = vmatpush3.xpose.msra.mxu0 %v4077_v57 }
 0x27d   : > { %13271 = vmatprep.subr.mxu0 %v14917_v25  ;;  %v5549_v1 = vpop.permute.xlu0 %5548 }
 0x27e   : > { %13267 = vmatpush3.xpose.msra.mxu1 %v14875_v52 }
 0x27f   : > { %13262 = vmatmul.mubr.f32.vlgmr.msra.gmra.mxu0 %v14667_v27  ;;  %13278 = vmatprep.subr.mxu1 %v4580_v29 }
 0x280   : > { %13272 = vmatpush3.xpose.msra.mxu0 %v14917_v25  ;;  %13275 = vmatprep.mubr.f32.mxu0 %v14761_v19  ;;  %v14965_v19 = vsub.f32 %v5551_v17, %v14957_v22 }
 0x281   : > { %13269 = vmatmul.mubr.f32.vlgmr.msra.gmra.mxu1 %v14667_v27  ;;  %13273 = vmatprep.subr.mxu0 %v14924_v3  ;;  %v14962_v27 = vand.u32 4294901760, %v5549_v1 }
 0x282   : > { %13279 = vmatpush3.xpose.msra.mxu1 %v4580_v29  ;;  %13282 = vmatprep.mubr.f32.mxu1 %v14714_v56 }
 0x283   : > { %13280 = vmatprep.subr.mxu1 %v4587_v31 }
 0x284   : > { %13274 = vmatpush3.xpose.msra.mxu0 %v14924_v3 }
 0x285   : > { %13285 = vmatprep.subr.mxu0 %v4577_v55 }
 0x286   : > { %13281 = vmatpush3.xpose.msra.mxu1 %v4587_v31 }
 0x287   : > { %13276 = vmatmul.mubr.f32.vlgmr.msra.gmra.mxu0 %v14779_v45  ;;  %13292 = vmatprep.subr.mxu1 %v14917_v25  ;;  %v14972_v45 = vsub.f32 %v5549_v1, %v14962_v27 }
 0x288   : > { %13286 = vmatpush3.xpose.msra.mxu0 %v4577_v55  ;;  %13289 = vmatprep.mubr.f32.mxu0 %v14724_v62  ;;  %v14975_v62 = vand.u32 4294901760, %v14965_v19 }
 0x289   : > { %13283 = vmatmul.mubr.f32.vlgmr.msra.gmra.mxu1 %v14731_v8  ;;  %13287 = vmatprep.subr.mxu0 %v4584_v13  ;;  %v14985_v43 = vand.u32 4294901760, %v14972_v45 }
 0x28a   : > { %13293 = vmatpush3.xpose.msra.mxu1 %v14917_v25  ;;  %13296 = vmatprep.mubr.f32.mxu1 %v14736_v10  ;;  %v5679_v10 = vsub.f32 %v14965_v19, %v14975_v62 }
 0x28b   : > { %13294 = vmatprep.subr.mxu1 %v14924_v3 }
 0x28c   : > { %13288 = vmatpush3.xpose.msra.mxu0 %v4584_v13 }
 0x28d   : > { %13299 = vmatprep.subr.mxu0 %v4578_v53 }
 0x28e   : > { %13295 = vmatpush3.xpose.msra.mxu1 %v14924_v3 }
 0x28f   : > { %13290 = vmatmul.mubr.f32.vlgmr.msra.gmra.mxu0 %v14743_v16  ;;  %13306 = vmatprep.subr.mxu1 %v14917_v25  ;;  %v5680_v16 = vand.u32 4294901760, %v5679_v10 }
 0x290   : > { %13300 = vmatpush3.xpose.msra.mxu0 %v4578_v53  ;;  %13303 = vmatprep.mubr.f32.mxu0 %v14714_v56 }
 0x291   : > { %13297 = vmatmul.mubr.f32.vlgmr.msra.gmra.mxu1 %v14754_v26  ;;  %13301 = vmatprep.subr.mxu0 %v4585_v40  ;;  %v5686_v26 = vsub.f32 %v14972_v45, %v14985_v43 }
 0x292   : > { %13307 = vmatpush3.xpose.msra.mxu1 %v14917_v25  ;;  %13310 = vmatprep.mubr.f32.mxu1 %v14714_v56 }
 0x293   : > { %13308 = vmatprep.subr.mxu1 %v14924_v3  ;;  %v5687_v56 = vand.u32 4294901760, %v5686_v26 }
 0x294   : > { %13302 = vmatpush3.xpose.msra.mxu0 %v4585_v40 }
 0x295   : > { %13313 = vmatprep.subr.mxu0 %v14957_v22 }
 0x296   : > { %13309 = vmatpush3.xpose.msra.mxu1 %v14924_v3 }
 0x297   : > { %13320 = vmatprep.subr.mxu1 %v5680_v16  ;;  %13304 = vmatmul.mubr.f32.vlgmr.msra.gmra.mxu0 %v14731_v8 }
 0x298   : > { %13314 = vmatpush3.msra.mxu0 %v14957_v22 }
 0x299   : > { %13311 = vmatmul.mubr.f32.vlgmr.msra.gmra.mxu1 %v14731_v8  ;;  %13315 = vmatprep.subr.mxu0 %v14962_v27 }
 0x29a   : > { %13321 = vmatpush3.msra.mxu1 %v5680_v16  ;;  %13316 = vmatpush3.msra.mxu0 %v14962_v27 }
 0x29b   : > { %13322 = vmatprep.subr.mxu1 %v5687_v56  ;;  %13327 = vmatprep.subr.mxu0 %v14965_v19 }
 0x29c   : > { %13323 = vmatpush3.msra.mxu1 %v5687_v56 }
 0x29d   : > { %13334 = vmatprep.subr.mxu1 %v14957_v22 }
 0x2b7   : > { %v13025_v46 = vpop.f32.mrf.mxu0  ;;  %v13032_v51 = vpop.f32.mrf.mxu1 }
 0x2b8   : > { %v1571_v4 = vadd.f32 %v13032_v51, %v13025_v46 }
 0x2b9   : > { %v1473_v8 = vpop.f32.mrf.mxu0  ;;  %v1564_v54 = vpop.f32.mrf.mxu1 }
 0x2ba   : > { %v1565_v58 = vadd.f32 %v1564_v54, %v1473_v8 }
 0x2bf   : > { %v13039_v11 = vpop.f32.mrf.mxu0 }
 0x2c0   : > { %v1654_v60 = vadd.f32 %v13039_v11, %v1571_v4 }
 0x2c1   : > { %v13046_v0 = vpop.f32.mrf.mxu1  ;;  %v1646_v7 = vpop.f32.mrf.mxu0 }
 0x2c2   : > { %v1737_v9 = vadd.f32 %v13046_v0, %v1654_v60  ;;  %v1647_v52 = vadd.f32 %v1646_v7, %v1565_v58 }
 0x2c3   : > { %v1728_v18 = vpop.f32.mrf.mxu1 }
 0x2c4   : > { %v1729_v15 = vadd.f32 %v1728_v18, %v1647_v52 }
 0x2c7   : > { %v13053_v2 = vpop.f32.mrf.mxu0 }
 0x2c8   : > { %v1820_v33 = vadd.f32 %v13053_v2, %v1737_v9 }
 0x2c9   : > { %v13060_v50 = vpop.f32.mrf.mxu1  ;;  %v1813_v57 = vpop.f32.mrf.mxu0 }
 0x2ca   : > { %v15006_v28 = vadd.f32 %v13060_v50, %v1820_v33  ;;  %v1814_v59 = vadd.f32 %v1813_v57, %v1729_v15 }
 0x2cb   : > { %v1892_v32 = vpop.f32.mrf.mxu1 }
 0x2cc   : > { %v15008_v63 = vadd.f32 %v1892_v32, %v1814_v59 }
 0x2cf   : > { %v13067_v47 = vpop.f32.mrf.mxu0 }
 0x2d1   : > { %v13074_v61 = vpop.f32.mrf.mxu1  ;;  %v1987_v25 = vpop.f32.mrf.mxu0 }
 0x2d2   : > { %v2085_v44 = vadd.f32 %v13074_v61, %v13067_v47 }
 0x2d3   : > { %v2078_v55 = vpop.f32.mrf.mxu1 }
 0x2d4   : > { %v2079_v3 = vadd.f32 %v2078_v55, %v1987_v25 }
 0x2d7   : > { %v13081_v53 = vpop.f32.mrf.mxu0 }
 0x2d8   : > { %v2168_v13 = vadd.f32 %v13081_v53, %v2085_v44 }
 0x2d9   : > { %v13088_v24 = vpop.f32.mrf.mxu1  ;;  %v2160_v40 = vpop.f32.mrf.mxu0 }
 0x2da   : > { %v2251_v29 = vadd.f32 %v13088_v24, %v2168_v13  ;;  %v2161_v42 = vadd.f32 %v2160_v40, %v2079_v3 }
 0x2db   : > { %v2242_v31 = vpop.f32.mrf.mxu1 }
 0x2dc   : > { %v2243_v17 = vadd.f32 %v2242_v31, %v2161_v42 }
 0x2df   : > { %v13095_v1 = vpop.f32.mrf.mxu0 }
 0x2e0   : > { %v2334_v10 = vadd.f32 %v13095_v1, %v2251_v29 }
 0x2e1   : > { %v13102_v16 = vpop.f32.mrf.mxu1  ;;  %v2327_v26 = vpop.f32.mrf.mxu0 }
 0x2e2   : > { %v15010_v56 = vadd.f32 %v13102_v16, %v2334_v10  ;;  %v2328_v46 = vadd.f32 %v2327_v26, %v2243_v17 }
 0x2e3   : > { %v2406_v51 = vpop.f32.mrf.mxu1 }
 0x2e4   : > { %v15012_v4 = vadd.f32 %v2406_v51, %v2328_v46 }
 0x2e7   : > { %v13109_v8 = vpop.f32.mrf.mxu0 }
 0x2e9   : > { %v13116_v54 = vpop.f32.mrf.mxu1  ;;  %v2501_v58 = vpop.f32.mrf.mxu0 }
 0x2ea   : > { %v2599_v11 = vadd.f32 %v13116_v54, %v13109_v8  ;;  %v14291_v8 = vmov 3   ;;  %v14292_v54 = vmov 1  }
 0x2eb   : > { %v2592_v60 = vpop.f32.mrf.mxu1 }
 0x2ec   : > { %v2593_v0 = vadd.f32 %v2592_v60, %v2501_v58  ;;  %v14293_v60 = vmov 5  }
 0x2ef   : > { %v13123_v7 = vpop.f32.mrf.mxu0 }
 0x2f0   : > { %v2682_v9 = vadd.f32 %v13123_v7, %v2599_v11 }
 0x2f1   : > { %v13130_v52 = vpop.f32.mrf.mxu1  ;;  %v2674_v18 = vpop.f32.mrf.mxu0 }
 0x2f2   : > { %v2765_v15 = vadd.f32 %v13130_v52, %v2682_v9  ;;  %v2675_v2 = vadd.f32 %v2674_v18, %v2593_v0  ;;  %v14294_v0 = vmov 4  }
 0x2f3   : > { %v2756_v33 = vpop.f32.mrf.mxu1 }
 0x2f4   : > { %v2757_v50 = vadd.f32 %v2756_v33, %v2675_v2  ;;  %v14296_v2 = vmov 6  }
 0x2f7   : > { %v13137_v57 = vpop.f32.mrf.mxu0 }
 0x2f8   : > { %v2848_v59 = vadd.f32 %v13137_v57, %v2765_v15  ;;  %v14295_v15 = vmov 7  }
 0x2f9   : > { %v13144_v32 = vpop.f32.mrf.mxu1  ;;  %v2841_v47 = vpop.f32.mrf.mxu0 }
 0x2fa   : > { %v15014_v61 = vadd.f32 %v13144_v32, %v2848_v59  ;;  %v2842_v25 = vadd.f32 %v2841_v47, %v2757_v50  ;;  %v14297_v32 = vmov 8  }
 0x2fb   : > { %v2920_v44 = vpop.f32.mrf.mxu1 }
 0x2fc   : > { %v15016_v55 = vadd.f32 %v2920_v44, %v2842_v25 }
 0x2ff   : > { %v13151_v3 = vpop.f32.mrf.mxu0 }
 0x301   : > { %v13158_v53 = vpop.f32.mrf.mxu1  ;;  %v3009_v13 = vpop.f32.mrf.mxu0 }
 0x302   : > { %v3107_v40 = vadd.f32 %v13158_v53, %v13151_v3 }
 0x303   : > { %v3100_v29 = vpop.f32.mrf.mxu1 }
 0x304   : > { %v3101_v58 = vadd.f32 %v3100_v29, %v3009_v13 }
 0x307   : > { %v13165_v24 = vpop.f32.mrf.mxu0 }
 0x308   : > { %v3190_v42 = vadd.f32 %v13165_v24, %v3107_v40 }
 0x309   : > { %v13172_v31 = vpop.f32.mrf.mxu1  ;;  %v3182_v17 = vpop.f32.mrf.mxu0 }
 0x30a   : > { %v3273_v1 = vadd.f32 %v13172_v31, %v3190_v42  ;;  %v3183_v11 = vadd.f32 %v3182_v17, %v3101_v58 }
 0x30b   : > { %v3264_v10 = vpop.f32.mrf.mxu1 }
 0x30c   : > { %v3265_v9 = vadd.f32 %v3264_v10, %v3183_v11 }
 0x30f   : > { %v13179_v16 = vpop.f32.mrf.mxu0 }
 0x310   : > { %v3356_v26 = vadd.f32 %v13179_v16, %v3273_v1 }
 0x311   : > { %v13186_v46 = vpop.f32.mrf.mxu1  ;;  %v3349_v7 = vpop.f32.mrf.mxu0 }
 0x312   : > { %v3435_v51 = vadd.f32 %v13186_v46, %v3356_v26  ;;  %v3350_v52 = vadd.f32 %v3349_v7, %v3265_v9 }
 0x313   : > { %v3428_v33 = vpop.f32.mrf.mxu1 }
 0x314   : > { %5090 = vperm.xlu1 %14103, %v3435_v51   ;;  %4984 = vperm.xlu0 %14099, %v3435_v51   ;;  %v3429_v50 = vadd.f32 %v3428_v33, %v3350_v52 }
 0x317   : > { %v13193_v18 = vpop.f32.mrf.mxu0 }
 0x318   : > { %14104 = vset.pattern.permute.xlu1 %v14291_v8  ;;  %14102 = vset.pattern.permute.xlu0 %v14292_v54 }
 0x319   : > { %5140 = vperm.xlu1 %14104, %v3435_v51   ;;  %5040 = vperm.xlu0 %14102, %v3435_v51   ;;  %v13200_v57 = vpop.f32.mrf.mxu1  ;;  %v3517_v59 = vpop.f32.mrf.mxu0 }
 0x31a   : > { %v3615_v25 = vadd.f32 %v13200_v57, %v13193_v18 }
 0x31b   : > { %v3608_v44 = vpop.f32.mrf.mxu1 }
 0x31c   : > { %v3609_v1 = vadd.f32 %v3608_v44, %v3517_v59 }
 0x31d   : > { %14106 = vset.pattern.permute.xlu1 %v14293_v60  ;;  %14105 = vset.pattern.permute.xlu0 %v14294_v0 }
 0x31e   : > { %5240 = vperm.xlu1 %14106, %v3435_v51   ;;  %5190 = vperm.xlu0 %14105, %v3435_v51  }
 0x31f   : > { %v13207_v47 = vpop.f32.mrf.mxu0 }
 0x320   : > { %v3698_v3 = vadd.f32 %v13207_v47, %v3615_v25 }
 0x321   : > { %v13214_v53 = vpop.f32.mrf.mxu1  ;;  %v3690_v13 = vpop.f32.mrf.mxu0 }
 0x322   : > { %14108 = vset.pattern.permute.xlu1 %v14295_v15  ;;  %14107 = vset.pattern.permute.xlu0 %v14296_v2  ;;  %v3781_v40 = vadd.f32 %v13214_v53, %v3698_v3  ;;  %v3691_v10 = vadd.f32 %v3690_v13, %v3609_v1 }
 0x323   : > { %5340 = vperm.xlu1 %14108, %v3435_v51   ;;  %5290 = vperm.xlu0 %14107, %v3435_v51   ;;  %v3772_v29 = vpop.f32.mrf.mxu1 }
 0x324   : > { %v3773_v26 = vadd.f32 %v3772_v29, %v3691_v10 }
 0x327   : > { %14110 = vset.pattern.permute.xlu1 %v14286_v5  ;;  %14109 = vset.pattern.permute.xlu0 %v14297_v32  ;;  %v13221_v24 = vpop.f32.mrf.mxu0 }
 0x328   : > { %5390 = vperm.xlu0 %14109, %v3435_v51   ;;  %4979 = vperm.xlu1 %14110, %v3429_v50   ;;  %v3864_v42 = vadd.f32 %v13221_v24, %v3781_v40 }
 0x329   : > { %v13228_v31 = vpop.f32.mrf.mxu1  ;;  %v3857_v16 = vpop.f32.mrf.mxu0 }
 0x32a   : > { %v15030_v17 = vadd.f32 %v13228_v31, %v3864_v42  ;;  %v3858_v46 = vadd.f32 %v3857_v16, %v3773_v26 }
 0x32b   : > { %v3936_v58 = vpop.f32.mrf.mxu1 }
 0x32c   : > { %14113 = vset.pattern.permute.xlu0 %v14291_v8  ;;  %14111 = vset.pattern.permute.xlu1 %v14292_v54  ;;  %v15041_v11 = vadd.f32 %v3936_v58, %v3858_v46 }
 0x32d   : > { %5136 = vperm.xlu0 %14113, %v3429_v50   ;;  %5036 = vperm.xlu1 %14111, %v3429_v50  }
 0x32f   : > { %v13235_v51 = vpop.f32.mrf.mxu0 }
 0x331   : > { %14118 = vset.pattern.permute.xlu0 %v14297_v32  ;;  %14112 = vset.pattern.permute.xlu1 %v14290_v41  ;;  %v13242_v7 = vpop.f32.mrf.mxu1  ;;  %v4025_v9 = vpop.f32.mrf.mxu0 }
 0x332   : > { %5386 = vperm.xlu0 %14118, %v3429_v50   ;;  %5086 = vperm.xlu1 %14112, %v3429_v50   ;;  %v4123_v18 = vadd.f32 %v13242_v7, %v13235_v51 }
 0x333   : > { %v4116_v33 = vpop.f32.mrf.mxu1 }
 0x334   : > { %v4117_v24 = vadd.f32 %v4116_v33, %v4025_v9 }
 0x336   : > { %14120 = vset.pattern.permute.xlu0 %v14292_v54  ;;  %14114 = vset.pattern.permute.xlu1 %v14294_v0 }
 0x337   : > { %5048 = vperm.xlu0 %14120, %v15030_v17   ;;  %5186 = vperm.xlu1 %14114, %v3429_v50   ;;  %v13249_v52 = vpop.f32.mrf.mxu0 }
 0x338   : > { %v4206_v57 = vadd.f32 %v13249_v52, %v4123_v18 }
 0x339   : > { %v13256_v59 = vpop.f32.mrf.mxu1  ;;  %v4198_v47 = vpop.f32.mrf.mxu0 }
 0x33a   : > { %v4289_v44 = vadd.f32 %v13256_v59, %v4206_v57  ;;  %v4199_v40 = vadd.f32 %v4198_v47, %v4117_v24 }
 0x33b   : > { %14123 = vset.pattern.permute.xlu0 %v14294_v0  ;;  %14115 = vset.pattern.permute.xlu1 %v14293_v60  ;;  %v4280_v3 = vpop.f32.mrf.mxu1 }
 0x33c   : > { %5198 = vperm.xlu0 %14123, %v15030_v17   ;;  %5236 = vperm.xlu1 %14115, %v3429_v50   ;;  %v4281_v42 = vadd.f32 %v4280_v3, %v4199_v40 }
 0x33f   : > { %v13263_v25 = vpop.f32.mrf.mxu0 }
 0x340   : > { %14125 = vset.pattern.permute.xlu0 %v14296_v2  ;;  %14116 = vset.pattern.permute.xlu1 %v14296_v2  ;;  %v4372_v53 = vadd.f32 %v13263_v25, %v4289_v44 }
 0x341   : > { %5298 = vperm.xlu0 %14125, %v15030_v17   ;;  %5286 = vperm.xlu1 %14116, %v3429_v50   ;;  %v4365_v29 = vpop.f32.mrf.mxu0 }
 0x342   : > { %v4366_v31 = vadd.f32 %v4365_v29, %v4281_v42  ;;  %v15102_v42 = vpop.permute.xlu1 %6064 }
 0x345   : > { %14128 = vset.pattern.permute.xlu0 %v14286_v5  ;;  %14117 = vset.pattern.permute.xlu1 %v14295_v15 }
 0x346   : > { %4989 = vperm.xlu0 %14128, %v15041_v11   ;;  %5336 = vperm.xlu1 %14117, %v3429_v50   ;;  %v13270_v50 = vpop.f32.mrf.mxu1 }
 0x347   : > { %v15054_v13 = vadd.f32 %v13270_v50, %v4372_v53  ;;  %v13277_v1 = vpop.f32.mrf.mxu0 }
 0x348   : > { %v4444_v10 = vpop.f32.mrf.mxu1 }
 0x349   : > { %v15068_v16 = vadd.f32 %v4444_v10, %v4366_v31  ;;  %v4533_v46 = vpop.f32.mrf.mxu0  ;;  %v15108_v31 = vpop.permute.xlu1 %6062 }
 0x34a   : > { %14131 = vset.pattern.permute.xlu0 %v14291_v8  ;;  %14119 = vset.pattern.permute.xlu1 %v14286_v5  ;;  %v13284_v26 = vpop.f32.mrf.mxu1 }
 0x34b   : > { %5144 = vperm.xlu0 %14131, %v15041_v11   ;;  %4994 = vperm.xlu1 %14119, %v15030_v17   ;;  %v4631_v58 = vadd.f32 %v13284_v26, %v13277_v1  ;;  %v15119_v1 = vpop.permute.xlu0 %6578 }
 0x34c   : > { %v4624_v7 = vpop.f32.mrf.mxu1 }
 0x34d   : > { %v4625_v44 = vadd.f32 %v4624_v7, %v4533_v46 }
 0x34f   : > { %14136 = vset.pattern.permute.xlu0 %v14297_v32  ;;  %14121 = vset.pattern.permute.xlu1 %v14290_v41  ;;  %v13291_v51 = vpop.f32.mrf.mxu0 }
 0x350   : > { %5394 = vperm.xlu0 %14136, %v15041_v11   ;;  %5098 = vperm.xlu1 %14121, %v15030_v17   ;;  %v4714_v9 = vadd.f32 %v13291_v51, %v4631_v58 }
 0x351   : > { %v13298_v52 = vpop.f32.mrf.mxu1  ;;  %v4706_v18 = vpop.f32.mrf.mxu0 }
 0x352   : > { %v4797_v57 = vadd.f32 %v13298_v52, %v4714_v9  ;;  %v4707_v3 = vadd.f32 %v4706_v18, %v4625_v44  ;;  %v15141_v9 = vand.u32 127, %v4962_v34 }
 0x353   : > { %v4788_v59 = vpop.f32.mrf.mxu1 }
 0x354   : > { %14138 = vset.pattern.permute.xlu0 %v14292_v54  ;;  %14122 = vset.pattern.permute.xlu1 %v14291_v8  ;;  %v4789_v50 = vadd.f32 %v4788_v59, %v4707_v3  ;;  %v15146_v52 = vsub.s32 %v15141_v9, %v14949_v20 }
 0x355   : > { %5056 = vperm.xlu0 %14138, %v15054_v13   ;;  %5148 = vperm.xlu1 %14122, %v15030_v17  }
 0x356   : > { %vm4975_vm2 = vcmp.eq.s32.totalorder %v15146_v52, 4294967292  ;;  %vm5033_vm3 = vcmp.eq.s32.totalorder %v15146_v52, 4294967293  ;;  %vm5083_vm4 = vcmp.eq.s32.totalorder %v15146_v52, 4294967294  ;;  %vm5133_vm5 = vcmp.eq.s32.totalorder %v15146_v52, 4294967295 }
 0x357   : > { %v13305_v33 = vpop.f32.mrf.mxu0  ;;  %vm5183_vm6 = vcmp.eq.s32.totalorder %v15146_v52, 0  ;;  %vm17414_vm7 = vcmp.eq.s32.totalorder %v15146_v52, 1  ;;  %vm17413_vm8 = vcmp.eq.s32.totalorder %v15146_v52, 2  ;;  %vm17415_vm9 = vcmp.eq.s32.totalorder %v15146_v52, 3 }
 0x358   : > { %v4880_v47 = vadd.f32 %v13305_v33, %v4797_v57  ;;  %vm17416_vm10 = vcmp.eq.s32.totalorder %v15146_v52, 4 }
 0x359   : > { %14141 = vset.pattern.permute.xlu0 %v14294_v0  ;;  %14124 = vset.pattern.permute.xlu1 %v14293_v60  ;;  %v4873_v53 = vpop.f32.mrf.mxu0 }
 0x35a   : > { %5206 = vperm.xlu0 %14141, %v15054_v13   ;;  %5248 = vperm.xlu1 %14124, %v15030_v17   ;;  %v4874_v24 = vadd.f32 %v4873_v53, %v4789_v50 }
 0x35e   : > { %14143 = vset.pattern.permute.xlu0 %v14296_v2  ;;  %14126 = vset.pattern.permute.xlu1 %v14295_v15 }
 0x35f   : > { %5306 = vperm.xlu0 %14143, %v15054_v13   ;;  %5348 = vperm.xlu1 %14126, %v15030_v17  }
 0x363   : > { %14146 = vset.pattern.permute.xlu0 %v14286_v5  ;;  %14127 = vset.pattern.permute.xlu1 %v14297_v32 }
 0x364   : > { %4999 = vperm.xlu0 %14146, %v15068_v16   ;;  %5398 = vperm.xlu1 %14127, %v15030_v17   ;;  %v13312_v17 = vpop.f32.mrf.mxu1 }
 0x365   : > { %v15082_v25 = vadd.f32 %v13312_v17, %v4880_v47 }
 0x366   : > { %v4952_v40 = vpop.f32.mrf.mxu1 }
 0x367   : > { %v15096_v29 = vadd.f32 %v4952_v40, %v4874_v24 }
 0x368   : > { %14149 = vset.pattern.permute.xlu0 %v14291_v8  ;;  %14129 = vset.pattern.permute.xlu1 %v14292_v54 }
 0x369   : > { %5152 = vperm.xlu0 %14149, %v15068_v16   ;;  %5044 = vperm.xlu1 %14129, %v15041_v11  }
 0x36d   : > { %14154 = vset.pattern.permute.xlu0 %v14297_v32  ;;  %14130 = vset.pattern.permute.xlu1 %v14290_v41 }
 0x36e   : > { %5402 = vperm.xlu0 %14154, %v15068_v16   ;;  %5094 = vperm.xlu1 %14130, %v15041_v11  }
 0x372   : > { %14156 = vset.pattern.permute.xlu0 %v14292_v54  ;;  %14132 = vset.pattern.permute.xlu1 %v14294_v0 }
 0x373   : > { %5064 = vperm.xlu0 %14156, %v15082_v25   ;;  %5194 = vperm.xlu1 %14132, %v15041_v11  }
 0x377   : > { %14159 = vset.pattern.permute.xlu0 %v14294_v0  ;;  %14133 = vset.pattern.permute.xlu1 %v14293_v60 }
 0x378   : > { %5214 = vperm.xlu0 %14159, %v15082_v25   ;;  %5244 = vperm.xlu1 %14133, %v15041_v11  }
 0x37c   : > { %14162 = vset.pattern.permute.xlu0 %v14295_v15  ;;  %14134 = vset.pattern.permute.xlu1 %v14296_v2 }
 0x37d   : > { %5364 = vperm.xlu0 %14162, %v15082_v25   ;;  %5294 = vperm.xlu1 %14134, %v15041_v11  }
 0x381   : > { %14164 = vset.pattern.permute.xlu0 %v14286_v5  ;;  %14135 = vset.pattern.permute.xlu1 %v14295_v15 }
 0x382   : > { %5009 = vperm.xlu0 %14164, %v15096_v29   ;;  %5344 = vperm.xlu1 %14135, %v15041_v11  }
 0x386   : > { %14167 = vset.pattern.permute.xlu0 %v14291_v8  ;;  %14137 = vset.pattern.permute.xlu1 %v14286_v5 }
 0x387   : > { %5160 = vperm.xlu0 %14167, %v15096_v29   ;;  %5004 = vperm.xlu1 %14137, %v15054_v13  }
 0x38b   : > { %14170 = vset.pattern.permute.xlu0 %v14296_v2  ;;  %14139 = vset.pattern.permute.xlu1 %v14290_v41 }
 0x38c   : > { %5310 = vperm.xlu0 %14170, %v15096_v29   ;;  %5106 = vperm.xlu1 %14139, %v15054_v13  }
 0x38f   : > { %v15114_v11 = vpop.permute.xlu1 %5090  ;;  %v15125_v26 = vpop.permute.xlu0 %4984 }
 0x390   : > { %14140 = vset.pattern.permute.xlu1 %v14291_v8  ;;  %14173 = vset.pattern.permute.xlu0 %v14289_v39 }
 0x391   : > { %5156 = vperm.xlu1 %14140, %v15054_v13  }
 0x394   : > { %v15121_v10 = vpop.permute.xlu1 %5140  ;;  %v15131_v51 = vpop.permute.xlu0 %5040 }
 0x395   : > { %14142 = vset.pattern.permute.xlu1 %v14293_v60 }
 0x396   : > { %5256 = vperm.xlu1 %14142, %v15054_v13  }
 0x399   : > { %v15127_v46 = vpop.permute.xlu1 %5240  ;;  %v15137_v58 = vpop.permute.xlu0 %5190 }
 0x39a   : > { %14144 = vset.pattern.permute.xlu1 %v14295_v15 }
 0x39b   : > { %5356 = vperm.xlu1 %14144, %v15054_v13  }
 0x39e   : > { %v15133_v39 = vpop.permute.xlu1 %5340  ;;  %v15148_v33 = vpop.permute.xlu0 %5290 }
 0x39f   : > { %14145 = vset.pattern.permute.xlu1 %v14297_v32 }
 0x3a0   : > { %5406 = vperm.xlu1 %14145, %v15054_v13   ;;  %v1300_v13 = vadd.f32 %v15002_v48, %v14877_v6 }
 0x3a2   : > { %v1379_v57 = vadd.f32 %v15004_v49, %v1300_v13 }
 0x3a3   : > { %v4980_v7 = vpop.permute.xlu1 %4979  ;;  %v15160_v59 = vpop.permute.xlu0 %5390 }
 0x3a4   : > { %14147 = vset.pattern.permute.xlu1 %v14292_v54  ;;  %v5017_v20 = vsel %vm4975_vm2, %v4980_v7, 0.0 }
 0x3a5   : > { %5052 = vperm.xlu1 %14147, %v15068_v16   ;;  %v5025_v48 = vadd.f32 %v5017_v20, %v1379_v57  ;;  %v12278_v57 = vld [vmem:[%s265_s28] ss:$0 sm:$0xff]  ;;  %s14299_s28 = smov 8  }
 0x3a8   : > { %v5037_v18 = vpop.permute.xlu1 %5036  ;;  %v5137_v49 = vpop.permute.xlu0 %5136 }
 0x3a9   : > { %14148 = vset.pattern.permute.xlu1 %v14290_v41  ;;  %v5067_v6 = vsel %vm5033_vm3, %v5037_v18, 0.0  ;;  %v5167_v50 = vsel %vm5133_vm5, %v5137_v49, 0.0 }
 0x3aa   : > { %5102 = vperm.xlu1 %14148, %v15068_v16   ;;  %v5075_v44 = vadd.f32 %v5067_v6, %v5025_v48 }
 0x3ad   : > { %v5087_v34 = vpop.permute.xlu1 %5086  ;;  %v5387_v6 = vpop.permute.xlu0 %5386 }
 0x3ae   : > { %14150 = vset.pattern.permute.xlu1 %v14294_v0  ;;  %v5117_v47 = vsel %vm5083_vm4, %v5087_v34, 0.0 }
 0x3af   : > { %5202 = vperm.xlu1 %14150, %v15068_v16   ;;  %v5125_v3 = vadd.f32 %v5117_v47, %v5075_v44 }
 0x3b1   : > { %v5175_v24 = vadd.f32 %v5167_v50, %v5125_v3  ;;  %v5417_v3 = vsel %vm17416_vm10, %v5387_v6, 0.0 }
 0x3b2   : > { %v5187_v17 = vpop.permute.xlu1 %5186 }
 0x3b3   : > { %14151 = vset.pattern.permute.xlu1 %v14293_v60  ;;  %v5217_v40 = vsel %vm5183_vm6, %v5187_v17, 0.0  ;;  %v15195_v17 = vsub.s32 %v15141_v9, %v14926_v14 }
 0x3b4   : > { %5252 = vperm.xlu1 %14151, %v15068_v16   ;;  %v5225_v13 = vadd.f32 %v5217_v40, %v5175_v24  ;;  %v5049_v24 = vpop.permute.xlu0 %5048 }
 0x3b5   : > { %vm4976_vm11 = vcmp.eq.s32.totalorder %v15195_v17, 4294967292  ;;  %vm5034_vm14 = vcmp.eq.s32.totalorder %v15195_v17, 4294967293  ;;  %vm17417_vm15 = vcmp.eq.s32.totalorder %v15195_v17, 4294967294  ;;  %vm17409_vm0 = vcmp.eq.s32.totalorder %v15195_v17, 4294967295 }
 0x3b6   : > { %vm17410_vm1 = vcmp.eq.s32.totalorder %v15195_v17, 0 }
 0x3b7   : > { %v5237_v53 = vpop.permute.xlu1 %5236 }
 0x3b8   : > { %14152 = vset.pattern.permute.xlu1 %v14296_v2  ;;  %v5267_v7 = vsel %vm17414_vm7, %v5237_v53, 0.0 }
 0x3b9   : > { %5302 = vperm.xlu1 %14152, %v15068_v16   ;;  %v5275_v20 = vadd.f32 %v5267_v7, %v5225_v13 }
 0x3bc   : > { %v5287_v18 = vpop.permute.xlu1 %5286 }
 0x3bd   : > { %14153 = vset.pattern.permute.xlu1 %v14295_v15  ;;  %v5317_v34 = vsel %vm17413_vm8, %v5287_v18, 0.0  ;;  %v5070_v18 = vsel %vm5034_vm14, %v5049_v24, 0.0 }
 0x3be   : > { %5352 = vperm.xlu1 %14153, %v15068_v16   ;;  %v5325_v48 = vadd.f32 %v5317_v34, %v5275_v20  ;;  %v15201_v16 = vmul.f32 %v12278_v57, %v14934_v36  ;;  %v5199_v20 = vpop.permute.xlu0 %5198 }
 0x3c0   : > { %vm17408_vm12 = vcmp.eq.f32.partialorder %v15201_v16, 0.0 }
 0x3c1   : > { %v5337_v47 = vpop.permute.xlu1 %5336 }
 0x3c2   : > { %v5367_v44 = vsel %vm17415_vm9, %v5337_v47, 0.0  ;;  %14155 = vset.pattern.permute.xlu1 %v14286_v5 }
 0x3c3   : > { %v5375_v49 = vadd.f32 %v5367_v44, %v5325_v48  ;;  %5014 = vperm.xlu1 %14155, %v15082_v25  }
 0x3c5   : > { %v5425_v53 = vadd.f32 %v5417_v3, %v5375_v49 }
 0x3c6   : > { %v4995_v50 = vpop.permute.xlu1 %4994 }
 0x3c7   : > { %v5020_v14 = vsel %vm4976_vm11, %v4995_v50, 0.0  ;;  %14157 = vset.pattern.permute.xlu1 %v14290_v41  ;;  %v15213_v5 = vsel %vm17408_vm12, -100000.0, %v5425_v53  ;;  %vm17411_vm12 = vcmp.eq.s32.totalorder %v15195_v17, 1  ;;  %v5299_v50 = vpop.permute.xlu0 %5298 }
 0x3c8   : > { %v5028_v40 = vadd.f32 %v5020_v14, %v15006_v28  ;;  %5114 = vperm.xlu1 %14157, %v15082_v25   ;;  %v5460_v7 = vsel %vm5459_vm13, %v15213_v5, -inf }
 0x3c9   : > { %5461 = vmax.xlane.f32.xlu0 %v5460_v7 }
 0x3ca   : > { %v5078_v34 = vadd.f32 %v5070_v18, %v5028_v40 }
 0x3cb   : > { %v5099_v13 = vpop.permute.xlu1 %5098 }
 0x3cc   : > { %14158 = vset.pattern.permute.xlu1 %v14291_v8  ;;  %v5120_v28 = vsel %vm17417_vm15, %v5099_v13, 0.0  ;;  %v5220_v8 = vsel %vm17410_vm1, %v5199_v20, 0.0  ;;  %vm5334_vm1 = vcmp.eq.s32.totalorder %v15195_v17, 3 }
 0x3cd   : > { %5164 = vperm.xlu1 %14158, %v15082_v25   ;;  %v5128_v6 = vadd.f32 %v5120_v28, %v5078_v34 }
 0x3d0   : > { %v5149_v48 = vpop.permute.xlu1 %5148 }
 0x3d1   : > { %v5170_v47 = vsel %vm17409_vm0, %v5149_v48, 0.0  ;;  %14160 = vset.pattern.permute.xlu1 %v14293_v60  ;;  %vm17412_vm0 = vcmp.eq.s32.totalorder %v15195_v17, 2  ;;  %v4990_v48 = vpop.permute.xlu0 %4989 }
 0x3d2   : > { %v5178_v44 = vadd.f32 %v5170_v47, %v5128_v6  ;;  %5264 = vperm.xlu1 %14160, %v15082_v25   ;;  %v5320_v24 = vsel %vm17412_vm0, %v5299_v50, 0.0  ;;  %v5019_v47 = vsel %vm4975_vm2, %v4990_v48, 0.0 }
 0x3d4   : > { %v5228_v49 = vadd.f32 %v5220_v8, %v5178_v44  ;;  %v5027_v8 = vadd.f32 %v5019_v47, %v15008_v63  ;;  %v5018_v63 = vsel %vm4976_vm11, %v15125_v26, 0.0 }
 0x3d5   : > { %v5249_v3 = vpop.permute.xlu1 %5248 }
 0x3d6   : > { %v5270_v53 = vsel %vm17411_vm12, %v5249_v3, 0.0  ;;  %14161 = vset.pattern.permute.xlu1 %v14296_v2  ;;  %v15249_v2 = vmul.f32 %v12278_v57, %v14944_v23  ;;  %vm5384_vm12 = vcmp.eq.s32.totalorder %v15195_v17, 4 }
 0x3d7   : > { %v5278_v14 = vadd.f32 %v5270_v53, %v5228_v49  ;;  %5314 = vperm.xlu1 %14161, %v15082_v25   ;;  %v5145_v53 = vpop.permute.xlu0 %5144 }
 0x3d8   : > { %vm5450_vm0 = vcmp.eq.f32.partialorder %v15249_v2, 0.0 }
 0x3d9   : > { %v5328_v7 = vadd.f32 %v5320_v24, %v5278_v14 }
 0x3da   : > { %v5349_v40 = vpop.permute.xlu1 %5348 }
 0x3db   : > { %14163 = vset.pattern.permute.xlu1 %v14297_v32  ;;  %v5370_v18 = vsel %vm5334_vm1, %v5349_v40, 0.0  ;;  %v5068_v40 = vsel %vm5034_vm14, %v15131_v51, 0.0  ;;  %v5118_v51 = vsel %vm17417_vm15, %v15114_v11, 0.0 }
 0x3dc   : > { %5414 = vperm.xlu1 %14163, %v15082_v25   ;;  %v5378_v13 = vadd.f32 %v5370_v18, %v5328_v7  ;;  %v5026_v7 = vadd.f32 %v5018_v63, %v14889_v21 }
 0x3de   : > { %v5076_v26 = vadd.f32 %v5068_v40, %v5026_v7 }
 0x3df   : > { %v5399_v34 = vpop.permute.xlu1 %5398 }
 0x3e0   : > { %v5420_v28 = vsel %vm5384_vm12, %v5399_v34, 0.0  ;;  %14165 = vset.pattern.permute.xlu1 %v14292_v54 }
 0x3e1   : > { %v5428_v20 = vadd.f32 %v5420_v28, %v5378_v13  ;;  %5060 = vperm.xlu1 %14165, %v15096_v29  }
 0x3e3   : > { %v15259_v25 = vsel %vm5450_vm0, -100000.0, %v5428_v20  ;;  %v5395_v20 = vpop.permute.xlu0 %5394 }
 0x3e4   : > { %v5045_v57 = vpop.permute.xlu1 %5044  ;;  %v5469_v6 = vsel %vm5459_vm13, %v15259_v25, -inf }
 0x3e5   : > { %14166 = vset.pattern.permute.xlu1 %v14290_v41  ;;  %5470 = vmax.xlane.f32.xlu0 %v5469_v6  ;;  %v5069_v44 = vsel %vm5033_vm3, %v5045_v57, 0.0  ;;  %v5126_v6 = vadd.f32 %v5118_v51, %v5076_v26 }
 0x3e6   : > { %5110 = vperm.xlu1 %14166, %v15096_v29   ;;  %v5077_v3 = vadd.f32 %v5069_v44, %v5027_v8 }
 0x3e9   : > { %v5095_v54 = vpop.permute.xlu1 %5094 }
 0x3ea   : > { %14168 = vset.pattern.permute.xlu1 %v14294_v0  ;;  %v5119_v41 = vsel %vm5083_vm4, %v5095_v54, 0.0  ;;  %v5169_v0 = vsel %vm5133_vm5, %v5145_v53, 0.0 }
 0x3eb   : > { %5210 = vperm.xlu1 %14168, %v15096_v29   ;;  %v5127_v50 = vadd.f32 %v5119_v41, %v5077_v3  ;;  %v5057_v3 = vpop.permute.xlu0 %5056 }
 0x3ed   : > { %v5177_v24 = vadd.f32 %v5169_v0, %v5127_v50 }
 0x3ee   : > { %v5195_v49 = vpop.permute.xlu1 %5194 }
 0x3ef   : > { %14169 = vset.pattern.permute.xlu1 %v14293_v60  ;;  %v5219_v60 = vsel %vm5183_vm6, %v5195_v49, 0.0  ;;  %v5207_v40 = vpop.permute.xlu0 %5206 }
 0x3f0   : > { %5260 = vperm.xlu1 %14169, %v15096_v29   ;;  %v5227_v13 = vadd.f32 %v5219_v60, %v5177_v24 }
 0x3f3   : > { %v5245_v14 = vpop.permute.xlu1 %5244 }
 0x3f4   : > { %14171 = vset.pattern.permute.xlu1 %v14295_v15  ;;  %v5269_v18 = vsel %vm17414_vm7, %v5245_v14, 0.0  ;;  %vm17431_vm7 = vcmp.eq.s32.totalorder %v15195_v17, 0  ;;  %v5072_v14 = vsel %vm5034_vm14, %v5057_v3, 0.0 }
 0x3f5   : > { %5360 = vperm.xlu1 %14171, %v15096_v29   ;;  %v5277_v28 = vadd.f32 %v5269_v18, %v5227_v13  ;;  %v5218_v11 = vsel %vm17431_vm7, %v15137_v58, 0.0  ;;  %vm17433_vm7 = vcmp.eq.s32.totalorder %v15195_v17, 1 }
 0x3f6   : > { %v5268_v63 = vsel %vm17433_vm7, %v15127_v46, 0.0 }
 0x3f8   : > { %v5295_v15 = vpop.permute.xlu1 %5294 }
 0x3f9   : > { %14172 = vset.pattern.permute.xlu1 %v14297_v32  ;;  %v5319_v34 = vsel %vm17413_vm8, %v5295_v15, 0.0  ;;  %v5419_v32 = vsel %vm17416_vm10, %v5395_v20, 0.0  ;;  %vm17430_vm8 = vcmp.eq.s32.totalorder %v15195_v17, 4294967295  ;;  %vm17436_vm10 = vcmp.eq.s32.totalorder %v15195_v17, 0 }
 0x3fa   : > { %5410 = vperm.xlu1 %14172, %v15096_v29   ;;  %v5327_v21 = vadd.f32 %v5319_v34, %v5277_v28  ;;  %v5168_v29 = vsel %vm17430_vm8, %v15121_v10, 0.0  ;;  %vm17434_vm8 = vcmp.eq.s32.totalorder %v15195_v17, 2  ;;  %v5222_v34 = vsel %vm17436_vm10, %v5207_v40, 0.0 }
 0x3fb   : > { %v5176_v44 = vadd.f32 %v5168_v29, %v5126_v6  ;;  %v5368_v28 = vsel %vm5334_vm1, %v15133_v39, 0.0  ;;  %vm17437_vm10 = vcmp.eq.s32.totalorder %v15146_v52, 1 }
 0x3fd   : > { %v5345_v57 = vpop.permute.xlu1 %5344  ;;  %v5226_v50 = vadd.f32 %v5218_v11, %v5176_v44 }
 0x3fe   : > { %v5369_v48 = vsel %vm17415_vm9, %v5345_v57, 0.0  ;;  %vm17432_vm9 = vcmp.eq.f32.partialorder %v15201_v16, 0.0  ;;  %v5307_v57 = vpop.permute.xlu0 %5306 }
 0x3ff   : > { %v5377_v54 = vadd.f32 %v5369_v48, %v5327_v21  ;;  %v5276_v60 = vadd.f32 %v5268_v63, %v5226_v50  ;;  %v5418_v21 = vsel %vm5384_vm12, %v15160_v59, 0.0 }
 0x401   : > { %v5427_v47 = vadd.f32 %v5419_v32, %v5377_v54  ;;  %v5322_v54 = vsel %vm17434_vm8, %v5307_v57, 0.0 }
 0x402   : > { %v5005_v8 = vpop.permute.xlu1 %5004 }
 0x403   : > { %v5022_v41 = vsel %vm4976_vm11, %v5005_v8, 0.0  ;;  %v15312_v49 = vsel %vm17432_vm9, -100000.0, %v5427_v47  ;;  %vm17435_vm9 = vcmp.eq.s32.totalorder %v15195_v17, 4294967295 }
 0x404   : > { %v5030_v53 = vadd.f32 %v5022_v41, %v15010_v56  ;;  %v5466_v10 = vsel %vm5459_vm13, %v15312_v49, -inf  ;;  %v5318_v56 = vsel %vm17434_vm8, %v15148_v33, 0.0  ;;  %vm17440_vm8 = vcmp.eq.s32.totalorder %v15195_v17, 4294967295 }
 0x405   : > { %5467 = vmax.xlane.f32.xlu0 %v5466_v10  ;;  %v5326_v13 = vadd.f32 %v5318_v56, %v5276_v60 }
 0x406   : > { %v5080_v58 = vadd.f32 %v5072_v14, %v5030_v53 }
 0x407   : > { %v5107_v0 = vpop.permute.xlu1 %5106  ;;  %v5376_v20 = vadd.f32 %v5368_v28, %v5326_v13 }
 0x408   : > { %v5122_v24 = vsel %vm17417_vm15, %v5107_v0, 0.0  ;;  %v5000_v0 = vpop.permute.xlu0 %4999 }
 0x409   : > { %v5130_v7 = vadd.f32 %v5122_v24, %v5080_v58  ;;  %v5426_v48 = vadd.f32 %v5418_v21, %v5376_v20  ;;  %v5021_v63 = vsel %vm4975_vm2, %v5000_v0, 0.0 }
 0x40a   : > { %v5029_v40 = vadd.f32 %v5021_v63, %v15012_v4 }
 0x40b   : > { %v15345_v47 = vsel %vm5450_vm0, -100000.0, %v5426_v48 }
 0x40c   : > { %v5157_v18 = vpop.permute.xlu1 %5156  ;;  %v5463_v41 = vsel %vm5459_vm13, %v15345_v47, -inf  ;;  %v5153_v24 = vpop.permute.xlu0 %5152 }
 0x40d   : > { %v5172_v15 = vsel %vm17435_vm9, %v5157_v18, 0.0  ;;  %vm17438_vm9 = vcmp.eq.s32.totalorder %v15146_v52, 2 }
 0x40e   : > { %v5180_v26 = vadd.f32 %v5172_v15, %v5130_v7 }
 0x410   : > { %v5230_v46 = vadd.f32 %v5222_v34, %v5180_v26  ;;  %v5403_v26 = vpop.permute.xlu0 %5402 }
 0x411   : > { %v5257_v51 = vpop.permute.xlu1 %5256 }
 0x412   : > { %v5272_v33 = vsel %vm17433_vm7, %v5257_v51, 0.0  ;;  %vm17439_vm7 = vcmp.eq.s32.totalorder %v15146_v52, 3 }
 0x413   : > { %v5280_v6 = vadd.f32 %v5272_v33, %v5230_v46 }
 0x414   : > { %v5065_v20 = vpop.permute.xlu0 %5064 }
 0x415   : > { %v5330_v29 = vadd.f32 %v5322_v54, %v5280_v6  ;;  %v5074_v6 = vsel %vm5034_vm14, %v5065_v20, 0.0 }
 0x416   : > { %v5357_v32 = vpop.permute.xlu1 %5356 }
 0x417   : > { %v5372_v39 = vsel %vm5334_vm1, %v5357_v32, 0.0 }
 0x418   : > { %v5380_v44 = vadd.f32 %v5372_v39, %v5330_v29 }
 0x41b   : > { %v5407_v8 = vpop.permute.xlu1 %5406 }
 0x41c   : > { %v5422_v59 = vsel %vm5384_vm12, %v5407_v8, 0.0 }
 0x41d   : > { %v5430_v11 = vadd.f32 %v5422_v59, %v5380_v44 }
 0x41e   : > { %5464 = vmax.xlane.f32.xlu1 %v5463_v41 }
 0x41f   : > { %v15353_v3 = vsel %vm5450_vm0, -100000.0, %v5430_v11 }
 0x420   : > { %v5053_v53 = vpop.permute.xlu1 %5052  ;;  %v5475_v10 = vsel %vm5459_vm13, %v15353_v3, -inf }
 0x421   : > { %5476 = vmax.xlane.f32.xlu0 %v5475_v10  ;;  %v5071_v60 = vsel %vm5033_vm3, %v5053_v53, 0.0  ;;  %v5215_v53 = vpop.permute.xlu0 %5214 }
 0x422   : > { %v5079_v18 = vadd.f32 %v5071_v60, %v5029_v40 }
 0x425   : > { %v5103_v50 = vpop.permute.xlu1 %5102  ;;  %v5365_v60 = vpop.permute.xlu0 %5364 }
 0x426   : > { %v5121_v7 = vsel %vm5083_vm4, %v5103_v50, 0.0 }
 0x427   : > { %v5129_v15 = vadd.f32 %v5121_v7, %v5079_v18 }
 0x42a   : > { %v5203_v14 = vpop.permute.xlu1 %5202 }
 0x42b   : > { %v5221_v46 = vsel %vm5183_vm6, %v5203_v14, 0.0 }
 0x42f   : > { %6576 = vrot.lane.b32.xlu1 %v14526_v12, %s14288_s13  ;;  %v5253_v58 = vpop.permute.xlu1 %5252  ;;  %v5171_v12 = vsel %vm5133_vm5, %v5153_v24, 0.0 }
 0x430   : > { %v5179_v34 = vadd.f32 %v5171_v12, %v5129_v15  ;;  %v5271_v4 = vsel %vm17437_vm10, %v5253_v58, 0.0  ;;  %vm17441_vm10 = vcmp.eq.s32.totalorder %v15146_v52, 4 }
 0x431   : > { %v5421_v41 = vsel %vm17441_vm10, %v5403_v26, 0.0  ;;  %vm17448_vm10 = vcmp.eq.s32.totalorder %v15146_v52, 3 }
 0x432   : > { %v5229_v21 = vadd.f32 %v5221_v46, %v5179_v34  ;;  %v5010_v46 = vpop.permute.xlu0 %5009 }
 0x433   : > { %v5023_v20 = vsel %vm4975_vm2, %v5010_v46, 0.0 }
 0x434   : > { %v5303_v56 = vpop.permute.xlu1 %5302  ;;  %v5279_v48 = vadd.f32 %v5271_v4, %v5229_v21 }
 0x435   : > { %v5321_v57 = vsel %vm17438_vm9, %v5303_v56, 0.0  ;;  %vm17442_vm9 = vcmp.eq.s32.totalorder %v15195_v17, 0 }
 0x436   : > { %v5329_v39 = vadd.f32 %v5321_v57, %v5279_v48  ;;  %v5224_v14 = vsel %vm17442_vm9, %v5215_v53, 0.0  ;;  %v5031_v57 = vadd.f32 %v5023_v20, %v15016_v55  ;;  %vm17449_vm9 = vcmp.eq.s32.totalorder %v15146_v52, 4 }
 0x439   : > { %v5353_v13 = vpop.permute.xlu1 %5352 }
 0x43a   : > { %v5371_v32 = vsel %vm17439_vm7, %v5353_v13, 0.0  ;;  %vm17443_vm7 = vcmp.eq.s32.totalorder %v15195_v17, 1  ;;  %v5374_v13 = vsel %vm5334_vm1, %v5365_v60, 0.0 }
 0x43b   : > { %v5379_v8 = vadd.f32 %v5371_v32, %v5329_v39 }
 0x43d   : > { %v5429_v50 = vadd.f32 %v5421_v41, %v5379_v8 }
 0x43e   : > { %v5015_v28 = vpop.permute.xlu1 %5014 }
 0x43f   : > { %v5024_v51 = vsel %vm4976_vm11, %v5015_v28, 0.0 }
 0x440   : > { %v5032_v33 = vadd.f32 %v5024_v51, %v15014_v61 }
 0x442   : > { %v5082_v29 = vadd.f32 %v5074_v6, %v5032_v33 }
 0x443   : > { %v5115_v54 = vpop.permute.xlu1 %5114 }
 0x444   : > { %v5124_v44 = vsel %vm17417_vm15, %v5115_v54, 0.0  ;;  %vm17444_vm15 = vcmp.eq.f32.partialorder %v15201_v16, 0.0  ;;  %v5161_v54 = vpop.permute.xlu0 %5160 }
 0x445   : > { %v5132_v59 = vadd.f32 %v5124_v44, %v5082_v29  ;;  %v15393_v24 = vsel %vm17444_vm15, -100000.0, %v5429_v50  ;;  %v5173_v29 = vsel %vm5133_vm5, %v5161_v54, 0.0  ;;  %vm17447_vm15 = vcmp.eq.s32.totalorder %v15146_v52, 2 }
 0x446   : > { %v5472_v7 = vsel %vm5459_vm13, %v15393_v24, -inf }
 0x448   : > { %v5165_v61 = vpop.permute.xlu1 %5164 }
 0x449   : > { %v5174_v11 = vsel %vm17440_vm8, %v5165_v61, 0.0  ;;  %vm17445_vm8 = vcmp.eq.s32.totalorder %v15195_v17, 2 }
 0x44a   : > { %v5182_v10 = vadd.f32 %v5174_v11, %v5132_v59  ;;  %v5311_v11 = vpop.permute.xlu0 %5310 }
 0x44b   : > { %v5323_v53 = vsel %vm17447_vm15, %v5311_v11, 0.0  ;;  %vm17453_vm15 = vcmp.eq.s32.totalorder %v15195_v17, 0 }
 0x44c   : > { %v5232_v58 = vadd.f32 %v5224_v14, %v5182_v10 }
 0x44d   : > { %v5265_v0 = vpop.permute.xlu1 %5264 }
 0x44e   : > { %v5274_v63 = vsel %vm17443_vm7, %v5265_v0, 0.0  ;;  %vm17450_vm7 = vcmp.eq.f32.partialorder %v15201_v16, 0.0 }
 0x44f   : > { %v5282_v56 = vadd.f32 %v5274_v63, %v5232_v58 }
 0x452   : > { %v5315_v40 = vpop.permute.xlu1 %5314 }
 0x453   : > { %v5324_v18 = vsel %vm17445_vm8, %v5315_v40, 0.0  ;;  %5473 = vmax.xlane.f32.xlu1 %v5472_v7  ;;  %v5462_v7 = vpop.xlane.xlu0 %5461  ;;  %vm17451_vm8 = vcmp.eq.s32.totalorder %v15195_v17, 4294967295 }
 0x454   : > { %v5332_v15 = vadd.f32 %v5324_v18, %v5282_v56 }
 0x456   : > { %v5382_v26 = vadd.f32 %v5374_v13, %v5332_v15  ;;  %v5484_v15 = vsub.f32 %v15213_v5, %v5462_v7 }
 0x457   : > { %v5415_v12 = vpop.permute.xlu1 %5414 }
 0x458   : > { %v5424_v34 = vsel %vm5384_vm12, %v5415_v12, 0.0  ;;  %v5492_v13 = vmul.f32 1.442695, %v5484_v15 }
 0x459   : > { %v5432_v28 = vadd.f32 %v5424_v34, %v5382_v26 }
 0x45a   : > { %14174 = vpow2.f32 %v5492_v13  ;;  %v15485_v13 = vand.u32 4294901760, %v15102_v42 }
 0x45b   : > { %v15405_v51 = vsel %vm5450_vm0, -100000.0, %v5432_v28  ;;  %vm17446_vm0 = vcmp.eq.s32.totalorder %v15146_v52, 1 }
 0x45c   : > { %v5061_v4 = vpop.permute.xlu1 %5060  ;;  %v5481_v33 = vsel %vm5459_vm13, %v15405_v51, -inf }
 0x45d   : > { %5482 = vmax.xlane.f32.xlu0 %v5481_v33  ;;  %v5073_v21 = vsel %vm5033_vm3, %v5061_v4, 0.0 }
 0x45e   : > { %v5081_v6 = vadd.f32 %v5073_v21, %v5031_v57 }
 0x461   : > { %v5111_v48 = vpop.permute.xlu1 %5110 }
 0x462   : > { %v5123_v2 = vsel %vm5083_vm4, %v5111_v48, 0.0 }
 0x463   : > { %v5131_v32 = vadd.f32 %v5123_v2, %v5081_v6 }
 0x465   : > { %v5181_v44 = vadd.f32 %v5173_v29, %v5131_v32 }
 0x466   : > { %v5211_v39 = vpop.permute.xlu1 %5210 }
 0x467   : > { %v5223_v8 = vsel %vm5183_vm6, %v5211_v39, 0.0  ;;  %v14175_v33 = vpop.eup %14174 }
 0x468   : > { %v5231_v59 = vadd.f32 %v5223_v8, %v5181_v44  ;;  %v5508_v21 = vsel %vm5459_vm13, %v14175_v33, 0.0 }
 0x46b   : > { %v5261_v61 = vpop.permute.xlu1 %5260 }
 0x46c   : > { %v5273_v55 = vsel %vm17446_vm0, %v5261_v61, 0.0  ;;  %vm17452_vm0 = vcmp.eq.s32.totalorder %v15195_v17, 4294967294 }
 0x46d   : > { %v5281_v41 = vadd.f32 %v5273_v55, %v5231_v59 }
 0x46e   : > { %v5471_v18 = vpop.xlane.xlu0 %5470 }
 0x46f   : > { %v5331_v50 = vadd.f32 %v5323_v53, %v5281_v41  ;;  %v5487_v16 = vsub.f32 %v15259_v25, %v5471_v18 }
 0x470   : > { %v5361_v10 = vpop.permute.xlu1 %5360 }
 0x471   : > { %v5373_v14 = vsel %vm17448_vm10, %v5361_v10, 0.0  ;;  %v5498_v28 = vmul.f32 1.442695, %v5487_v16  ;;  %vm17454_vm10 = vcmp.eq.s32.totalorder %v15195_v17, 1 }
 0x472   : > { %v5381_v0 = vadd.f32 %v5373_v14, %v5331_v50 }
 0x473   : > { %7092 = vrot.lane.b32.xlu0 %v14555_v30, %s14288_s13 }
 0x475   : > { %v5411_v58 = vpop.permute.xlu1 %5410 }
 0x476   : > { %v5423_v63 = vsel %vm17449_vm9, %v5411_v58, 0.0  ;;  %vm17455_vm9 = vcmp.eq.s32.totalorder %v15146_v52, 1 }
 0x477   : > { %v5431_v60 = vadd.f32 %v5423_v63, %v5381_v0 }
 0x479   : > { %v5457_v56 = vsel %vm17450_vm7, -100000.0, %v5431_v60  ;;  %vm17456_vm7 = vcmp.eq.s32.totalorder %v15195_v17, 2 }
 0x47a   : > { %v5478_v40 = vsel %vm5459_vm13, %v5457_v56, -inf }
 0x47b   : > { %5479 = vmax.xlane.f32.xlu1 %v5478_v40 }
 0x48c   : > { %7090 = vrot.lane.b32.xlu1 %v14563_v35, %s14288_s13 }
 0x48e   : > { %v5468_v30 = vpop.xlane.xlu0 %5467 }
 0x48f   : > { %v5486_v26 = vsub.f32 %v15312_v49, %v5468_v30 }
 0x491   : > { %v5496_v12 = vmul.f32 1.442695, %v5486_v26 }
 0x493   : > { %14176 = vpow2.f32 %v5496_v12 }
 0x4a0   : > { %v15441_v49 = vpop.eup %14176 }
 0x4a1   : > { %v5514_v25 = vsel %vm5459_vm13, %v15441_v49, 0.0 }
 0x4a7   : > { %v5465_v34 = vpop.xlane.xlu1 %5464 }
 0x4a8   : > { %v5485_v46 = vsub.f32 %v15345_v47, %v5465_v34  ;;  %v15490_v34 = vand.u32 4294901760, %v15108_v31 }
 0x4aa   : > { %v5494_v20 = vmul.f32 1.442695, %v5485_v46  ;;  %v5477_v4 = vpop.xlane.xlu0 %5476  ;;  %v15494_v46 = vsub.f32 %v15102_v42, %v15485_v13  ;;  %v15508_v42 = vsub.f32 %v15108_v31, %v15490_v34 }
 0x4ab   : > { %v5489_v35 = vsub.f32 %v15353_v3, %v5477_v4  ;;  %v15454_v54 = vpop.permute.xlu1 %6576 }
 0x4ac   : > { %14178 = vpow2.f32 %v5494_v20 }
 0x4ad   : > { %14180 = vpow2.f32 %v5498_v28  ;;  %v5502_v5 = vmul.f32 1.442695, %v5489_v35 }
 0x4af   : > { %14182 = vpow2.f32 %v5502_v5 }
 0x4b0   : > { %5509 = vadd.xlane.f32.xlu1 %v5508_v21 }
 0x4b4   : > { %5515 = vadd.xlane.f32.xlu1 %v5514_v25 }
 0x4b9   : > { %v14179_v47 = vpop.eup %14178 }
 0x4ba   : > { %v5511_v57 = vsel %vm5459_vm13, %v14179_v47, 0.0  ;;  %v15446_v6 = vpop.eup %14180 }
 0x4bb   : > { %5512 = vadd.xlane.f32.xlu0 %v5511_v57  ;;  %v5517_v3 = vsel %vm5459_vm13, %v15446_v6, 0.0 }
 0x4bc   : > { %v15450_v48 = vpop.eup %14182 }
 0x4bd   : > { %v5523_v2 = vsel %vm5459_vm13, %v15450_v48, 0.0 }
 0x4bf   : > { %5518 = vadd.xlane.f32.xlu0 %v5517_v3  ;;  %v15518_v3 = vand.u32 4294901760, %v15494_v46 }
 0x4c3   : > { %5524 = vadd.xlane.f32.xlu0 %v5523_v2 }
 0x4dc   : > { %v5474_v32 = vpop.xlane.xlu1 %5473 }
 0x4dd   : > { %v5488_v29 = vsub.f32 %v15393_v24, %v5474_v32 }
 0x4df   : > { %v5500_v39 = vmul.f32 1.442695, %v5488_v29 }
 0x4e1   : > { %14184 = vpow2.f32 %v5500_v39 }
 0x4e6   : > { %v5483_v44 = vpop.xlane.xlu0 %5482 }
 0x4e7   : > { %v5491_v8 = vsub.f32 %v15405_v51, %v5483_v44 }
 0x4e9   : > { %v5506_v59 = vmul.f32 1.442695, %v5491_v8  ;;  %v15532_v8 = vand.u32 4294901760, %v15508_v42 }
 0x4ea   : > { %v15472_v58 = vpop.permute.xlu0 %7092 }
 0x4eb   : > { %14186 = vpow2.f32 %v5506_v59 }
 0x4ee   : > { %v15458_v61 = vpop.eup %14184 }
 0x4ef   : > { %v5520_v55 = vsel %vm5459_vm13, %v15458_v61, 0.0 }
 0x4f0   : > { %5521 = vadd.xlane.f32.xlu1 %v5520_v55  ;;  %v6193_v55 = vsub.f32 %v15494_v46, %v15518_v3 }
 0x4f8   : > { %v15462_v11 = vpop.eup %14186 }
 0x4f9   : > { %v5529_v41 = vsel %vm5459_vm13, %v15462_v11, 0.0 }
 0x4fa   : > { %5530 = vadd.xlane.f32.xlu0 %v5529_v41 }
 0x504   : > { %v5480_v24 = vpop.xlane.xlu1 %5479 }
 0x505   : > { %v5490_v53 = vsub.f32 %v5457_v56, %v5480_v24 }
 0x507   : > { %v5504_v10 = vmul.f32 1.442695, %v5490_v53 }
 0x508   : > { %v15470_v14 = vpop.permute.xlu1 %7090 }
 0x509   : > { %14188 = vpow2.f32 %v5504_v10 }
 0x516   : > { %v15466_v50 = vpop.eup %14188 }
 0x517   : > { %v5526_v51 = vsel %vm5459_vm13, %v15466_v50, 0.0 }
 0x518   : > { %5527 = vadd.xlane.f32.xlu1 %v5526_v51 }
 0x539   : > { %v5510_v0 = vpop.xlane.xlu1 %5509 }
 0x53a   : > { %14190 = vrcp.f32 %v5510_v0 }
 0x53d   : > { %v5516_v60 = vpop.xlane.xlu1 %5515 }
 0x544   : > { %v5513_v63 = vpop.xlane.xlu0 %5512 }
 0x545   : > { %14192 = vrcp.f32 %v5513_v63  ;;  %v6200_v63 = vsub.f32 %v15508_v42, %v15532_v8 }
 0x546   : > { %14194 = vrcp.f32 %v5516_v60  ;;  %v6194_v60 = vand.u32 4294901760, %v6193_v55 }
 0x547   : > { %v14191_v40 = vpop.eup %14190 }
 0x548   : > { %v15474_v7 = vmul.f32 %v14191_v40, %v14175_v33  ;;  %v5519_v56 = vpop.xlane.xlu0 %5518 }
 0x549   : > { %14196 = vrcp.f32 %v5519_v56  ;;  %v6201_v56 = vand.u32 4294901760, %v6200_v63 }
 0x54a   : > { %v5555_v18 = vsel %vm5459_vm13, %v15474_v7, 0  ;;  %v7653_v57 = vsel %vm5033_vm3, %v15474_v7, 0.0 }
 0x54b   : > { %v15478_v15 = vand.u32 4294901760, %v5555_v18  ;;  %v7661_v39 = vsel %vm5459_vm13, %v7653_v57, 0.0 }
 0x54d   : > { %13324 = vmatprep.mubr.f32.mxu1 %v15478_v15  ;;  %v15482_v30 = vsub.f32 %v5555_v18, %v15478_v15  ;;  %v7751_v18 = vsel %vm5133_vm5, %v15474_v7, 0.0 }
 0x54f   : > { %v5629_v26 = vand.u32 4294901760, %v15482_v30 }
 0x551   : > { %v5630_v12 = vsub.f32 %v15482_v30, %v5629_v26 }
 0x552   : > { %v14193_v16 = vpop.eup %14192 }
 0x553   : > { %v15496_v28 = vmul.f32 %v14193_v16, %v14179_v47  ;;  %v5631_v20 = vand.u32 4294901760, %v5630_v12  ;;  %v14195_v5 = vpop.eup %14194  ;;  %v7759_v16 = vsel %vm5459_vm13, %v7751_v18, 0.0  ;;  %v15698_v18 = vand.u32 4294901760, %v15472_v58 }
 0x554   : > { %v15526_v32 = vmul.f32 %v14195_v5, %v15441_v49  ;;  %v7702_v49 = vsel %vm5083_vm4, %v15474_v7, 0.0 }
 0x555   : > { %13317 = vmatprep.mubr.f32.mxu0 %v5631_v20  ;;  %v7752_v4 = vsel %vm17451_vm8, %v15496_v28, 0.0  ;;  %v7605_v35 = vsel %vm4976_vm11, %v15496_v28, 0.0  ;;  %v5558_v33 = vsel %vm5459_vm13, %v15496_v28, 0  ;;  %v7654_v31 = vsel %vm5034_vm14, %v15496_v28, 0.0 }
 0x556   : > { %v7762_v21 = vsel %vm5459_vm13, %v7752_v4, 0.0  ;;  %v7615_v25 = vsel %vm5459_vm13, %v7605_v35, 0.0  ;;  %v15512_v47 = vand.u32 4294901760, %v5558_v33  ;;  %v14197_v29 = vpop.eup %14196  ;;  %v7664_v59 = vsel %vm5459_vm13, %v7654_v31, 0.0 }
 0x557   : > { %7763 = vadd.xlane.f32.xlu1 %v7762_v21  ;;  %7616 = vadd.xlane.f32.xlu0 %v7615_v25  ;;  %v7703_v41 = vsel %vm17452_vm0, %v15496_v28, 0.0  ;;  %v15546_v53 = vmul.f32 %v14197_v29, %v15446_v6  ;;  %v6069_v10 = vsel %vm5459_vm13, %v15526_v32, 0  ;;  %v7710_v51 = vsel %vm5459_vm13, %v7702_v49, 0.0  ;;  %v5525_v21 = vpop.xlane.xlu0 %5524 }
 0x558   : > { %v5638_v2 = vsub.f32 %v5558_v33, %v15512_v47  ;;  %13325 = vmatmul.mubr.f32.vlgmr.msra.gmra.mxu1 %v15512_v47  ;;  %v7713_v6 = vsel %vm5459_vm13, %v7703_v41, 0.0  ;;  %v15558_v40 = vand.u32 4294901760, %v6069_v10  ;;  %v15585_v4 = vand.u32 4294901760, %v15454_v54 }
 0x559   : > { %13335 = vmatpush3.msra.mxu1 %v14957_v22  ;;  %13338 = vmatprep.mubr.f32.mxu1 %v5629_v26  ;;  %v15572_v26 = vand.u32 4294901760, %v15119_v1  ;;  %v7800_v33 = vsel %vm5183_vm6, %v15474_v7, 0.0  ;;  %14198 = vrcp.f32 %v5525_v21  ;;  %v7849_v31 = vsel %vm17455_vm9, %v15474_v7, 0.0 }
 0x55a   : > { %13336 = vmatprep.subr.mxu1 %v14962_v27  ;;  %v5639_v44 = vand.u32 4294901760, %v5638_v2  ;;  %v15578_v12 = vsub.f32 %v6069_v10, %v15558_v40  ;;  %v15609_v5 = vsub.f32 %v15454_v54, %v15585_v4  ;;  %vm17457_vm8 = vcmp.eq.s32.totalorder %v15146_v52, 3 }
 0x55b   : > { %13337 = vmatpush3.msra.mxu1 %v14962_v27  ;;  %7662 = vadd.xlane.f32.xlu1 %v7661_v39  ;;  %v7997_v63 = vsel %vm5384_vm12, %v15496_v28, 0.0  ;;  %vm17460_vm9 = vcmp.eq.s32.totalorder %v15146_v52, 4  ;;  %v15723_v21 = vand.u32 4294901760, %v15470_v14 }
 0x55c   : > { %7665 = vadd.xlane.f32.xlu0 %v7664_v59  ;;  %13348 = vmatprep.subr.mxu1 %v14957_v22  ;;  %v5640_v24 = vsub.f32 %v5638_v2, %v5639_v44  ;;  %v6143_v35 = vand.u32 4294901760, %v15578_v12 }
 0x55d   : > { %13339 = vmatmul.mubr.f32.vlgmr.msra.gmra.mxu1 %v5639_v44  ;;  %v7857_v44 = vsel %vm5459_vm13, %v7849_v31, 0.0  ;;  %v15745_v31 = vsub.f32 %v15470_v14, %v15723_v21 }
 0x55e   : > { %13349 = vmatpush3.msra.mxu1 %v14957_v22  ;;  %13352 = vmatprep.mubr.f32.mxu1 %v15478_v15  ;;  %v5641_v0 = vand.u32 4294901760, %v5640_v24  ;;  %v6072_v22 = vsel %vm5459_vm13, %v15546_v53, 0  ;;  %v6144_v57 = vsub.f32 %v15578_v12, %v6143_v35  ;;  %v7947_v24 = vsel %vm17457_vm8, %v15474_v7, 0.0 }
 0x55f   : > { %13350 = vmatprep.subr.mxu1 %v14962_v27  ;;  %7711 = vadd.xlane.f32.xlu1 %v7710_v51  ;;  %vm17462_vm8 = vcmp.eq.s32.totalorder %v15195_v17, 1 }
 0x560   : > { %13351 = vmatpush3.msra.mxu1 %v14962_v27  ;;  %7714 = vadd.xlane.f32.xlu0 %v7713_v6  ;;  %v7801_v27 = vsel %vm17453_vm15, %v15496_v28, 0.0  ;;  %vm17458_vm15 = vcmp.eq.s32.totalorder %v15146_v52, 2 }
 0x561   : > { %13362 = vmatprep.subr.mxu1 %v6194_v60  ;;  %13318 = vmatmul.mubr.f32.vlgmr.msra.gmra.mxu0 %v5641_v0  ;;  %v7811_v20 = vsel %vm5459_vm13, %v7801_v27, 0.0 }
 0x562   : > { %13328 = vmatpush3.msra.mxu0 %v14965_v19  ;;  %13353 = vmatmul.mubr.f32.vlgmr.msra.gmra.mxu1 %v15512_v47  ;;  %v15575_v19 = vand.u32 4294901760, %v6072_v22 }
 0x563   : > { %13363 = vmatpush3.msra.mxu1 %v6194_v60  ;;  %13329 = vmatprep.subr.mxu0 %v14972_v45  ;;  %v8007_v60 = vsel %vm5459_vm13, %v7997_v63, 0.0  ;;  %v7802_v63 = vsel %vm5183_vm6, %v15526_v32, 0.0 }
 0x564   : > { %13331 = vmatprep.mubr.f32.mxu0 %v15482_v30  ;;  %13364 = vmatprep.subr.mxu1 %v6201_v56  ;;  %v15590_v30 = vsub.f32 %v15119_v1, %v15572_v26  ;;  %v7850_v1 = vsel %vm17454_vm10, %v15496_v28, 0.0  ;;  %vm17459_vm10 = vcmp.eq.s32.totalorder %v15195_v17, 4294967295 }
 0x565   : > { %13366 = vmatprep.mubr.f32.mxu1 %v15558_v40  ;;  %13330 = vmatpush3.msra.mxu0 %v14972_v45  ;;  %v15594_v45 = vsub.f32 %v6072_v22, %v15575_v19  ;;  %v7860_v54 = vsel %vm5459_vm13, %v7850_v1, 0.0  ;;  %v7604_v22 = vsel %vm4975_vm2, %v15474_v7, 0.0  ;;  %v7754_v27 = vsel %vm17459_vm10, %v15546_v53, 0.0 }
 0x566   : > { %13365 = vmatpush3.msra.mxu1 %v6201_v56  ;;  %7760 = vadd.xlane.f32.xlu1 %v7759_v16  ;;  %v14199_v0 = vpop.eup %14198  ;;  %v7898_v56 = vsel %vm17458_vm15, %v15474_v7, 0.0  ;;  %v7606_v1 = vsel %vm4975_vm2, %v15526_v32, 0.0  ;;  %vm17464_vm15 = vcmp.eq.s32.totalorder %v15146_v52, 1  ;;  %vm17465_vm10 = vcmp.eq.s32.totalorder %v15146_v52, 3 }
 0x567   : > { %7812 = vadd.xlane.f32.xlu0 %v7811_v20  ;;  %13341 = vmatprep.subr.mxu0 %v14975_v62  ;;  %v6153_v25 = vand.u32 4294901760, %v15594_v45  ;;  %v15672_v6 = vmul.f32 %v14199_v0, %v15450_v48  ;;  %v7705_v48 = vsel %vm17452_vm0, %v15546_v53, 0.0  ;;  %v7768_v20 = vsel %vm5459_vm13, %v7754_v27, 0.0 }
 0x568   : > { %13376 = vmatprep.subr.mxu1 %v15485_v13  ;;  %13332 = vmatmul.mubr.f32.vlgmr.msra.gmra.mxu0 %v5638_v2  ;;  %v15618_v2 = vand.u32 4294901760, %v15590_v30  ;;  %vm17463_vm0 = vcmp.eq.s32.totalorder %v15195_v17, 2 }
 0x569   : > { %13342 = vmatpush3.msra.mxu0 %v14975_v62  ;;  %13367 = vmatmul.mubr.f32.vlgmr.msra.gmra.mxu1 %v15575_v19  ;;  %v7808_v62 = vsel %vm5459_vm13, %v7800_v33, 0.0  ;;  %v6154_v39 = vsub.f32 %v15594_v45, %v6153_v25 }
 0x56a   : > { %13377 = vmatpush3.msra.mxu1 %v15485_v13  ;;  %13343 = vmatprep.subr.mxu0 %v14985_v43  ;;  %v6707_v29 = vsub.f32 %v15590_v30, %v15618_v2 }
 0x56b   : > { %13345 = vmatprep.mubr.f32.mxu0 %v15478_v15  ;;  %13378 = vmatprep.subr.mxu1 %v15490_v34  ;;  %v6145_v15 = vand.u32 4294901760, %v6144_v57  ;;  %v6155_v55 = vand.u32 4294901760, %v6154_v39 }
 0x56c   : > { %13380 = vmatprep.mubr.f32.mxu1 %v6143_v35  ;;  %13344 = vmatpush3.msra.mxu0 %v14985_v43  ;;  %v15626_v43 = vand.u32 4294901760, %v15609_v5  ;;  %v6708_v49 = vand.u32 4294901760, %v6707_v29  ;;  %v15714_v35 = vsub.f32 %v15472_v58, %v15698_v18 }
 0x56d   : > { %13379 = vmatpush3.msra.mxu1 %v15490_v34  ;;  %7809 = vadd.xlane.f32.xlu1 %v7808_v62 }
 0x56e   : > { %7861 = vadd.xlane.f32.xlu0 %v7860_v54  ;;  %13355 = vmatprep.subr.mxu0 %v15485_v13  ;;  %v6714_v59 = vsub.f32 %v15609_v5, %v15626_v43  ;;  %v7704_v54 = vsel %vm5083_vm4, %v15526_v32, 0.0 }
 0x56f   : > { %13390 = vmatprep.subr.mxu1 %v15485_v13  ;;  %13346 = vmatmul.mubr.f32.vlgmr.msra.gmra.mxu0 %v15512_v47  ;;  %v7899_v47 = vsel %vm17456_vm7, %v15496_v28, 0.0  ;;  %vm17461_vm7 = vcmp.eq.s32.totalorder %v15195_v17, 0 }
 0x570   : > { %13356 = vmatpush3.msra.mxu0 %v15485_v13  ;;  %13381 = vmatmul.mubr.f32.vlgmr.msra.gmra.mxu1 %v6153_v25  ;;  %v6715_v41 = vand.u32 4294901760, %v6714_v59  ;;  %v7607_v25 = vsel %vm4976_vm11, %v15546_v53, 0.0  ;;  %v7803_v59 = vsel %vm17461_vm7, %v15546_v53, 0.0  ;;  %vm17467_vm7 = vcmp.eq.s32.totalorder %v15146_v52, 2 }
 0x571   : > { %13391 = vmatpush3.msra.mxu1 %v15485_v13  ;;  %13357 = vmatprep.subr.mxu0 %v15490_v34  ;;  %v7909_v13 = vsel %vm5459_vm13, %v7899_v47, 0.0  ;;  %v7621_v47 = vsel %vm5459_vm13, %v7607_v25, 0.0 }
 0x572   : > { %13359 = vmatprep.mubr.f32.mxu0 %v6145_v15  ;;  %13392 = vmatprep.subr.mxu1 %v15490_v34  ;;  %v15741_v15 = vand.u32 4294901760, %v15714_v35 }
 0x573   : > { %13394 = vmatprep.mubr.f32.mxu1 %v15558_v40  ;;  %13358 = vmatpush3.msra.mxu0 %v15490_v34 }
 0x574   : > { %13393 = vmatpush3.msra.mxu1 %v15490_v34  ;;  %7858 = vadd.xlane.f32.xlu1 %v7857_v44  ;;  %v7948_v34 = vsel %vm5334_vm1, %v15496_v28, 0.0  ;;  %v7716_v44 = vsel %vm5459_vm13, %v7704_v54, 0.0 }
 0x575   : > { %7910 = vadd.xlane.f32.xlu0 %v7909_v13  ;;  %13369 = vmatprep.subr.mxu0 %v15494_v46  ;;  %v7958_v51 = vsel %vm5459_vm13, %v7948_v34, 0.0  ;;  %v7753_v13 = vsel %vm5133_vm5, %v15526_v32, 0.0  ;;  %v7817_v34 = vsel %vm5459_vm13, %v7803_v59, 0.0 }
 0x576   : > { %13404 = vmatprep.subr.mxu1 %v6708_v49  ;;  %13360 = vmatmul.mubr.f32.vlgmr.msra.gmra.mxu0 %v6155_v55 }
 0x577   : > { %13370 = vmatpush3.msra.mxu0 %v15494_v46  ;;  %13395 = vmatmul.mubr.f32.vlgmr.msra.gmra.mxu1 %v15575_v19  ;;  %v7955_v46 = vsel %vm5459_vm13, %v7947_v24, 0.0  ;;  %v15766_v24 = vand.u32 4294901760, %v15745_v31 }
 0x578   : > { %13405 = vmatpush3.msra.mxu1 %v6708_v49  ;;  %13371 = vmatprep.subr.mxu0 %v15508_v42  ;;  %v7221_v49 = vsub.f32 %v15714_v35, %v15741_v15 }
 0x579   : > { %13373 = vmatprep.mubr.f32.mxu0 %v15578_v12  ;;  %13406 = vmatprep.subr.mxu1 %v6715_v41  ;;  %v5522_v10 = vpop.xlane.xlu1 %5521  ;;  %v7906_v12 = vsel %vm5459_vm13, %v7898_v56, 0.0  ;;  %v7950_v56 = vsel %vm5334_vm1, %v15546_v53, 0.0 }
 0x57a   : > { %13372 = vmatpush3.msra.mxu0 %v15508_v42  ;;  %13407 = vmatpush3.msra.mxu1 %v6715_v41  ;;  %14200 = vrcp.f32 %v5522_v10  ;;  %v7656_v42 = vsel %vm5034_vm14, %v15546_v53, 0.0  ;;  %v7964_v27 = vsel %vm5459_vm13, %v7950_v56, 0.0 }
 0x57b   : > { %7956 = vadd.xlane.f32.xlu1 %v7955_v46  ;;  %7959 = vadd.xlane.f32.xlu0 %v7958_v51  ;;  %v7670_v28 = vsel %vm5459_vm13, %v7656_v42, 0.0  ;;  %v7765_v46 = vsel %vm5459_vm13, %v7753_v13, 0.0  ;;  %v7852_v51 = vsel %vm17462_vm8, %v15546_v53, 0.0  ;;  %v7222_v42 = vand.u32 4294901760, %v7221_v49 }
 0x57c   : > { %13383 = vmatprep.subr.mxu0 %v15518_v3  ;;  %13418 = vmatprep.subr.mxu1 %v15572_v26  ;;  %vm17468_vm8 = vcmp.eq.s32.totalorder %v15146_v52, 4 }
 0x57d   : > { %13374 = vmatmul.mubr.f32.vlgmr.msra.gmra.mxu0 %v15594_v45  ;;  %v7996_v45 = vsel %vm17460_vm9, %v15474_v7, 0.0  ;;  %vm17466_vm9 = vcmp.eq.s32.totalorder %v15195_v17, 4294967294  ;;  %v7998_v54 = vsel %vm17468_vm8, %v15526_v32, 0.0  ;;  %vm17473_vm8 = vcmp.eq.s32.totalorder %v15195_v17, 2 }
 0x57e   : > { %13384 = vmatpush3.msra.mxu0 %v15518_v3  ;;  %13387 = vmatprep.mubr.f32.mxu0 %v15558_v40  ;;  %v7612_v3 = vsel %vm5459_vm13, %v7604_v22, 0.0  ;;  %v6586_v40 = vsel %vm5459_vm13, %v15672_v6, 0  ;;  %v8004_v7 = vsel %vm5459_vm13, %v7996_v45, 0.0  ;;  %v7814_v22 = vsel %vm5459_vm13, %v7802_v63, 0.0 }
 0x57f   : > { %13385 = vmatprep.subr.mxu0 %v15532_v8  ;;  %8008 = vadd.xlane.f32.xlu0 %v8007_v60 }
 0x580   : > { %13386 = vmatpush3.msra.mxu0 %v15532_v8  ;;  %7671 = vadd.xlane.f32.xlu1 %v7670_v28  ;;  %v7719_v8 = vsel %vm5459_vm13, %v7705_v48, 0.0  ;;  %v7228_v28 = vsub.f32 %v15745_v31, %v15766_v24  ;;  %v7901_v48 = vsel %vm17463_vm0, %v15546_v53, 0.0  ;;  %vm17469_vm0 = vcmp.eq.s32.totalorder %v15195_v17, 4294967295 }
 0x581   : > { %13397 = vmatprep.subr.mxu0 %v15572_v26  ;;  %13388 = vmatmul.mubr.f32.vlgmr.msra.gmra.mxu0 %v15575_v19  ;;  %v15705_v19 = vand.u32 4294901760, %v6586_v40 }
 0x582   : > { %13398 = vmatpush3.msra.mxu0 %v15572_v26 }
 0x583   : > { %13399 = vmatprep.subr.mxu0 %v15585_v4  ;;  %7613 = vadd.xlane.f32.xlu0 %v7612_v3  ;;  %v15726_v62 = vsub.f32 %v6586_v40, %v15705_v19  ;;  %v5531_v10 = vpop.xlane.xlu0 %5530  ;;  %v7229_v3 = vand.u32 4294901760, %v7228_v28  ;;  %v7915_v40 = vsel %vm5459_vm13, %v7901_v48, 0.0 }
 0x584   : > { %13400 = vmatpush3.msra.mxu0 %v15585_v4  ;;  %7720 = vadd.xlane.f32.xlu1 %v7719_v8  ;;  %14202 = vrcp.f32 %v5531_v10 }
 0x585   : > { %13411 = vmatprep.subr.mxu0 %v15590_v30  ;;  %v6667_v39 = vand.u32 4294901760, %v15726_v62 }
 0x587   : > { %v14201_v16 = vpop.eup %14200  ;;  %7907 = vadd.xlane.f32.xlu0 %v7906_v12  ;;  %v6668_v41 = vsub.f32 %v15726_v62, %v6667_v39 }
 0x588   : > { %v15717_v33 = vmul.f32 %v14201_v16, %v15458_v61  ;;  %7769 = vadd.xlane.f32.xlu1 %v7768_v20  ;;  %v7618_v61 = vsel %vm5459_vm13, %v7606_v1, 0.0  ;;  %v7999_v16 = vsel %vm5384_vm12, %v15546_v53, 0.0  ;;  %v7655_v1 = vsel %vm5033_vm3, %v15526_v32, 0.0 }
 0x589   : > { %v6669_v60 = vand.u32 4294901760, %v6668_v41  ;;  %v8013_v45 = vsel %vm5459_vm13, %v7999_v16, 0.0 }
 0x58a   : > { %v6583_v58 = vsel %vm5459_vm13, %v15717_v33, 0 }
 0x58b   : > { %8005 = vadd.xlane.f32.xlu0 %v8004_v7  ;;  %v15735_v57 = vand.u32 4294901760, %v6583_v58 }
 0x58c   : > { %7619 = vadd.xlane.f32.xlu1 %v7618_v61  ;;  %v7608_v61 = vsel %vm4975_vm2, %v15717_v33, 0.0 }
 0x58d   : > { %13408 = vmatprep.mubr.f32.mxu1 %v15735_v57  ;;  %v6656_v29 = vsub.f32 %v6583_v58, %v15735_v57  ;;  %v7900_v58 = vsel %vm17467_vm7, %v15526_v32, 0.0 }
 0x58e   : > { %13409 = vmatmul.mubr.f32.vlgmr.msra.gmra.mxu1 %v15705_v19  ;;  %v7912_v25 = vsel %vm5459_vm13, %v7900_v58, 0.0 }
 0x58f   : > { %7622 = vadd.xlane.f32.xlu0 %v7621_v47  ;;  %13419 = vmatpush3.msra.mxu1 %v15572_v26  ;;  %v6657_v14 = vand.u32 4294901760, %v6656_v29 }
 0x590   : > { %7717 = vadd.xlane.f32.xlu1 %v7716_v44  ;;  %13420 = vmatprep.subr.mxu1 %v15585_v4  ;;  %v8010_v44 = vsel %vm5459_vm13, %v7998_v54, 0.0 }
 0x591   : > { %13421 = vmatpush3.msra.mxu1 %v15585_v4  ;;  %13422 = vmatprep.mubr.f32.mxu1 %v6657_v14  ;;  %v6658_v55 = vsub.f32 %v6656_v29, %v6657_v14  ;;  %v14203_v53 = vpop.eup %14202 }
 0x592   : > { %13432 = vmatprep.subr.mxu1 %v15572_v26  ;;  %13423 = vmatmul.mubr.f32.vlgmr.msra.gmra.mxu1 %v6667_v39  ;;  %v7706_v39 = vsel %vm5083_vm4, %v15717_v33, 0.0 }
 0x593   : > { %7818 = vadd.xlane.f32.xlu0 %v7817_v34  ;;  %13433 = vmatpush3.msra.mxu1 %v15572_v26  ;;  %v6659_v0 = vand.u32 4294901760, %v6658_v55  ;;  %v7866_v26 = vsel %vm5459_vm13, %v7852_v51, 0.0  ;;  %v7722_v13 = vsel %vm5459_vm13, %v7706_v39, 0.0  ;;  %v7755_v55 = vsel %vm5133_vm5, %v15717_v33, 0.0 }
 0x594   : > { %7766 = vadd.xlane.f32.xlu1 %v7765_v46  ;;  %13434 = vmatprep.subr.mxu1 %v15585_v4  ;;  %v7771_v51 = vsel %vm5459_vm13, %v7755_v55, 0.0 }
 0x595   : > { %13436 = vmatprep.mubr.f32.mxu1 %v15735_v57  ;;  %13435 = vmatpush3.msra.mxu1 %v15585_v4  ;;  %v7851_v4 = vsel %vm17464_vm15, %v15526_v32, 0.0  ;;  %vm17470_vm15 = vcmp.eq.s32.totalorder %v15195_v17, 0 }
 0x596   : > { %13401 = vmatprep.mubr.f32.mxu0 %v6659_v0  ;;  %13446 = vmatprep.subr.mxu1 %v7222_v42  ;;  %v7863_v8 = vsel %vm5459_vm13, %v7851_v4, 0.0  ;;  %v7756_v0 = vsel %vm17469_vm0, %v15672_v6, 0.0  ;;  %vm17474_vm0 = vcmp.eq.s32.totalorder %v15146_v52, 3 }
 0x597   : > { %7867 = vadd.xlane.f32.xlu0 %v7866_v26  ;;  %13402 = vmatmul.mubr.f32.vlgmr.msra.gmra.mxu0 %v6669_v60 }
 0x598   : > { %7815 = vadd.xlane.f32.xlu1 %v7814_v22  ;;  %13412 = vmatpush3.msra.mxu0 %v15590_v30  ;;  %v7949_v30 = vsel %vm17465_vm10, %v15526_v32, 0.0  ;;  %v7609_v32 = vsel %vm4976_vm11, %v15672_v6, 0.0  ;;  %v7774_v22 = vsel %vm5459_vm13, %v7756_v0, 0.0  ;;  %vm17471_vm10 = vcmp.eq.s32.totalorder %v15146_v52, 1 }
 0x599   : > { %13437 = vmatmul.mubr.f32.vlgmr.msra.gmra.mxu1 %v15705_v19  ;;  %13413 = vmatprep.subr.mxu0 %v15609_v5  ;;  %v7961_v12 = vsel %vm5459_vm13, %v7949_v30, 0.0  ;;  %v7627_v34 = vsel %vm5459_vm13, %v7609_v32, 0.0 }
 0x59a   : > { %13447 = vmatpush3.msra.mxu1 %v7222_v42  ;;  %13415 = vmatprep.mubr.f32.mxu0 %v6656_v29  ;;  %v297_v29 = vld [vmem:[%s17403_s4 + $0x48] sm:$0xff]  ;;  %v7804_v42 = vsel %vm5183_vm6, %v15717_v33, 0.0 }
 0x59b   : > { %7916 = vadd.xlane.f32.xlu0 %v7915_v40  ;;  %13448 = vmatprep.subr.mxu1 %v7229_v3  ;;  %v15859_v59 = vand.u32 4294901760, %v297_v29  ;;  %v7820_v4 = vsel %vm5459_vm13, %v7804_v42, 0.0 }
 0x59c   : > { %7864 = vadd.xlane.f32.xlu1 %v7863_v8  ;;  %13414 = vmatpush3.msra.mxu0 %v15609_v5  ;;  %v7658_v5 = vsel %vm5034_vm14, %v15672_v6, 0.0  ;;  %v7853_v8 = vsel %vm17471_vm10, %v15717_v33, 0.0 }
 0x59d   : > { %13449 = vmatpush3.msra.mxu1 %v7229_v3  ;;  %13425 = vmatprep.subr.mxu0 %v15618_v2  ;;  %v15878_v46 = vsub.f32 %v297_v29, %v15859_v59  ;;  %v7805_v3 = vsel %vm17470_vm15, %v15672_v6, 0.0  ;;  %v8001_v29 = vsel %vm5384_vm12, %v15672_v6, 0.0  ;;  %vm17476_vm15 = vcmp.eq.s32.totalorder %v15146_v52, 4 }
 0x59e   : > { %13460 = vmatprep.subr.mxu1 %v15698_v18  ;;  %13416 = vmatmul.mubr.f32.vlgmr.msra.gmra.mxu0 %v15726_v62  ;;  %v7667_v62 = vsel %vm5459_vm13, %v7655_v1, 0.0  ;;  %v8019_v39 = vsel %vm5459_vm13, %v8001_v29, 0.0 }
 0x59f   : > { %7965 = vadd.xlane.f32.xlu0 %v7964_v27  ;;  %13426 = vmatpush3.msra.mxu0 %v15618_v2  ;;  %v7676_v2 = vsel %vm5459_vm13, %v7658_v5, 0.0  ;;  %v15900_v48 = vand.u32 4294901760, %v15878_v46  ;;  %v7869_v5 = vsel %vm5459_vm13, %v7853_v8, 0.0 }
 0x5a0   : > { %7962 = vadd.xlane.f32.xlu1 %v7961_v12  ;;  %13427 = vmatprep.subr.mxu0 %v15626_v43  ;;  %v7823_v12 = vsel %vm5459_vm13, %v7805_v3, 0.0 }
 0x5a1   : > { %13429 = vmatprep.mubr.f32.mxu0 %v15735_v57  ;;  %13428 = vmatpush3.msra.mxu0 %v15626_v43  ;;  %v5528_v20 = vpop.xlane.xlu1 %5527  ;;  %v7707_v43 = vsel %vm17466_vm9, %v15672_v6, 0.0  ;;  %v7624_v57 = vsel %vm5459_vm13, %v7608_v61, 0.0  ;;  %v8170_v16 = vsub.f32 %v15878_v46, %v15900_v48  ;;  %vm17472_vm9 = vcmp.eq.s32.totalorder %v15195_v17, 1 }
 0x5a2   : > { %13439 = vmatprep.subr.mxu0 %v15698_v18  ;;  %13430 = vmatmul.mubr.f32.vlgmr.msra.gmra.mxu0 %v15705_v19  ;;  %14204 = vrcp.f32 %v5528_v20  ;;  %v15832_v19 = vmul.f32 %v14203_v53, %v15462_v11  ;;  %v7725_v7 = vsel %vm5459_vm13, %v7707_v43, 0.0  ;;  %v7854_v20 = vsel %vm17472_vm9, %v15672_v6, 0.0 }
 0x5a3   : > { %8014 = vadd.xlane.f32.xlu0 %v8013_v45  ;;  %13440 = vmatpush3.msra.mxu0 %v15698_v18  ;;  %v7902_v53 = vsel %vm17467_vm7, %v15717_v33, 0.0  ;;  %v7872_v43 = vsel %vm5459_vm13, %v7854_v20, 0.0 }
 0x5a4   : > { %7677 = vadd.xlane.f32.xlu1 %v7676_v2  ;;  %13441 = vmatprep.subr.mxu0 %v15723_v21  ;;  %v7100_v11 = vsel %vm5459_vm13, %v15832_v19, 0  ;;  %v8003_v52 = vsel %vm5384_vm12, %v15832_v19, 0.0  ;;  %vm7783_vm12 = vcmp.eq.s32.totalorder %v15141_v9, 3 }
 0x5a5   : > { %13442 = vmatpush3.msra.mxu0 %v15723_v21  ;;  %v15856_v47 = vand.u32 4294901760, %v7100_v11 }
 0x5a6   : > { %13453 = vmatprep.subr.mxu0 %v15714_v35 }
 0x5a7   : > { %7668 = vadd.xlane.f32.xlu0 %v7667_v62  ;;  %v15872_v41 = vsub.f32 %v7100_v11, %v15856_v47  ;;  %v7918_v62 = vsel %vm5459_vm13, %v7902_v53, 0.0  ;;  %v7952_v11 = vsel %vm5334_vm1, %v15672_v6, 0.0 }
 0x5a8   : > { %7726 = vadd.xlane.f32.xlu1 %v7725_v7  ;;  %v7903_v7 = vsel %vm17473_vm8, %v15672_v6, 0.0 }
 0x5a9   : > { %v7181_v28 = vand.u32 4294901760, %v15872_v41  ;;  %v7921_v61 = vsel %vm5459_vm13, %v7903_v7, 0.0 }
 0x5ab   : > { %7913 = vadd.xlane.f32.xlu0 %v7912_v25  ;;  %v7182_v30 = vsub.f32 %v15872_v41, %v7181_v28 }
 0x5ac   : > { %7625 = vadd.xlane.f32.xlu1 %v7624_v57  ;;  %v7970_v57 = vsel %vm5459_vm13, %v7952_v11, 0.0 }
 0x5ad   : > { %v7183_v2 = vand.u32 4294901760, %v7182_v30 }
 0x5af   : > { %v14205_v14 = vpop.eup %14204  ;;  %8011 = vadd.xlane.f32.xlu0 %v8010_v44 }
 0x5b0   : > { %v15866_v49 = vmul.f32 %v14205_v14, %v15466_v50  ;;  %7723 = vadd.xlane.f32.xlu1 %v7722_v13  ;;  %v296_v50 = vld [vmem:[%s17403_s4 + $0x40] sm:$0xff]  ;;  %v8000_v13 = vsel %vm17476_vm15, %v15717_v33, 0.0 }
 0x5b1   : > { %v15895_v26 = vand.u32 4294901760, %v296_v50  ;;  %v8016_v55 = vsel %vm5459_vm13, %v8000_v13, 0.0 }
 0x5b2   : > { %v7097_v10 = vsel %vm5459_vm13, %v15866_v49, 0  ;;  %v7708_v32 = vsel %vm5083_vm4, %v15866_v49, 0.0  ;;  %v7806_v0 = vsel %vm5183_vm6, %v15866_v49, 0.0  ;;  %vm17478_vm4 = vcmp.eq.s32.totalorder %v15195_v17, 0  ;;  %vm17480_vm6 = vmmov %vm17467_vm7 }
 0x5b3   : > { %7628 = vadd.xlane.f32.xlu0 %v7627_v34  ;;  %v15887_v63 = vand.u32 4294901760, %v7097_v10  ;;  %v15914_v27 = vsub.f32 %v296_v50, %v15895_v26  ;;  %v7611_v34 = vsel %vm4976_vm11, %v15832_v19, 0.0  ;;  %v7826_v42 = vsel %vm5459_vm13, %v7806_v0, 0.0  ;;  %vm17481_vm11 = vmmov %vm17472_vm9 }
 0x5b4   : > { %7772 = vadd.xlane.f32.xlu1 %v7771_v51  ;;  %v7659_v3 = vsel %vm5033_vm3, %v15866_v49, 0.0  ;;  %vm17484_vm9 = vmmov %vm17476_vm15  ;;  %vm7685_vm7 = vcmp.eq.s32.totalorder %v15141_v9, 1  ;;  %vm7930_vm15 = vcmp.eq.s32.totalorder %v15141_v9, 6 }
 0x5b5   : > { %13450 = vmatprep.mubr.f32.mxu1 %v15887_v63  ;;  %v7170_v60 = vsub.f32 %v7097_v10, %v15887_v63  ;;  %v15932_v1 = vand.u32 4294901760, %v15914_v27  ;;  %v7757_v10 = vsel %vm5133_vm5, %v15866_v49, 0.0  ;;  %vm17479_vm5 = vmmov %vm17471_vm10  ;;  %v7679_v30 = vsel %vm5459_vm13, %v7659_v3, 0.0 }
 0x5b6   : > { %13451 = vmatmul.mubr.f32.vlgmr.msra.gmra.mxu1 %v15856_v47  ;;  %v7777_v50 = vsel %vm5459_vm13, %v7757_v10, 0.0  ;;  %vm17483_vm10 = vmmov %vm17473_vm8  ;;  %vm7734_vm8 = vcmp.eq.s32.totalorder %v15141_v9, 2 }
 0x5b7   : > { %7775 = vadd.xlane.f32.xlu0 %v7774_v22  ;;  %13461 = vmatpush3.msra.mxu1 %v15698_v18  ;;  %v7171_v40 = vand.u32 4294901760, %v7170_v60  ;;  %v8177_v58 = vsub.f32 %v15914_v27, %v15932_v1 }
 0x5b8   : > { %7821 = vadd.xlane.f32.xlu1 %v7820_v4  ;;  %13462 = vmatprep.subr.mxu1 %v15723_v21 }
 0x5b9   : > { %13463 = vmatpush3.msra.mxu1 %v15723_v21  ;;  %13464 = vmatprep.mubr.f32.mxu1 %v7171_v40  ;;  %v7172_v56 = vsub.f32 %v7170_v60, %v7171_v40  ;;  %v7904_v40 = vsel %vm17480_vm6, %v15866_v49, 0.0  ;;  %vm17485_vm6 = vcmask 64512  }
 0x5ba   : > { %13474 = vmatprep.subr.mxu1 %v15698_v18  ;;  %13465 = vmatmul.mubr.f32.vlgmr.msra.gmra.mxu1 %v7181_v28  ;;  %v7855_v28 = vsel %vm17479_vm5, %v15866_v49, 0.0  ;;  %vm10113_vm5 = vcmask 195584  }
 0x5bb   : > { %7824 = vadd.xlane.f32.xlu0 %v7823_v12  ;;  %13475 = vmatpush3.msra.mxu1 %v15698_v18  ;;  %v7173_v45 = vand.u32 4294901760, %v7172_v56  ;;  %v8171_v18 = vand.u32 4294901760, %v8170_v16  ;;  %v7875_v4 = vsel %vm5459_vm13, %v7855_v28, 0.0  ;;  %v7924_v12 = vsel %vm5459_vm13, %v7904_v40, 0.0 }
 0x5bc   : > { %7870 = vadd.xlane.f32.xlu1 %v7869_v5  ;;  %13476 = vmatprep.subr.mxu1 %v15723_v21  ;;  %v7856_v16 = vsel %vm17481_vm11, %v15832_v19, 0.0  ;;  %vm17486_vm11 = vcmask 261120  }
 0x5bd   : > { %13478 = vmatprep.mubr.f32.mxu1 %v15887_v63  ;;  %13477 = vmatpush3.msra.mxu1 %v15723_v21  ;;  %v7951_v21 = vsel %vm17474_vm0, %v15717_v33, 0.0  ;;  %v7878_v20 = vsel %vm5459_vm13, %v7856_v16, 0.0 }
 0x5be   : > { %13443 = vmatprep.mubr.f32.mxu0 %v7173_v45  ;;  %13479 = vmatmul.mubr.f32.vlgmr.msra.gmra.mxu1 %v15856_v47  ;;  %v7967_v25 = vsel %vm5459_vm13, %v7951_v21, 0.0  ;;  %v7954_v21 = vsel %vm5334_vm1, %v15832_v19, 0.0  ;;  %vm7636_vm1 = vcmp.eq.s32.totalorder %v15141_v9, 0 }
 0x5bf   : > { %7873 = vadd.xlane.f32.xlu0 %v7872_v43  ;;  %13444 = vmatmul.mubr.f32.vlgmr.msra.gmra.mxu0 %v7183_v2  ;;  %v7905_v43 = vsel %vm17483_vm10, %v15832_v19, 0.0  ;;  %vm17488_vm10 = vmmov %vm17486_vm11 }
 0x5c0   : > { %7919 = vadd.xlane.f32.xlu1 %v7918_v62  ;;  %13454 = vmatpush3.msra.mxu0 %v15714_v35  ;;  %v7660_v35 = vsel %vm5034_vm14, %v15832_v19, 0.0  ;;  %vm17475_vm14 = vcmp.eq.s32.totalorder %v15195_v17, 4294967294  ;;  %v7927_v62 = vsel %vm5459_vm13, %v7905_v43, 0.0 }
 0x5c1   : > { %13455 = vmatprep.subr.mxu0 %v15745_v31  ;;  %13457 = vmatprep.mubr.f32.mxu0 %v7170_v60  ;;  %v7682_v54 = vsel %vm5459_vm13, %v7660_v35, 0.0  ;;  %v7807_v60 = vsel %vm17478_vm4, %v15832_v19, 0.0  ;;  %vm8028_vm4 = vcmp.eq.s32.totalorder %v15141_v9, 8 }
 0x5c2   : > { %13456 = vmatpush3.msra.mxu0 %v15745_v31  ;;  %13488 = vmatprep.subr.mxu1 %v8171_v18  ;;  %v8178_v31 = vand.u32 4294901760, %v8177_v58  ;;  %v7829_v22 = vsel %vm5459_vm13, %v7807_v60, 0.0 }
 0x5c3   : > { %7922 = vadd.xlane.f32.xlu0 %v7921_v61  ;;  %13467 = vmatprep.subr.mxu0 %v15741_v15 }
 0x5c4   : > { %7968 = vadd.xlane.f32.xlu1 %v7967_v25  ;;  %13458 = vmatmul.mubr.f32.vlgmr.msra.gmra.mxu0 %v15872_v41  ;;  %v7728_v41 = vsel %vm5459_vm13, %v7708_v32, 0.0  ;;  %v7976_v25 = vsel %vm5459_vm13, %v7954_v21, 0.0 }
 0x5c5   : > { %13468 = vmatpush3.msra.mxu0 %v15741_v15  ;;  %13471 = vmatprep.mubr.f32.mxu0 %v15887_v63  ;;  %v7709_v15 = vsel %vm17475_vm14, %v15832_v19, 0.0  ;;  %vm7881_vm14 = vcmp.eq.s32.totalorder %v15141_v9, 5 }
 0x5c6   : > { %13469 = vmatprep.subr.mxu0 %v15766_v24  ;;  %13489 = vmatpush3.msra.mxu1 %v8171_v18  ;;  %v7731_v6 = vsel %vm5459_vm13, %v7709_v15, 0.0  ;;  %v8002_v18 = vsel %vm17484_vm9, %v15866_v49, 0.0  ;;  %vm17491_vm9 = vmmov %vm17488_vm10 }
 0x5c7   : > { %7971 = vadd.xlane.f32.xlu0 %v7970_v57  ;;  %13470 = vmatpush3.msra.mxu0 %v15766_v24  ;;  %v7657_v24 = vsel %vm5033_vm3, %v15717_v33, 0.0  ;;  %v7633_v33 = vsel %vm5459_vm13, %v7611_v34, 0.0  ;;  %vm17482_vm3 = vmmov %vm17474_vm0  ;;  %v8022_v7 = vsel %vm5459_vm13, %v8002_v18, 0.0  ;;  %vm7832_vm0 = vcmp.eq.s32.totalorder %v15141_v9, 4 }
 0x5c8   : > { %7683 = vadd.xlane.f32.xlu1 %v7682_v54  ;;  %13472 = vmatmul.mubr.f32.vlgmr.msra.gmra.mxu0 %v15856_v47  ;;  %v7610_v47 = vsel %vm4975_vm2, %v15866_v49, 0.0  ;;  %v7673_v44 = vsel %vm5459_vm13, %v7657_v24, 0.0  ;;  %vm17477_vm2 = vcmp.eq.s32.totalorder %v15195_v17, 4294967295  ;;  %v7953_v5 = vsel %vm17482_vm3, %v15866_v49, 0.0  ;;  %vm17487_vm3 = vmmov %vm17485_vm6 }
 0x5c9   : > { %13490 = vmatprep.subr.mxu1 %v8178_v31  ;;  %13481 = vmatprep.subr.mxu0 %v15859_v59  ;;  %v7630_v14 = vsel %vm5459_vm13, %v7610_v47, 0.0  ;;  %v7758_v51 = vsel %vm17477_vm2, %v15832_v19, 0.0  ;;  %v7973_v2 = vsel %vm5459_vm13, %v7953_v5, 0.0  ;;  %v8025_v49 = vsel %vm5459_vm13, %v8003_v52, 0.0 }
 0x5ca   : > { %13491 = vmatpush3.msra.mxu1 %v8178_v31  ;;  %13482 = vmatpush3.msra.mxu0 %v15859_v59  ;;  %v7780_v63 = vsel %vm5459_vm13, %v7758_v51, 0.0  ;;  %vm7979_vm2 = vcmp.eq.s32.totalorder %v15141_v9, 7 }
 0x5cb   : > { %8020 = vadd.xlane.f32.xlu0 %v8019_v39  ;;  %13502 = vmatprep.subr.mxu1 %v15859_v59 }
 0x5cc   : > { %7732 = vadd.xlane.f32.xlu1 %v7731_v6  ;;  %13483 = vmatprep.subr.mxu0 %v15895_v26 }
 0x5cd   : > { %13484 = vmatpush3.msra.mxu0 %v15895_v26 }
 0x5ce   : > { %13495 = vmatprep.subr.mxu0 %v15878_v46 }
 0x5cf   : > { %7674 = vadd.xlane.f32.xlu0 %v7673_v44 }
 0x5d0   : > { %7631 = vadd.xlane.f32.xlu1 %v7630_v14 }
 0x5d3   : > { %8017 = vadd.xlane.f32.xlu0 %v8016_v55 }
 0x5d4   : > { %7729 = vadd.xlane.f32.xlu1 %v7728_v41 }
 0x5d7   : > { %7634 = vadd.xlane.f32.xlu0 %v7633_v33 }
 0x5d8   : > { %7778 = vadd.xlane.f32.xlu1 %v7777_v50 }
 0x5db   : > { %7781 = vadd.xlane.f32.xlu0 %v7780_v63 }
 0x5dc   : > { %7827 = vadd.xlane.f32.xlu1 %v7826_v42 }
 0x5df   : > { %7830 = vadd.xlane.f32.xlu0 %v7829_v22 }
 0x5e0   : > { %7876 = vadd.xlane.f32.xlu1 %v7875_v4  ;;  %v7764_v8 = vpop.xlane.xlu1 %7763  ;;  %v7617_v56 = vpop.xlane.xlu0 %7616 }
 0x5e1   : > { %v7638_v17 = vsel %vm7636_vm1, %v7617_v56, 0.0  ;;  %v7785_v24 = vsel %vm7783_vm12, %v7764_v8, 0.0 }
 0x5e3   : > { %7680 = vadd.xlane.f32.xlu0 %v7679_v30 }
 0x5e4   : > { %7925 = vadd.xlane.f32.xlu1 %v7924_v12  ;;  %v7663_v45 = vpop.xlane.xlu1 %7662 }
 0x5e5   : > { %v7666_v53 = vpop.xlane.xlu0 %7665  ;;  %v7686_v0 = vsel %vm7685_vm7, %v7663_v45, 0.0 }
 0x5e6   : > { %v7687_v54 = vsel %vm7685_vm7, %v7666_v53, 0.0  ;;  %v299_v53 = vld [vmem:[%s17403_s4 + $0x58] sm:$0xff] }
 0x5e7   : > { %7879 = vadd.xlane.f32.xlu0 %v7878_v20  ;;  %v7695_v39 = vadd.f32 %v7687_v54, %v7638_v17  ;;  %v16098_v21 = vand.u32 4294901760, %v299_v53 }
 0x5e8   : > { %7974 = vadd.xlane.f32.xlu1 %v7973_v2  ;;  %v7712_v58 = vpop.xlane.xlu1 %7711 }
 0x5e9   : > { %v7715_v61 = vpop.xlane.xlu0 %7714  ;;  %v7735_v4 = vsel %vm7734_vm8, %v7712_v58, 0.0 }
 0x5ea   : > { %v7736_v19 = vsel %vm7734_vm8, %v7715_v61, 0.0 }
 0x5eb   : > { %7928 = vadd.xlane.f32.xlu0 %v7927_v62  ;;  %v7744_v6 = vadd.f32 %v7736_v19, %v7695_v39 }
 0x5ec   : > { %8023 = vadd.xlane.f32.xlu1 %v8022_v7 }
 0x5ed   : > { %v7793_v14 = vadd.f32 %v7785_v24, %v7744_v6 }
 0x5ef   : > { %7977 = vadd.xlane.f32.xlu0 %v7976_v25  ;;  %v7761_v11 = vpop.xlane.xlu1 %7760 }
 0x5f0   : > { %v7813_v35 = vpop.xlane.xlu0 %7812  ;;  %v7784_v56 = vsel %vm7783_vm12, %v7761_v11, 0.0  ;;  %v298_v11 = vld [vmem:[%s17403_s4 + $0x50] sm:$0xff] }
 0x5f1   : > { %v7834_v13 = vsel %vm7832_vm0, %v7813_v35, 0.0 }
 0x5f2   : > { %v7842_v41 = vadd.f32 %v7834_v13, %v7793_v14 }
 0x5f3   : > { %8026 = vadd.xlane.f32.xlu0 %v8025_v49 }
 0x5f6   : > { %v7810_v31 = vpop.xlane.xlu1 %7809 }
 0x5f7   : > { %v7862_v57 = vpop.xlane.xlu0 %7861  ;;  %v7833_v5 = vsel %vm7832_vm0, %v7810_v31, 0.0 }
 0x5f8   : > { %v7883_v32 = vsel %vm7881_vm14, %v7862_v57, 0.0  ;;  %v16112_v57 = vsub.f32 %v299_v53, %v16098_v21 }
 0x5f9   : > { %v7891_v33 = vadd.f32 %v7883_v32, %v7842_v41 }
 0x5fd   : > { %v7859_v29 = vpop.xlane.xlu1 %7858 }
 0x5fe   : > { %v7911_v15 = vpop.xlane.xlu0 %7910  ;;  %v7882_v2 = vsel %vm7881_vm14, %v7859_v29, 0.0 }
 0x5ff   : > { %v7932_v10 = vsel %vm7930_vm15, %v7911_v15, 0.0  ;;  %v16119_v15 = vand.u32 4294901760, %v298_v11 }
 0x600   : > { %v7940_v63 = vadd.f32 %v7932_v10, %v7891_v33 }
 0x601   : > { %v16133_v41 = vsub.f32 %v298_v11, %v16119_v15 }
 0x604   : > { %v7957_v47 = vpop.xlane.xlu1 %7956  ;;  %v7960_v44 = vpop.xlane.xlu0 %7959 }
 0x605   : > { %v7981_v50 = vsel %vm7979_vm2, %v7960_v44, 0.0  ;;  %v7980_v52 = vsel %vm7979_vm2, %v7957_v47, 0.0 }
 0x606   : > { %v7989_v3 = vadd.f32 %v7981_v50, %v7940_v63 }
 0x608   : > { %v8009_v55 = vpop.xlane.xlu0 %8008 }
 0x609   : > { %v7672_v34 = vpop.xlane.xlu1 %7671  ;;  %v8030_v28 = vsel %vm8028_vm4, %v8009_v55, 0.0  ;;  %v16130_v55 = vand.u32 4294901760, %v16112_v57 }
 0x60a   : > { %v8038_v30 = vadd.f32 %v8030_v28, %v7989_v3  ;;  %v7689_v6 = vsel %vm7685_vm7, %v7672_v34, 0.0 }
 0x60c   : > { %v7614_v51 = vpop.xlane.xlu0 %7613  ;;  %v8049_v43 = vsel %vm5459_vm13, %v8038_v30, 0 }
 0x60d   : > { %v7721_v42 = vpop.xlane.xlu1 %7720  ;;  %v7637_v60 = vsel %vm7636_vm1, %v7614_v51, 0.0  ;;  %v16100_v58 = vand.u32 4294901760, %v8049_v43 }
 0x60e   : > { %v7694_v22 = vadd.f32 %v7686_v0, %v7637_v60  ;;  %v7738_v50 = vsel %vm7734_vm8, %v7721_v42, 0.0  ;;  %v16148_v42 = vand.u32 4294901760, %v16133_v41 }
 0x60f   : > { %v16115_v54 = vsub.f32 %v8049_v43, %v16100_v58 }
 0x610   : > { %v7743_v40 = vadd.f32 %v7735_v4, %v7694_v22  ;;  %v7908_v8 = vpop.xlane.xlu0 %7907 }
 0x611   : > { %v7770_v12 = vpop.xlane.xlu1 %7769  ;;  %v7931_v7 = vsel %vm7930_vm15, %v7908_v8, 0.0  ;;  %v8130_v32 = vand.u32 4294901760, %v16115_v54 }
 0x612   : > { %v7792_v16 = vadd.f32 %v7784_v56, %v7743_v40  ;;  %v8678_v40 = vsub.f32 %v16112_v57, %v16130_v55  ;;  %v7787_v30 = vsel %vm7783_vm12, %v7770_v12, 0.0 }
 0x613   : > { %v8131_v4 = vsub.f32 %v16115_v54, %v8130_v32 }
 0x614   : > { %v7841_v20 = vadd.f32 %v7833_v5, %v7792_v16  ;;  %v8006_v45 = vpop.xlane.xlu0 %8005  ;;  %v8679_v43 = vand.u32 4294901760, %v8678_v40 }
 0x615   : > { %v16094_v18 = vpop.xlane.xlu1 %7619  ;;  %v8029_v31 = vsel %vm8028_vm4, %v8006_v45, 0.0  ;;  %v8132_v53 = vand.u32 4294901760, %v8131_v4 }
 0x616   : > { %v7890_v62 = vadd.f32 %v7882_v2, %v7841_v20 }
 0x618   : > { %v7939_v61 = vadd.f32 %v7931_v7, %v7890_v62  ;;  %v7623_v25 = vpop.xlane.xlu0 %7622  ;;  %v13326_v14 = vpop.f32.mrf.mxu1  ;;  %v8685_v62 = vsub.f32 %v16133_v41, %v16148_v42 }
 0x619   : > { %v16104_v49 = vpop.xlane.xlu1 %7717  ;;  %v7640_v19 = vsel %vm7636_vm1, %v7623_v25, 0.0 }
 0x61a   : > { %v7988_v35 = vadd.f32 %v7980_v52, %v7939_v61  ;;  %v7697_v44 = vadd.f32 %v7689_v6, %v7640_v19  ;;  %v5724_v60 = vpop.f32.mrf.mxu1 }
 0x61c   : > { %v8037_v17 = vadd.f32 %v8029_v31, %v7988_v35  ;;  %v7819_v29 = vpop.xlane.xlu0 %7818  ;;  %v7746_v0 = vadd.f32 %v7738_v50, %v7697_v44 }
 0x61d   : > { %v16121_v39 = vpop.xlane.xlu1 %7766  ;;  %v13340_v5 = vpop.f32.mrf.mxu1 }
 0x61e   : > { %v8046_v24 = vsel %vm5459_vm13, %v8037_v17, 0  ;;  %v7795_v16 = vadd.f32 %v7787_v30, %v7746_v0  ;;  %v8686_v17 = vand.u32 4294901760, %v8685_v62 }
 0x61f   : > { %v16126_v47 = vand.u32 4294901760, %v8046_v24  ;;  %v5888_v52 = vpop.f32.mrf.mxu1 }
 0x620   : > { %v7868_v13 = vpop.xlane.xlu0 %7867 }
 0x621   : > { %v8119_v10 = vsub.f32 %v8046_v24, %v16126_v47  ;;  %v16136_v33 = vpop.xlane.xlu1 %7815  ;;  %13492 = vmatprep.mubr.f32.mxu1 %v16126_v47  ;;  %v13319_v34 = vpop.f32.mrf.mxu0  ;;  %v7885_v31 = vsel %vm7881_vm14, %v7868_v13, 0.0 }
 0x622   : > { %13493 = vmatmul.mubr.f32.vlgmr.msra.gmra.mxu1 %v16100_v58  ;;  %v5731_v51 = vadd.f32 %v13326_v14, %v13319_v34  ;;  %v13354_v24 = vpop.f32.mrf.mxu1  ;;  %v7835_v40 = vsel %vm7832_vm0, %v16136_v33, 0.0 }
 0x623   : > { %13503 = vmatpush3.msra.mxu1 %v15859_v59  ;;  %v8120_v63 = vand.u32 4294901760, %v8119_v10  ;;  %v5633_v28 = vpop.f32.mrf.mxu0 }
 0x624   : > { %13504 = vmatprep.subr.mxu1 %v15895_v26  ;;  %v7917_v22 = vpop.xlane.xlu0 %7916  ;;  %v5725_v3 = vadd.f32 %v5724_v60, %v5633_v28  ;;  %v6052_v60 = vpop.f32.mrf.mxu1 }
 0x625   : > { %v16150_v8 = vpop.xlane.xlu1 %7864  ;;  %13505 = vmatpush3.msra.mxu1 %v15895_v26  ;;  %13506 = vmatprep.mubr.f32.mxu1 %v8120_v63  ;;  %v8121_v56 = vsub.f32 %v8119_v10, %v8120_v63 }
 0x626   : > { %13507 = vmatmul.mubr.f32.vlgmr.msra.gmra.mxu1 %v8130_v32  ;;  %13516 = vmatprep.subr.mxu1 %v15859_v59 }
 0x627   : > { %13517 = vmatpush3.msra.mxu1 %v15859_v59  ;;  %13520 = vmatprep.mubr.f32.mxu1 %v16126_v47  ;;  %v8122_v20 = vand.u32 4294901760, %v8121_v56  ;;  %v7836_v59 = vsel %vm7832_vm0, %v7819_v29, 0.0 }
 0x628   : > { %13518 = vmatprep.subr.mxu1 %v15895_v26  ;;  %v7966_v45 = vpop.xlane.xlu0 %7965  ;;  %v13333_v2 = vpop.f32.mrf.mxu0  ;;  %v7844_v25 = vadd.f32 %v7836_v59, %v7795_v16 }
 0x629   : > { %v16161_v12 = vpop.xlane.xlu1 %7962  ;;  %13485 = vmatprep.mubr.f32.mxu0 %v8122_v20  ;;  %13519 = vmatpush3.msra.mxu1 %v15895_v26  ;;  %v5814_v7 = vadd.f32 %v13333_v2, %v5731_v51  ;;  %v7983_v14 = vsel %vm7979_vm2, %v7966_v45, 0.0  ;;  %v301_v20 = vld [vmem:[%s17403_s4 + $0x68] sm:$0xff]  ;;  %v16228_v2 = vpop.f32.mrf.mxu1 }
 0x62a   : > { %13486 = vmatmul.mubr.f32.vlgmr.msra.gmra.mxu0 %v8132_v53  ;;  %13521 = vmatmul.mubr.f32.vlgmr.msra.gmra.mxu1 %v16100_v58  ;;  %v5806_v61 = vpop.f32.mrf.mxu0  ;;  %v7893_v6 = vadd.f32 %v7885_v31, %v7844_v25 }
 0x62b   : > { %13496 = vmatpush3.msra.mxu0 %v15878_v46  ;;  %13499 = vmatprep.mubr.f32.mxu0 %v8119_v10  ;;  %v5807_v11 = vadd.f32 %v5806_v61, %v5725_v3  ;;  %v5897_v35 = vadd.f32 %v13340_v5, %v5814_v7  ;;  %v7934_v46 = vsel %vm7930_vm15, %v7917_v22, 0.0  ;;  %v16230_v7 = vand.u32 4294901760, %v301_v20  ;;  %v300_v61 = vld [vmem:[%s17403_s4 + $0x60] sm:$0xff] }
 0x62c   : > { %13497 = vmatprep.subr.mxu0 %v15914_v27  ;;  %v8015_v26 = vpop.xlane.xlu0 %8014  ;;  %13530 = vmatprep.subr.mxu1 %v8679_v43  ;;  %v7942_v32 = vadd.f32 %v7934_v46, %v7893_v6 }
 0x62d   : > { %v16171_v19 = vpop.xlane.xlu1 %7677  ;;  %13498 = vmatpush3.msra.mxu0 %v15914_v27  ;;  %v5889_v29 = vadd.f32 %v5888_v52, %v5807_v11  ;;  %13531 = vmatpush3.msra.mxu1 %v8679_v43  ;;  %v8032_v34 = vsel %vm8028_vm4, %v8015_v26, 0.0 }
 0x62e   : > { %13500 = vmatmul.mubr.f32.vlgmr.msra.gmra.mxu0 %v16115_v54  ;;  %13509 = vmatprep.subr.mxu0 %v15900_v48  ;;  %v7639_v54 = vsel %vm7636_vm1, %v16094_v18, 0.0  ;;  %v7737_v18 = vsel %vm7734_vm8, %v16104_v49, 0.0  ;;  %v7991_v63 = vadd.f32 %v7983_v14, %v7942_v32 }
 0x62f   : > { %13510 = vmatpush3.msra.mxu0 %v15900_v48  ;;  %13513 = vmatprep.mubr.f32.mxu0 %v16126_v47  ;;  %v13347_v44 = vpop.f32.mrf.mxu0 }
 0x630   : > { %13511 = vmatprep.subr.mxu0 %v15932_v1  ;;  %v7669_v27 = vpop.xlane.xlu0 %7668  ;;  %v5980_v13 = vadd.f32 %v13347_v44, %v5897_v35  ;;  %13532 = vmatprep.subr.mxu1 %v8686_v17  ;;  %v8040_v4 = vadd.f32 %v8032_v34, %v7991_v63  ;;  %v16245_v35 = vpop.f32.mrf.mxu1 }
 0x631   : > { %v16186_v10 = vpop.xlane.xlu1 %7726  ;;  %v7688_v48 = vsel %vm7685_vm7, %v7669_v27, 0.0  ;;  %13512 = vmatpush3.msra.mxu0 %v15932_v1  ;;  %v5973_v47 = vpop.f32.mrf.mxu0  ;;  %13533 = vmatpush3.msra.mxu1 %v8686_v17  ;;  %v16248_v17 = vsub.f32 %v301_v20, %v16230_v7 }
 0x632   : > { %v7696_v50 = vadd.f32 %v7688_v48, %v7639_v54  ;;  %13514 = vmatmul.mubr.f32.vlgmr.msra.gmra.mxu0 %v16100_v58  ;;  %v16194_v51 = vadd.f32 %v13354_v24, %v5980_v13  ;;  %v5974_v0 = vadd.f32 %v5973_v47, %v5889_v29  ;;  %13544 = vmatprep.subr.mxu1 %v16098_v21  ;;  %v7786_v58 = vsel %vm7783_vm12, %v16121_v39, 0.0  ;;  %v16259_v44 = vpop.f32.mrf.mxu1 }
 0x633   : > { %13523 = vmatprep.subr.mxu0 %v16098_v21  ;;  %v7884_v39 = vsel %vm7881_vm14, %v16150_v8, 0.0  ;;  %v8557_v16 = vsel %vm5459_vm13, %v8040_v4, 0  ;;  %v7982_v8 = vsel %vm7979_vm2, %v16161_v12, 0.0  ;;  %v16250_v12 = vand.u32 4294901760, %v300_v61 }
 0x634   : > { %v7745_v1 = vadd.f32 %v7737_v18, %v7696_v50  ;;  %v7914_v28 = vpop.xlane.xlu0 %7913  ;;  %v16201_v22 = vadd.f32 %v6052_v60, %v5974_v0  ;;  %13524 = vmatpush3.msra.mxu0 %v16098_v21  ;;  %v16226_v53 = vand.u32 4294901760, %v8557_v16  ;;  %v16263_v13 = vand.u32 4294901760, %v16248_v17  ;;  %v16276_v50 = vpop.f32.mrf.mxu1 }
 0x635   : > { %v16207_v3 = vpop.xlane.xlu1 %7625  ;;  %13525 = vmatprep.subr.mxu0 %v16119_v15  ;;  %v7933_v33 = vsel %vm7930_vm15, %v7914_v28, 0.0  ;;  %v16266_v54 = vsub.f32 %v300_v61, %v16250_v12 }
 0x636   : > { %v7794_v49 = vadd.f32 %v7786_v58, %v7745_v1  ;;  %13526 = vmatpush3.msra.mxu0 %v16119_v15  ;;  %v16243_v11 = vsub.f32 %v8557_v16, %v16226_v53  ;;  %v16252_v29 = vpop.f32.mrf.mxu0  ;;  %v9186_v60 = vsub.f32 %v16248_v17, %v16263_v13 }
 0x637   : > { %13537 = vmatprep.subr.mxu0 %v16112_v57  ;;  %v16285_v1 = vand.u32 4294901760, %v16266_v54 }
 0x638   : > { %v7843_v56 = vadd.f32 %v7835_v40, %v7794_v49  ;;  %v8012_v30 = vpop.xlane.xlu0 %8011  ;;  %v8638_v27 = vand.u32 4294901760, %v16243_v11  ;;  %v16269_v48 = vpop.f32.mrf.mxu0  ;;  %v7691_v49 = vsel %vm7685_vm7, %v16171_v19, 0.0  ;;  %v9187_v20 = vand.u32 4294901760, %v9186_v60 }
 0x639   : > { %v16219_v5 = vpop.xlane.xlu1 %7723  ;;  %v8031_v52 = vsel %vm8028_vm4, %v8012_v30, 0.0  ;;  %v16298_v30 = vpop.f32.mrf.mxu1 }
 0x63a   : > { %v7892_v45 = vadd.f32 %v7884_v39, %v7843_v56  ;;  %v8639_v63 = vsub.f32 %v16243_v11, %v8638_v27 }
 0x63c   : > { %v7941_v43 = vadd.f32 %v7933_v33, %v7892_v45  ;;  %v7629_v62 = vpop.xlane.xlu0 %7628  ;;  %v8640_v16 = vand.u32 4294901760, %v8639_v63  ;;  %v9193_v45 = vsub.f32 %v16266_v54, %v16285_v1 }
 0x63d   : > { %v16235_v59 = vpop.xlane.xlu1 %7772  ;;  %v7642_v0 = vsel %vm7636_vm1, %v7629_v62, 0.0  ;;  %v16287_v28 = vpop.f32.mrf.mxu0 }
 0x63e   : > { %v7990_v25 = vadd.f32 %v7982_v8, %v7941_v43  ;;  %v7699_v40 = vadd.f32 %v7691_v49, %v7642_v0  ;;  %v16313_v62 = vpop.f32.mrf.mxu1 }
 0x63f   : > { %v16303_v19 = vpop.f32.mrf.mxu0 }
 0x640   : > { %v8039_v31 = vadd.f32 %v8031_v52, %v7990_v25  ;;  %v7776_v26 = vpop.xlane.xlu0 %7775 }
 0x641   : > { %v16254_v46 = vpop.xlane.xlu1 %7821  ;;  %v7789_v8 = vsel %vm7783_vm12, %v7776_v26, 0.0  ;;  %v16318_v25 = vpop.f32.mrf.mxu0 }
 0x642   : > { %v8554_v6 = vsel %vm5459_vm13, %v8039_v31, 0 }
 0x643   : > { %v16257_v24 = vand.u32 4294901760, %v8554_v6 }
 0x644   : > { %v7825_v14 = vpop.xlane.xlu0 %7824 }
 0x645   : > { %v8627_v32 = vsub.f32 %v8554_v6, %v16257_v24  ;;  %v16271_v47 = vpop.xlane.xlu1 %7870  ;;  %13534 = vmatprep.mubr.f32.mxu1 %v16257_v24  ;;  %v16332_v6 = vpop.f32.mrf.mxu0 }
 0x646   : > { %13535 = vmatmul.mubr.f32.vlgmr.msra.gmra.mxu1 %v16226_v53 }
 0x647   : > { %13545 = vmatpush3.msra.mxu1 %v16098_v21  ;;  %v8628_v34 = vand.u32 4294901760, %v8627_v32 }
 0x648   : > { %13546 = vmatprep.subr.mxu1 %v16119_v15  ;;  %v7874_v18 = vpop.xlane.xlu0 %7873 }
 0x649   : > { %v16289_v58 = vpop.xlane.xlu1 %7919  ;;  %13547 = vmatpush3.msra.mxu1 %v16119_v15  ;;  %13548 = vmatprep.mubr.f32.mxu1 %v8628_v34  ;;  %v8629_v4 = vsub.f32 %v8627_v32, %v8628_v34  ;;  %v7887_v26 = vsel %vm7881_vm14, %v7874_v18, 0.0 }
 0x64a   : > { %13549 = vmatmul.mubr.f32.vlgmr.msra.gmra.mxu1 %v8638_v27  ;;  %13558 = vmatprep.subr.mxu1 %v16098_v21 }
 0x64b   : > { %13559 = vmatpush3.msra.mxu1 %v16098_v21  ;;  %13562 = vmatprep.mubr.f32.mxu1 %v16257_v24  ;;  %v8630_v56 = vand.u32 4294901760, %v8629_v4  ;;  %v7740_v21 = vsel %vm7734_vm8, %v16186_v10, 0.0 }
 0x64c   : > { %13560 = vmatprep.subr.mxu1 %v16119_v15  ;;  %v7923_v39 = vpop.xlane.xlu0 %7922  ;;  %v7748_v43 = vadd.f32 %v7740_v21, %v7699_v40  ;;  %v7788_v21 = vsel %vm7783_vm12, %v16235_v59, 0.0  ;;  %v7886_v59 = vsel %vm7881_vm14, %v16271_v47, 0.0 }
 0x64d   : > { %v16305_v33 = vpop.xlane.xlu1 %7968  ;;  %13527 = vmatprep.mubr.f32.mxu0 %v8630_v56  ;;  %13561 = vmatpush3.msra.mxu1 %v16119_v15  ;;  %v9194_v15 = vand.u32 4294901760, %v9193_v45 }
 0x64e   : > { %13528 = vmatmul.mubr.f32.vlgmr.msra.gmra.mxu0 %v8640_v16  ;;  %13563 = vmatmul.mubr.f32.vlgmr.msra.gmra.mxu1 %v16226_v53  ;;  %v13410_v52 = vpop.f32.mrf.mxu1  ;;  %v7797_v31 = vadd.f32 %v7789_v8, %v7748_v43 }
 0x64f   : > { %13538 = vmatpush3.msra.mxu0 %v16112_v57  ;;  %13541 = vmatprep.mubr.f32.mxu0 %v8627_v32  ;;  %v7838_v57 = vsel %vm7832_vm0, %v7825_v14, 0.0 }
 0x650   : > { %13539 = vmatprep.subr.mxu0 %v16133_v41  ;;  %v7972_v61 = vpop.xlane.xlu0 %7971  ;;  %13572 = vmatprep.subr.mxu1 %v9187_v20  ;;  %v7846_v14 = vadd.f32 %v7838_v57, %v7797_v31 }
 0x651   : > { %v16320_v10 = vpop.xlane.xlu1 %7683  ;;  %13540 = vmatpush3.msra.mxu0 %v16133_v41  ;;  %13573 = vmatpush3.msra.mxu1 %v9187_v20  ;;  %v7985_v34 = vsel %vm7979_vm2, %v7972_v61, 0.0 }
 0x652   : > { %13542 = vmatmul.mubr.f32.vlgmr.msra.gmra.mxu0 %v16243_v11  ;;  %13551 = vmatprep.subr.mxu0 %v16130_v55  ;;  %v6752_v11 = vpop.f32.mrf.mxu1 }
 0x653   : > { %13552 = vmatpush3.msra.mxu0 %v16130_v55  ;;  %13555 = vmatprep.mubr.f32.mxu0 %v16257_v24  ;;  %v7936_v55 = vsel %vm7930_vm15, %v7923_v39, 0.0  ;;  %v7895_v24 = vadd.f32 %v7887_v26, %v7846_v14  ;;  %v303_v14 = vld [vmem:[%s17403_s4 + $0x78] sm:$0xff] }
 0x654   : > { %13553 = vmatprep.subr.mxu0 %v16148_v42  ;;  %v8021_v41 = vpop.xlane.xlu0 %8020  ;;  %13574 = vmatprep.subr.mxu1 %v9194_v15  ;;  %v13424_v40 = vpop.f32.mrf.mxu1 }
 0x655   : > { %v16334_v27 = vpop.xlane.xlu1 %7732  ;;  %13554 = vmatpush3.msra.mxu0 %v16148_v42  ;;  %13575 = vmatpush3.msra.mxu1 %v9194_v15  ;;  %v7641_v42 = vsel %vm7636_vm1, %v16207_v3, 0.0  ;;  %v7944_v63 = vadd.f32 %v7936_v55, %v7895_v24  ;;  %v8034_v4 = vsel %vm8028_vm4, %v8021_v41, 0.0  ;;  %v7739_v3 = vsel %vm7734_vm8, %v16219_v5, 0.0 }
 0x656   : > { %13556 = vmatmul.mubr.f32.vlgmr.msra.gmra.mxu0 %v16226_v53  ;;  %13586 = vmatprep.subr.mxu1 %v16230_v7  ;;  %v6916_v15 = vpop.f32.mrf.mxu1 }
 0x657   : > { %v13403_v32 = vpop.f32.mrf.mxu0  ;;  %13565 = vmatprep.subr.mxu0 %v16230_v7  ;;  %v7993_v39 = vadd.f32 %v7985_v34, %v7944_v63 }
 0x658   : > { %v7675_v0 = vpop.xlane.xlu0 %7674  ;;  %v6759_v18 = vadd.f32 %v13410_v52, %v13403_v32  ;;  %13566 = vmatpush3.msra.mxu0 %v16230_v7  ;;  %v7837_v52 = vsel %vm7832_vm0, %v16254_v46, 0.0 }
 0x659   : > { %v16348_v53 = vpop.xlane.xlu1 %7631  ;;  %v7690_v60 = vsel %vm7685_vm7, %v7675_v0, 0.0  ;;  %13567 = vmatprep.subr.mxu0 %v16250_v12  ;;  %v6661_v56 = vpop.f32.mrf.mxu0  ;;  %v8042_v43 = vadd.f32 %v8034_v4, %v7993_v39 }
 0x65a   : > { %v7698_v49 = vadd.f32 %v7690_v60, %v7641_v42  ;;  %13568 = vmatpush3.msra.mxu0 %v16250_v12  ;;  %v6753_v16 = vadd.f32 %v6752_v11, %v6661_v56  ;;  %v13438_v0 = vpop.f32.mrf.mxu1  ;;  %v16376_v60 = vand.u32 4294901760, %v303_v14 }
 0x65b   : > { %13579 = vmatprep.subr.mxu0 %v16248_v17  ;;  %v9065_v55 = vsel %vm5459_vm13, %v8042_v43, 0 }
 0x65c   : > { %v7747_v20 = vadd.f32 %v7739_v3, %v7698_v49  ;;  %v8018_v45 = vpop.xlane.xlu0 %8017  ;;  %v16378_v4 = vand.u32 4294901760, %v9065_v55 }
 0x65d   : > { %v7730_v8 = vpop.xlane.xlu1 %7729  ;;  %v8033_v43 = vsel %vm8028_vm4, %v8018_v45, 0.0  ;;  %v7693_v45 = vsel %vm7685_vm7, %v16320_v10, 0.0 }
 0x65e   : > { %v7796_v61 = vadd.f32 %v7788_v21, %v7747_v20  ;;  %v13417_v57 = vpop.f32.mrf.mxu0  ;;  %v7080_v21 = vpop.f32.mrf.mxu1 }
 0x65f   : > { %v6842_v5 = vadd.f32 %v13417_v57, %v6759_v18  ;;  %v7935_v18 = vsel %vm7930_vm15, %v16289_v58, 0.0  ;;  %v302_v58 = vld [vmem:[%s17403_s4 + $0x70] sm:$0xff] }
 0x660   : > { %v7845_v31 = vadd.f32 %v7837_v52, %v7796_v61  ;;  %v7635_v26 = vpop.xlane.xlu0 %7634  ;;  %v6834_v41 = vpop.f32.mrf.mxu0 }
 0x661   : > { %v7779_v11 = vpop.xlane.xlu1 %7778  ;;  %v6835_v24 = vadd.f32 %v6834_v41, %v6753_v16  ;;  %v6925_v32 = vadd.f32 %v13424_v40, %v6842_v5  ;;  %v7984_v40 = vsel %vm7979_vm2, %v16305_v33, 0.0  ;;  %v16396_v33 = vsub.f32 %v9065_v55, %v16378_v4 }
 0x662   : > { %v7894_v34 = vadd.f32 %v7886_v59, %v7845_v31  ;;  %v13431_v46 = vpop.f32.mrf.mxu0  ;;  %v16398_v5 = vand.u32 4294901760, %v302_v58  ;;  %v7644_v31 = vsel %vm7636_vm1, %v7635_v26, 0.0  ;;  %v7643_v26 = vsel %vm7636_vm1, %v16348_v53, 0.0 }
 0x663   : > { %v7008_v42 = vadd.f32 %v13431_v46, %v6925_v32  ;;  %v6917_v63 = vadd.f32 %v6916_v15, %v6835_v24  ;;  %v16393_v15 = vsub.f32 %v303_v14, %v16376_v60  ;;  %v7701_v55 = vadd.f32 %v7693_v45, %v7644_v31 }
 0x664   : > { %v7943_v49 = vadd.f32 %v7935_v18, %v7894_v34  ;;  %v7782_v47 = vpop.xlane.xlu0 %7781  ;;  %v7001_v56 = vpop.f32.mrf.mxu0  ;;  %v9146_v34 = vand.u32 4294901760, %v16396_v33 }
 0x665   : > { %v7828_v3 = vpop.xlane.xlu1 %7827  ;;  %v16383_v39 = vadd.f32 %v13438_v0, %v7008_v42  ;;  %v7002_v16 = vadd.f32 %v7001_v56, %v6917_v63  ;;  %v16409_v14 = vand.u32 4294901760, %v16393_v15  ;;  %v16413_v0 = vsub.f32 %v302_v58, %v16398_v5 }
 0x666   : > { %v7992_v20 = vadd.f32 %v7984_v40, %v7943_v49  ;;  %v7742_v63 = vsel %vm7734_vm8, %v16334_v27, 0.0  ;;  %v7741_v49 = vsel %vm7734_vm8, %v7730_v8, 0.0  ;;  %v7790_v27 = vsel %vm7783_vm12, %v7779_v11, 0.0 }
 0x667   : > { %v16390_v61 = vadd.f32 %v7080_v21, %v7002_v16  ;;  %v9694_v56 = vsub.f32 %v16393_v15, %v16409_v14  ;;  %v7750_v40 = vadd.f32 %v7742_v63, %v7701_v55  ;;  %v16434_v21 = vand.u32 4294901760, %v16413_v0 }
 0x668   : > { %v8041_v57 = vadd.f32 %v8033_v43, %v7992_v20  ;;  %v7831_v52 = vpop.xlane.xlu0 %7830  ;;  %v9147_v20 = vsub.f32 %v16396_v33, %v9146_v34  ;;  %v7791_v8 = vsel %vm7783_vm12, %v7782_v47, 0.0  ;;  %vm10746_vm12 = vcmp.lt.s32.totalorder %v14571_v37, 7 }
 0x669   : > { %v7877_v41 = vpop.xlane.xlu1 %7876  ;;  %v7840_v45 = vsel %vm7832_vm0, %v7831_v52, 0.0  ;;  %v9695_v47 = vand.u32 4294901760, %v9694_v56  ;;  %v7799_v55 = vadd.f32 %v7791_v8, %v7750_v40 }
 0x66a   : > { %v9062_v59 = vsel %vm5459_vm13, %v8041_v57, 0 }
 0x66b   : > { %v16406_v24 = vand.u32 4294901760, %v9062_v59 }
 0x66c   : > { %v7681_v32 = vpop.xlane.xlu0 %7680 }
 0x66d   : > { %v9135_v46 = vsub.f32 %v9062_v59, %v16406_v24  ;;  %v7926_v18 = vpop.xlane.xlu1 %7925  ;;  %v7692_v10 = vsel %vm7685_vm7, %v7681_v32, 0.0  ;;  %13576 = vmatprep.mubr.f32.mxu1 %v16406_v24  ;;  %v7839_v59 = vsel %vm7832_vm0, %v7828_v3, 0.0  ;;  %v7888_v3 = vsel %vm7881_vm14, %v7877_v41, 0.0  ;;  %vm17492_vm7 = vmmov %vm17491_vm9 }
 0x66e   : > { %v7700_v42 = vadd.f32 %v7692_v10, %v7643_v26  ;;  %13577 = vmatmul.mubr.f32.vlgmr.msra.gmra.mxu1 %v16378_v4  ;;  %v9701_v10 = vsub.f32 %v16413_v0, %v16434_v21  ;;  %v7937_v63 = vsel %vm7930_vm15, %v7926_v18, 0.0  ;;  %vm17493_vm1 = vmmov %vm17492_vm7  ;;  %vm10739_vm0 = vcmp.lt.s32.totalorder %v14571_v37, 1 }
 0x66f   : > { %13587 = vmatpush3.msra.mxu1 %v16230_v7  ;;  %v9136_v53 = vand.u32 4294901760, %v9135_v46 }
 0x670   : > { %v7749_v16 = vadd.f32 %v7741_v49, %v7700_v42  ;;  %13588 = vmatprep.subr.mxu1 %v16250_v12  ;;  %v7880_v58 = vpop.xlane.xlu0 %7879  ;;  %v9702_v40 = vand.u32 4294901760, %v9701_v10 }
 0x671   : > { %13589 = vmatpush3.msra.mxu1 %v16250_v12  ;;  %13590 = vmatprep.mubr.f32.mxu1 %v9136_v53  ;;  %v9137_v43 = vsub.f32 %v9135_v46, %v9136_v53  ;;  %v7975_v31 = vpop.xlane.xlu1 %7974  ;;  %v7889_v52 = vsel %vm7881_vm14, %v7880_v58, 0.0 }
 0x672   : > { %v7798_v57 = vadd.f32 %v7790_v27, %v7749_v16  ;;  %13591 = vmatmul.mubr.f32.vlgmr.msra.gmra.mxu1 %v9146_v34  ;;  %13600 = vmatprep.subr.mxu1 %v16230_v7  ;;  %v9148_v34 = vand.u32 4294901760, %v9147_v20  ;;  %v7986_v16 = vsel %vm7979_vm2, %v7975_v31, 0.0 }
 0x673   : > { %13601 = vmatpush3.msra.mxu1 %v16230_v7  ;;  %13604 = vmatprep.mubr.f32.mxu1 %v16406_v24  ;;  %v9138_v11 = vand.u32 4294901760, %v9137_v43  ;;  %v7848_v7 = vadd.f32 %v7840_v45, %v7799_v55 }
 0x674   : > { %v7847_v32 = vadd.f32 %v7839_v59, %v7798_v57  ;;  %13602 = vmatprep.subr.mxu1 %v16250_v12  ;;  %v7929_v26 = vpop.xlane.xlu0 %7928 }
 0x675   : > { %13569 = vmatprep.mubr.f32.mxu0 %v9138_v11  ;;  %13603 = vmatpush3.msra.mxu1 %v16250_v12  ;;  %v7938_v49 = vsel %vm7930_vm15, %v7929_v26, 0.0  ;;  %v7897_v53 = vadd.f32 %v7889_v52, %v7848_v7  ;;  %v8024_v56 = vpop.xlane.xlu1 %8023  ;;  %vm10769_vm15 = vcmask 523264  }
 0x676   : > { %v7896_v42 = vadd.f32 %v7888_v3, %v7847_v32  ;;  %13570 = vmatmul.mubr.f32.vlgmr.msra.gmra.mxu0 %v9148_v34  ;;  %13605 = vmatmul.mubr.f32.vlgmr.msra.gmra.mxu1 %v16378_v4  ;;  %v8035_v20 = vsel %vm8028_vm4, %v8024_v56, 0.0 }
 0x677   : > { %13580 = vmatpush3.msra.mxu0 %v16248_v17  ;;  %13583 = vmatprep.mubr.f32.mxu0 %v9135_v46  ;;  %v7946_v17 = vadd.f32 %v7938_v49, %v7897_v53  ;;  %v13452_v46 = vpop.f32.mrf.mxu1 }
 0x678   : > { %v7945_v41 = vadd.f32 %v7937_v63, %v7896_v42  ;;  %13581 = vmatprep.subr.mxu0 %v16266_v54  ;;  %v7978_v12 = vpop.xlane.xlu0 %7977  ;;  %13614 = vmatprep.subr.mxu1 %v9695_v47 }
 0x679   : > { %v7987_v18 = vsel %vm7979_vm2, %v7978_v12, 0.0  ;;  %13582 = vmatpush3.msra.mxu0 %v16266_v54  ;;  %13615 = vmatpush3.msra.mxu1 %v9695_v47  ;;  %vm10776_vm2 = vcmask 785408  }
 0x67a   : > { %v7994_v58 = vadd.f32 %v7986_v16, %v7945_v41  ;;  %13584 = vmatmul.mubr.f32.vlgmr.msra.gmra.mxu0 %v16396_v33  ;;  %13593 = vmatprep.subr.mxu0 %v16263_v13  ;;  %v7995_v8 = vadd.f32 %v7987_v18, %v7946_v17 }
 0x67b   : > { %13594 = vmatpush3.msra.mxu0 %v16263_v13  ;;  %13597 = vmatprep.mubr.f32.mxu0 %v16406_v24  ;;  %v7266_v13 = vpop.f32.mrf.mxu1 }
 0x67c   : > { %v8043_v27 = vadd.f32 %v8035_v20, %v7994_v58  ;;  %13595 = vmatprep.subr.mxu0 %v16285_v1  ;;  %v8027_v54 = vpop.xlane.xlu0 %8026  ;;  %13616 = vmatprep.subr.mxu1 %v9702_v40 }
 0x67d   : > { %v8036_v43 = vsel %vm8028_vm4, %v8027_v54, 0.0  ;;  %13596 = vmatpush3.msra.mxu0 %v16285_v1  ;;  %13617 = vmatpush3.msra.mxu1 %v9702_v40  ;;  %v13466_v47 = vpop.f32.mrf.mxu1  ;;  %vm17497_vm4 = vmmov %vm17493_vm1 }
 0x67e   : > { %v9570_v33 = vsel %vm5459_vm13, %v8043_v27, 0  ;;  %v8044_v57 = vadd.f32 %v8036_v43, %v7995_v8  ;;  %13598 = vmatmul.mubr.f32.vlgmr.msra.gmra.mxu0 %v16378_v4  ;;  %13628 = vmatprep.subr.mxu1 %v16376_v60 }
 0x67f   : > { %v9642_v24 = vand.u32 4294901760, %v9570_v33  ;;  %13607 = vmatprep.subr.mxu0 %v16376_v60  ;;  %v13445_v31 = vpop.f32.mrf.mxu0  ;;  %v7430_v52 = vpop.f32.mrf.mxu1 }
 0x680   : > { %v9573_v59 = vsel %vm5459_vm13, %v8044_v57, 0  ;;  %13608 = vmatpush3.msra.mxu0 %v16376_v60  ;;  %v7273_v9 = vadd.f32 %v13452_v46, %v13445_v31 }
 0x681   : > { %v9643_v45 = vsub.f32 %v9570_v33, %v9642_v24  ;;  %v9652_v1 = vand.u32 4294901760, %v9573_v59  ;;  %13618 = vmatprep.mubr.f32.mxu1 %v9642_v24  ;;  %13609 = vmatprep.subr.mxu0 %v16398_v5  ;;  %v7175_v11 = vpop.f32.mrf.mxu0  ;;  %v13480_v16 = vpop.f32.mrf.mxu1 }
 0x682   : > { %13610 = vmatpush3.msra.mxu0 %v16398_v5  ;;  %v7267_v4 = vadd.f32 %v7266_v13, %v7175_v11 }
 0x683   : > { %v9653_v55 = vsub.f32 %v9573_v59, %v9652_v1  ;;  %13619 = vmatmul.mubr.f32.vlgmr.msra.gmra.mxu1 %v9652_v1  ;;  %v9644_v32 = vand.u32 4294901760, %v9643_v45  ;;  %13621 = vmatprep.subr.mxu0 %v16393_v15 }
 0x684   : > { %13629 = vmatpush3.msra.mxu1 %v16376_v60  ;;  %v13459_v26 = vpop.f32.mrf.mxu0 }
 0x685   : > { %13630 = vmatprep.subr.mxu1 %v16398_v5  ;;  %13632 = vmatprep.mubr.f32.mxu1 %v9644_v32  ;;  %v9654_v34 = vand.u32 4294901760, %v9653_v55  ;;  %v9645_v10 = vsub.f32 %v9643_v45, %v9644_v32  ;;  %v7356_v3 = vadd.f32 %v13459_v26, %v7273_v9 }
 0x686   : > { %13631 = vmatpush3.msra.mxu1 %v16398_v5  ;;  %v7348_v7 = vpop.f32.mrf.mxu0 }
 0x687   : > { %13633 = vmatmul.mubr.f32.vlgmr.msra.gmra.mxu1 %v9654_v34  ;;  %13642 = vmatprep.subr.mxu1 %v16376_v60  ;;  %v9646_v42 = vand.u32 4294901760, %v9645_v10  ;;  %v9655_v63 = vsub.f32 %v9653_v55, %v9654_v34  ;;  %v7349_v49 = vadd.f32 %v7348_v7, %v7267_v4  ;;  %v7439_v41 = vadd.f32 %v13466_v47, %v7356_v3 }
 0x688   : > { %13643 = vmatpush3.msra.mxu1 %v16376_v60  ;;  %13646 = vmatprep.mubr.f32.mxu1 %v9642_v24  ;;  %v13473_v53 = vpop.f32.mrf.mxu0  ;;  %v14214_v60 = vld [vmem:[%s17401_s2 + $0x18] sm:$0xff] }
 0x689   : > { %13611 = vmatprep.mubr.f32.mxu0 %v9646_v42  ;;  %13644 = vmatprep.subr.mxu1 %v16398_v5  ;;  %v9656_v56 = vand.u32 4294901760, %v9655_v63  ;;  %v7522_v12 = vadd.f32 %v13473_v53, %v7439_v41  ;;  %v16493_v40 = vadd.f32 %v7430_v52, %v7349_v49 }
 0x68a   : > { %13645 = vmatpush3.msra.mxu1 %v16398_v5  ;;  %10130 = vrot.lane.b32.xlu1 %v14214_v60, %s14298_s16  ;;  %v14216_v5 = vld [vmem:[%s17401_s2 + $0x8] sm:$0xff]  ;;  %v16519_v58 = vpop.f32.mrf.mxu0 }
 0x68b   : > { %13612 = vmatmul.mubr.f32.vlgmr.msra.gmra.mxu0 %v9656_v56  ;;  %13647 = vmatmul.mubr.f32.vlgmr.msra.gmra.mxu1 %v9652_v1  ;;  %v16496_v18 = vadd.f32 %v13480_v16, %v7522_v12 }
 0x68c   : > { %13622 = vmatpush3.msra.mxu0 %v16393_v15  ;;  %13625 = vmatprep.mubr.f32.mxu0 %v9643_v45  ;;  %v14215_v15 = vld [vmem:[%s17401_s2 + $0x10] sm:$0xff] }
 0x68d   : > { %13623 = vmatprep.subr.mxu0 %v16413_v0 }
 0x68e   : > { %13624 = vmatpush3.msra.mxu0 %v16413_v0  ;;  %10128 = vrot.lane.b32.xlu1 %v14215_v15, %s14298_s16 }
 0x68f   : > { %13635 = vmatprep.subr.mxu0 %v16409_v14  ;;  %13626 = vmatmul.mubr.f32.vlgmr.msra.gmra.mxu0 %v9653_v55 }
 0x690   : > { %13636 = vmatpush3.msra.mxu0 %v16409_v14  ;;  %13639 = vmatprep.mubr.f32.mxu0 %v9642_v24  ;;  %v16517_v14 = vpop.f32.mrf.mxu1 }
 0x691   : > { %13637 = vmatprep.subr.mxu0 %v16434_v21 }
 0x692   : > { %13638 = vmatpush3.msra.mxu0 %v16434_v21  ;;  %10126 = vrot.lane.b32.xlu1 %v14216_v5, %s14298_s16 }
 0x693   : > { %13640 = vmatmul.mubr.f32.vlgmr.msra.gmra.mxu0 %v9652_v1 }
 0x6e2   : > { %v13494_v0 = vpop.f32.mrf.mxu1 }
 0x6e4   : > { %v8215_v21 = vpop.f32.mrf.mxu1 }
 0x6e6   : > { %v13508_v17 = vpop.f32.mrf.mxu1 }
 0x6e8   : > { %v8379_v54 = vpop.f32.mrf.mxu1 }
 0x6ea   : > { %v13487_v46 = vpop.f32.mrf.mxu0  ;;  %v13522_v31 = vpop.f32.mrf.mxu1 }
 0x6eb   : > { %v8222_v20 = vadd.f32 %v13494_v0, %v13487_v46 }
 0x6ec   : > { %v8124_v27 = vpop.f32.mrf.mxu0  ;;  %v8543_v4 = vpop.f32.mrf.mxu1 }
 0x6ed   : > { %v8216_v8 = vadd.f32 %v8215_v21, %v8124_v27 }
 0x6ee   : > { %v13501_v43 = vpop.f32.mrf.mxu0 }
 0x6ef   : > { %v8305_v33 = vadd.f32 %v13501_v43, %v8222_v20 }
 0x6f0   : > { %v8297_v57 = vpop.f32.mrf.mxu0 }
 0x6f1   : > { %v8298_v13 = vadd.f32 %v8297_v57, %v8216_v8  ;;  %v8388_v24 = vadd.f32 %v13508_v17, %v8305_v33 }
 0x6f2   : > { %v13515_v59 = vpop.f32.mrf.mxu0 }
 0x6f3   : > { %v8471_v9 = vadd.f32 %v13515_v59, %v8388_v24  ;;  %v8380_v45 = vadd.f32 %v8379_v54, %v8298_v13 }
 0x6f4   : > { %v8464_v1 = vpop.f32.mrf.mxu0 }
 0x6f5   : > { %v8550_v11 = vadd.f32 %v13522_v31, %v8471_v9  ;;  %v8465_v47 = vadd.f32 %v8464_v1, %v8380_v45 }
 0x6f7   : > { %v16522_v55 = vadd.f32 %v8550_v11, %v16194_v51  ;;  %v8544_v32 = vadd.f32 %v8543_v4, %v8465_v47  ;;  %v6245_v51 = vadd.f32 %v16228_v2, %v16252_v29 }
 0x6f9   : > { %v16525_v26 = vadd.f32 %v8544_v32, %v16201_v22  ;;  %v6239_v22 = vadd.f32 %v16245_v35, %v16269_v48  ;;  %v6328_v49 = vadd.f32 %v16287_v28, %v6245_v51 }
 0x6fb   : > { %v6321_v12 = vadd.f32 %v16303_v19, %v6239_v22  ;;  %v6411_v2 = vadd.f32 %v16259_v44, %v6328_v49 }
 0x6fc   : > { %v10131_v34 = vpop.permute.xlu1 %10130 }
 0x6fd   : > { %v16527_v10 = vand.u32 4294901760, %v10131_v34  ;;  %v6403_v35 = vadd.f32 %v16276_v50, %v6321_v12  ;;  %v6494_v0 = vadd.f32 %v16318_v25, %v6411_v2 }
 0x6ff   : > { %13649 = vmatprep.subr.mxu0 %v16527_v10  ;;  %v6488_v20 = vadd.f32 %v16332_v6, %v6403_v35  ;;  %v6573_v44 = vadd.f32 %v16298_v30, %v6494_v0  ;;  %v16554_v47 = vsub.f32 %v10131_v34, %v16527_v10 }
 0x700   : > { %v10129_v52 = vpop.permute.xlu1 %10128  ;;  %13650 = vmatpush3.msra.mxu0 %v16527_v10 }
 0x701   : > { %v16531_v7 = vand.u32 4294901760, %v10129_v52  ;;  %v6567_v50 = vadd.f32 %v16313_v62, %v6488_v20 }
 0x703   : > { %13651 = vmatprep.subr.mxu0 %v16531_v7  ;;  %v16557_v32 = vsub.f32 %v10129_v52, %v16531_v7 }
 0x704   : > { %v10127_v63 = vpop.permute.xlu1 %10126  ;;  %13652 = vmatpush3.msra.mxu0 %v16531_v7 }
 0x705   : > { %v16540_v41 = vand.u32 4294901760, %v10127_v63  ;;  %v16566_v34 = vand.u32 4294901760, %v16557_v32 }
 0x706   : > { %v13536_v3 = vpop.f32.mrf.mxu1 }
 0x707   : > { %13653 = vmatprep.subr.mxu0 %v16540_v41  ;;  %v10266_v35 = vsub.f32 %v16557_v32, %v16566_v34 }
 0x708   : > { %v8723_v42 = vpop.f32.mrf.mxu1  ;;  %13654 = vmatpush3.msra.mxu0 %v16540_v41 }
 0x70a   : > { %v13550_v53 = vpop.f32.mrf.mxu1 }
 0x70c   : > { %v8887_v60 = vpop.f32.mrf.mxu1 }
 0x70e   : > { %v13529_v56 = vpop.f32.mrf.mxu0  ;;  %v13564_v19 = vpop.f32.mrf.mxu1 }
 0x70f   : > { %v8730_v29 = vadd.f32 %v13536_v3, %v13529_v56  ;;  %v16563_v56 = vand.u32 4294901760, %v16554_v47 }
 0x710   : > { %v8632_v16 = vpop.f32.mrf.mxu0  ;;  %v9051_v57 = vpop.f32.mrf.mxu1 }
 0x711   : > { %v8724_v48 = vadd.f32 %v8723_v42, %v8632_v16  ;;  %v16560_v42 = vsub.f32 %v10127_v63, %v16540_v41  ;;  %v10259_v52 = vsub.f32 %v16554_v47, %v16563_v56 }
 0x712   : > { %v13543_v15 = vpop.f32.mrf.mxu0 }
 0x713   : > { %v8813_v28 = vadd.f32 %v13543_v15, %v8730_v29  ;;  %v16571_v29 = vand.u32 4294901760, %v16560_v42 }
 0x714   : > { %v8805_v5 = vpop.f32.mrf.mxu0 }
 0x715   : > { %v8806_v21 = vadd.f32 %v8805_v5, %v8724_v48  ;;  %v8896_v17 = vadd.f32 %v13550_v53, %v8813_v28  ;;  %v10260_v48 = vand.u32 4294901760, %v10259_v52  ;;  %v10273_v28 = vsub.f32 %v16560_v42, %v16571_v29 }
 0x716   : > { %v13557_v46 = vpop.f32.mrf.mxu0 }
 0x717   : > { %v8979_v27 = vadd.f32 %v13557_v46, %v8896_v17  ;;  %v8888_v8 = vadd.f32 %v8887_v60, %v8806_v21  ;;  %v10267_v17 = vand.u32 4294901760, %v10266_v35  ;;  %13660 = vmatprep.subr.mxu1 %v10260_v48 }
 0x718   : > { %v8972_v54 = vpop.f32.mrf.mxu0  ;;  %13661 = vmatpush3.msra.mxu1 %v10260_v48 }
 0x719   : > { %v9058_v43 = vadd.f32 %v13564_v19, %v8979_v27  ;;  %v8973_v33 = vadd.f32 %v8972_v54, %v8888_v8  ;;  %v10274_v19 = vand.u32 4294901760, %v10273_v28  ;;  %13662 = vmatprep.subr.mxu1 %v10267_v17  ;;  %v14217_v27 = vld [vmem:[%s17401_s2] sm:$0xff] }
 0x71a   : > { %13663 = vmatpush3.msra.mxu1 %v10267_v17 }
 0x71b   : > { %v10080_v13 = vadd.f32 %v9058_v43, %v6573_v44  ;;  %v9052_v24 = vadd.f32 %v9051_v57, %v8973_v33  ;;  %13664 = vmatprep.subr.mxu1 %v10274_v19 }
 0x71c   : > { %13665 = vmatpush3.msra.mxu1 %v10274_v19 }
 0x71d   : > { %v10079_v31 = vadd.f32 %v9052_v24, %v6567_v50  ;;  %10089 = vrot.lane.b32.xlu1 %v10080_v13, %s14299_s28 }
 0x71f   : > { %10087 = vrot.lane.b32.xlu0 %v10079_v31, %s14299_s28 }
 0x72e   : > { %v13578_v25 = vpop.f32.mrf.mxu1 }
 0x730   : > { %v9231_v6 = vpop.f32.mrf.mxu1 }
 0x732   : > { %v13592_v59 = vpop.f32.mrf.mxu1 }
 0x734   : > { %v9395_v1 = vpop.f32.mrf.mxu1 }
 0x736   : > { %v13571_v9 = vpop.f32.mrf.mxu0  ;;  %v13606_v51 = vpop.f32.mrf.mxu1 }
 0x737   : > { %v9238_v30 = vadd.f32 %v13578_v25, %v13571_v9 }
 0x738   : > { %v9140_v45 = vpop.f32.mrf.mxu0  ;;  %v9559_v63 = vpop.f32.mrf.mxu1 }
 0x739   : > { %v9232_v62 = vadd.f32 %v9231_v6, %v9140_v45  ;;  %v7516_v6 = vadd.f32 %v16519_v58, %v16493_v40 }
 0x73a   : > { %v13585_v11 = vpop.f32.mrf.mxu0 }
 0x73b   : > { %v9321_v4 = vadd.f32 %v13585_v11, %v9238_v30  ;;  %v7595_v11 = vadd.f32 %v16517_v14, %v7516_v6 }
 0x73c   : > { %v9313_v3 = vpop.f32.mrf.mxu0 }
 0x73d   : > { %v9314_v22 = vadd.f32 %v9313_v3, %v9232_v62  ;;  %v9404_v49 = vadd.f32 %v13592_v59, %v9321_v4 }
 0x73e   : > { %v13599_v53 = vpop.f32.mrf.mxu0 }
 0x73f   : > { %v9487_v12 = vadd.f32 %v13599_v53, %v9404_v49  ;;  %v9396_v16 = vadd.f32 %v9395_v1, %v9314_v22 }
 0x740   : > { %v9480_v2 = vpop.f32.mrf.mxu0 }
 0x741   : > { %v9566_v60 = vadd.f32 %v13606_v51, %v9487_v12  ;;  %v9481_v15 = vadd.f32 %v9480_v2, %v9396_v16 }
 0x743   : > { %v10082_v5 = vadd.f32 %v9566_v60, %v16383_v39  ;;  %v9560_v0 = vadd.f32 %v9559_v63, %v9481_v15  ;;  %v13620_v21 = vpop.f32.mrf.mxu1 }
 0x745   : > { %v10081_v46 = vadd.f32 %v9560_v0, %v16390_v61  ;;  %10097 = vrot.lane.b32.xlu1 %v10082_v5, %s14300_s29  ;;  %v9739_v20 = vpop.f32.mrf.mxu1 }
 0x747   : > { %10095 = vrot.lane.b32.xlu0 %v10081_v46, %s14300_s29  ;;  %v13634_v39 = vpop.f32.mrf.mxu1 }
 0x749   : > { %10124 = vrot.lane.b32.xlu1 %v14217_v27, %s14298_s16  ;;  %v9903_v61 = vpop.f32.mrf.mxu1 }
 0x74b   : > { %v13613_v8 = vpop.f32.mrf.mxu0  ;;  %v13648_v31 = vpop.f32.mrf.mxu1 }
 0x74c   : > { %v9746_v44 = vadd.f32 %v13620_v21, %v13613_v8 }
 0x74d   : > { %v9648_v54 = vpop.f32.mrf.mxu0  ;;  %v10067_v30 = vpop.f32.mrf.mxu1 }
 0x74e   : > { %v9740_v33 = vadd.f32 %v9739_v20, %v9648_v54 }
 0x74f   : > { %v13627_v43 = vpop.f32.mrf.mxu0 }
 0x750   : > { %v9829_v57 = vadd.f32 %v13627_v43, %v9746_v44 }
 0x751   : > { %v9821_v50 = vpop.f32.mrf.mxu0 }
 0x752   : > { %v9822_v13 = vadd.f32 %v9821_v50, %v9740_v33  ;;  %v9912_v24 = vadd.f32 %v13634_v39, %v9829_v57 }
 0x753   : > { %v13641_v25 = vpop.f32.mrf.mxu0 }
 0x754   : > { %v9904_v59 = vadd.f32 %v9903_v61, %v9822_v13  ;;  %v9995_v45 = vadd.f32 %v13641_v25, %v9912_v24 }
 0x755   : > { %v9988_v9 = vpop.f32.mrf.mxu0 }
 0x756   : > { %v9989_v1 = vadd.f32 %v9988_v9, %v9904_v59  ;;  %v10074_v4 = vadd.f32 %v13648_v31, %v9995_v45 }
 0x758   : > { %v10068_v62 = vadd.f32 %v10067_v30, %v9989_v1  ;;  %v10084_v51 = vadd.f32 %v10074_v4, %v16496_v18  ;;  %v14218_v4 = vld [vmem:[%s14428_s26 + $0x8] sm:$0xff] }
 0x75a   : > { %v10083_v3 = vadd.f32 %v10068_v62, %v7595_v11 }
 0x75c   : > { %10103 = vrot.lane.b32.xlu0 %v10083_v3, %s14301_s12 }
 0x760   : > { %10105 = vrot.lane.b32.xlu0 %v10084_v51, %s14301_s12  ;;  %s17353_s12 = scalar_lea.hbm %s17405_s6, %s12286_s19 }
 0x78f   : > { %v10090_v22 = vpop.permute.xlu1 %10089 }
 0x790   : > { %v10110_v48 = vsel %vm17487_vm3, %v16522_v55, %v10090_v22  ;;  %v14219_v22 = vld [vmem:[%s14428_s26] sm:$0xff]  ;;  %vm17506_vm3 = vmmov %vm17493_vm1  ;;  %s14225_s26 = sshll.u32 %s14303_s15, 4  ;;  %s14226_s26 = int_to_ptr.vmem [resolvable:$false] %s14225_s26 }
 0x791   : > { %v10088_v2 = vpop.permute.xlu0 %10087  ;;  %s14227_s17 = scalar_lea.vmem %s14226_s26, 512 }
 0x792   : > { %v10109_v52 = vsel %vm17485_vm6, %v16525_v26, %v10088_v2  ;;  %vm17503_vm6 = vmmov %vm17493_vm1 }
 0x7b7   : > { %v10098_v49 = vpop.permute.xlu1 %10097 }
 0x7b8   : > { %v10112_v5 = vsel %vm5459_vm13, %v10110_v48, %v10098_v49  ;;  %v16658_v48 = vld [vmem:[%s17402_s3 + $0x48] sm:$0xff] }
 0x7b9   : > { %v10096_v18 = vpop.permute.xlu0 %10095 }
 0x7ba   : > { %v10111_v63 = vsel %vm5459_vm13, %v10109_v52, %v10096_v18  ;;  %vm17490_vm13 = vmmov %vm17488_vm10 }
 0x7bb   : > { %v10125_v53 = vpop.permute.xlu1 %10124 }
 0x7bc   : > { %v10176_v12 = vand.u32 4294901760, %v10125_v53 }
 0x7be   : > { %v10278_v40 = vsub.f32 %v10125_v53, %v10176_v12  ;;  %13655 = vmatprep.subr.mxu0 %v10176_v12 }
 0x7bf   : > { %13656 = vmatpush3.msra.mxu0 %v10176_v12 }
 0x7c0   : > { %13671 = vmatprep.subr.mxu0 %v16554_v47  ;;  %v16588_v58 = vand.u32 4294901760, %v10278_v40 }
 0x7c2   : > { %v10280_v14 = vsub.f32 %v10278_v40, %v16588_v58 }
 0x7c4   : > { %v10281_v16 = vand.u32 4294901760, %v10280_v14 }
 0x7c6   : > { %13666 = vmatprep.subr.mxu1 %v10281_v16 }
 0x7c7   : > { %13667 = vmatpush3.msra.mxu1 %v10281_v16 }
 0x7c8   : > { %13682 = vmatprep.subr.mxu1 %v16527_v10 }
 0x7ce   : > { %v10104_v60 = vpop.permute.xlu0 %10103 }
 0x7cf   : > { %v10114_v15 = vsel %vm10113_vm5, %v10111_v63, %v10104_v60 }
 0x7d0   : > { %v10137_v35 = vsel %vm17486_vm11, %v10114_v15, 0  ;;  %v16648_v15 = vld [vmem:[%s17402_s3 + $0x58] sm:$0xff]  ;;  %vm17504_vm11 = vmmov %vm17493_vm1 }
 0x7d1   : > { %v10211_v28 = vand.u32 4294901760, %v10137_v35 }
 0x7d2   : > { %v10106_v0 = vpop.permute.xlu0 %10105 }
 0x7d3   : > { %v10212_v21 = vsub.f32 %v10137_v35, %v10211_v28  ;;  %v10115_v17 = vsel %vm10113_vm5, %v10112_v5, %v10106_v0  ;;  %13668 = vmatprep.mubr.f32.mxu1 %v10211_v28  ;;  %v16653_v35 = vld [vmem:[%s17402_s3 + $0x50] sm:$0xff]  ;;  %v16667_v0 = vand.u32 4294901760, %v16658_v48  ;;  %vm17498_vm5 = vmmov %vm17493_vm1 }
 0x7d4   : > { %v10140_v19 = vsel %vm17488_vm10, %v10115_v17, 0  ;;  %v16664_v5 = vand.u32 4294901760, %v16653_v35  ;;  %v16677_v17 = vld [vmem:[%s17402_s3 + $0x38] sm:$0xff]  ;;  %vm17508_vm10 = vmmov %vm17493_vm1 }
 0x7d5   : > { %v10221_v46 = vand.u32 4294901760, %v10140_v19  ;;  %v10213_v26 = vand.u32 4294901760, %v10212_v21 }
 0x7d7   : > { %v10222_v20 = vsub.f32 %v10140_v19, %v10221_v46  ;;  %13669 = vmatmul.mubr.f32.vlgmr.msra.gmra.mxu1 %v10221_v46  ;;  %v10214_v27 = vsub.f32 %v10212_v21, %v10213_v26 }
 0x7d8   : > { %13683 = vmatpush3.msra.mxu1 %v16527_v10  ;;  %13690 = vmatprep.mubr.f32.mxu1 %v10213_v26 }
 0x7d9   : > { %13684 = vmatprep.subr.mxu1 %v16531_v7  ;;  %v10215_v55 = vand.u32 4294901760, %v10214_v27  ;;  %v10223_v39 = vand.u32 4294901760, %v10222_v20  ;;  %v16695_v27 = vsub.f32 %v16658_v48, %v16667_v0 }
 0x7da   : > { %13685 = vmatpush3.msra.mxu1 %v16531_v7 }
 0x7db   : > { %13686 = vmatprep.subr.mxu1 %v16540_v41  ;;  %13657 = vmatprep.mubr.f32.mxu0 %v10215_v55  ;;  %v10224_v8 = vsub.f32 %v10222_v20, %v10223_v39 }
 0x7dc   : > { %13687 = vmatpush3.msra.mxu1 %v16540_v41 }
 0x7dd   : > { %13688 = vmatprep.subr.mxu1 %v10176_v12  ;;  %v10225_v54 = vand.u32 4294901760, %v10224_v8 }
 0x7de   : > { %13689 = vmatpush3.msra.mxu1 %v10176_v12 }
 0x7df   : > { %13691 = vmatmul.mubr.f32.vlgmr.msra.gmra.mxu1 %v10223_v39  ;;  %13704 = vmatprep.subr.mxu1 %v16527_v10 }
 0x7e0   : > { %13658 = vmatmul.mubr.f32.vlgmr.msra.gmra.mxu0 %v10225_v54  ;;  %13705 = vmatpush3.msra.mxu1 %v16527_v10  ;;  %v10118_v10 = vsub.s32 0, %v14571_v37 }
 0x7e1   : > { %13672 = vmatpush3.msra.mxu0 %v16554_v47  ;;  %13712 = vmatprep.mubr.f32.mxu1 %v10211_v28 }
 0x7e2   : > { %13673 = vmatprep.subr.mxu0 %v16557_v32  ;;  %13679 = vmatprep.mubr.f32.mxu0 %v10212_v21  ;;  %v16672_v21 = vld [vmem:[%s17402_s3 + $0x40] sm:$0xff] }
 0x7e3   : > { %13706 = vmatprep.subr.mxu1 %v16531_v7  ;;  %13674 = vmatpush3.msra.mxu0 %v16557_v32  ;;  %v16680_v19 = vand.u32 4294901760, %v16672_v21 }
 0x7e4   : > { %13707 = vmatpush3.msra.mxu1 %v16531_v7  ;;  %13675 = vmatprep.subr.mxu0 %v16560_v42  ;;  %v16628_v7 = vld [vmem:[%s17404_s5] sm:$0x7f] }
 0x7e5   : > { %13708 = vmatprep.subr.mxu1 %v16540_v41  ;;  %13676 = vmatpush3.msra.mxu0 %v16560_v42  ;;  %17489 = vst [vmem:[#allocation7_spill] sm:$0xff] %v16628_v7  ;;  %v10119_v47 = vrot.slane %v16628_v7, %v10118_v10  ;;  %v16700_v55 = vsub.f32 %v16672_v21, %v16680_v19  ;;  %v16714_v10 = vand.u32 4294901760, %v16695_v27 }
 0x7e6   : > { %13709 = vmatpush3.msra.mxu1 %v16540_v41  ;;  %13677 = vmatprep.subr.mxu0 %v10278_v40 }
 0x7e7   : > { %13710 = vmatprep.subr.mxu1 %v10176_v12  ;;  %13678 = vmatpush3.msra.mxu0 %v10278_v40 }
 0x7e8   : > { %13711 = vmatpush3.msra.mxu1 %v10176_v12  ;;  %13680 = vmatmul.mubr.f32.vlgmr.msra.gmra.mxu0 %v10222_v20  ;;  %v16691_v20 = vsub.f32 %v16653_v35, %v16664_v5 }
 0x7e9   : > { %13693 = vmatprep.subr.mxu0 %v16563_v56  ;;  %13713 = vmatmul.mubr.f32.vlgmr.msra.gmra.mxu1 %v10221_v46 }
 0x7ea   : > { %13694 = vmatpush3.msra.mxu0 %v16563_v56  ;;  %13701 = vmatprep.mubr.f32.mxu0 %v10211_v28  ;;  %v16661_v28 = vand.u32 4294901760, %v16648_v15  ;;  %v16711_v54 = vand.u32 4294901760, %v16691_v20 }
 0x7eb   : > { %13695 = vmatprep.subr.mxu0 %v16566_v34 }
 0x7ec   : > { %13696 = vmatpush3.msra.mxu0 %v16566_v34  ;;  %v16687_v26 = vsub.f32 %v16648_v15, %v16661_v28 }
 0x7ed   : > { %13697 = vmatprep.subr.mxu0 %v16571_v29 }
 0x7ee   : > { %13698 = vmatpush3.msra.mxu0 %v16571_v29  ;;  %v16708_v8 = vand.u32 4294901760, %v16687_v26 }
 0x7ef   : > { %13699 = vmatprep.subr.mxu0 %v16588_v58 }
 0x7f0   : > { %13700 = vmatpush3.msra.mxu0 %v16588_v58 }
 0x7f1   : > { %13702 = vmatmul.mubr.f32.vlgmr.msra.gmra.mxu0 %v10221_v46  ;;  %v16683_v46 = vand.u32 4294901760, %v16677_v17  ;;  %13715 = vmatprep.subr.mxu0 %v16661_v28 }
 0x7f2   : > { %13716 = vmatpush3.msra.mxu0 %v16661_v28 }
 0x7f3   : > { %v16704_v39 = vsub.f32 %v16677_v17, %v16683_v46  ;;  %13717 = vmatprep.subr.mxu0 %v16664_v5 }
 0x7f4   : > { %13718 = vmatpush3.msra.mxu0 %v16664_v5 }
 0x7f5   : > { %13719 = vmatprep.subr.mxu0 %v16667_v0 }
 0x7f6   : > { %13720 = vmatpush3.msra.mxu0 %v16667_v0 }
 0x7f7   : > { %13721 = vmatprep.subr.mxu0 %v16680_v19 }
 0x7f8   : > { %13722 = vmatpush3.msra.mxu0 %v16680_v19 }
 0x7f9   : > { %13723 = vmatprep.subr.mxu0 %v16683_v46 }
 0x7fa   : > { %13724 = vmatpush3.msra.mxu0 %v16683_v46 }
 0x897   : > { %v13670_v32 = vpop.f32.mrf.mxu1 }
 0x899   : > { %v10318_v44 = vpop.f32.mrf.mxu1 }
 0x89f   : > { %v13692_v43 = vpop.f32.mrf.mxu1 }
 0x8a0   : > { %v13659_v41 = vpop.f32.mrf.mxu0 }
 0x8a1   : > { %v10228_v56 = vadd.f32 %v13659_v41, %v10119_v47  ;;  %v10488_v24 = vpop.f32.mrf.mxu1  ;;  %v16718_v41 = vand.u32 4294901760, %v16700_v55 }
 0x8a2   : > { %v10217_v42 = vpop.f32.mrf.mxu0 }
 0x8a3   : > { %v10218_v34 = vadd.f32 %v10217_v42, %v10119_v47  ;;  %v10325_v61 = vadd.f32 %v13670_v32, %v10228_v56  ;;  %v10892_v47 = vsub.f32 %v16687_v26, %v16708_v8  ;;  %v10899_v32 = vsub.f32 %v16691_v20, %v16711_v54 }
 0x8a4   : > { %v10906_v42 = vsub.f32 %v16695_v27, %v16714_v10  ;;  %v16728_v56 = vand.u32 4294901760, %v16704_v39 }
 0x8a5   : > { %v10319_v50 = vadd.f32 %v10318_v44, %v10218_v34  ;;  %v10893_v34 = vand.u32 4294901760, %v10892_v47  ;;  %v10913_v44 = vsub.f32 %v16700_v55, %v16718_v41 }
 0x8a7   : > { %13742 = vmatprep.subr.mxu1 %v10893_v34 }
 0x8a8   : > { %v13681_v29 = vpop.f32.mrf.mxu0  ;;  %13743 = vmatpush3.msra.mxu1 %v10893_v34 }
 0x8a9   : > { %v10412_v57 = vadd.f32 %v13681_v29, %v10325_v61  ;;  %v13714_v25 = vpop.f32.mrf.mxu1  ;;  %v10900_v29 = vand.u32 4294901760, %v10899_v32  ;;  %v10907_v61 = vand.u32 4294901760, %v10906_v42 }
 0x8aa   : > { %v10404_v33 = vpop.f32.mrf.mxu0 }
 0x8ab   : > { %v10405_v13 = vadd.f32 %v10404_v33, %v10319_v50  ;;  %v10497_v31 = vadd.f32 %v13692_v43, %v10412_v57  ;;  %v10660_v11 = vpop.f32.mrf.mxu1  ;;  %v10920_v43 = vsub.f32 %v16704_v39, %v16728_v56  ;;  %13744 = vmatprep.subr.mxu1 %v10900_v29  ;;  %v10914_v33 = vand.u32 4294901760, %v10913_v44 }
 0x8ac   : > { %13745 = vmatpush3.msra.mxu1 %v10900_v29 }
 0x8ad   : > { %v10489_v9 = vadd.f32 %v10488_v24, %v10405_v13  ;;  %13746 = vmatprep.subr.mxu1 %v10907_v61  ;;  %v10921_v57 = vand.u32 4294901760, %v10920_v43 }
 0x8ae   : > { %13747 = vmatpush3.msra.mxu1 %v10907_v61 }
 0x8af   : > { %13748 = vmatprep.subr.mxu1 %v10914_v33 }
 0x8b0   : > { %13749 = vmatpush3.msra.mxu1 %v10914_v33 }
 0x8b1   : > { %v13703_v6 = vpop.f32.mrf.mxu0  ;;  %13750 = vmatprep.subr.mxu1 %v10921_v57 }
 0x8b2   : > { %v10586_v59 = vadd.f32 %v13703_v6, %v10497_v31  ;;  %13751 = vmatpush3.msra.mxu1 %v10921_v57 }
 0x8b3   : > { %v10579_v45 = vpop.f32.mrf.mxu0 }
 0x8b4   : > { %v10667_v1 = vadd.f32 %v13714_v25, %v10586_v59  ;;  %v10580_v30 = vadd.f32 %v10579_v45, %v10489_v9  ;;  %v16743_v59 = vld [vmem:[%s17402_s3 + $0x30] sm:$0xff]  ;;  %v10701_v45 = vsub.s32 3, %v14571_v37 }
 0x8b5   : > { %v16746_v9 = vand.u32 4294901760, %v16743_v59 }
 0x8b6   : > { %v10661_v62 = vadd.f32 %v10660_v11, %v10580_v30  ;;  %v10671_v3 = vadd.f32 %v14218_v4, %v10667_v1  ;;  %v16752_v1 = vld [vmem:[%s17402_s3 + $0x28] sm:$0xff]  ;;  %v16766_v4 = vld [vmem:[%s17402_s3 + $0x20] sm:$0xff] }
 0x8b7   : > { %v16756_v30 = vsub.f32 %v16743_v59, %v16746_v9  ;;  %v16759_v11 = vand.u32 4294901760, %v16752_v1  ;;  %13725 = vmatprep.subr.mxu0 %v16746_v9 }
 0x8b8   : > { %v10675_v51 = vsel %vm17490_vm13, %v10671_v3, 0.0  ;;  %v10670_v49 = vadd.f32 %v14219_v22, %v10661_v62  ;;  %v10707_v62 = vsub.s32 4, %v14571_v37  ;;  %13726 = vmatpush3.msra.mxu0 %v16746_v9  ;;  %v16777_v22 = vand.u32 4294901760, %v16766_v4  ;;  %vm17509_vm13 = vmmov %vm17493_vm1 }
 0x8b9   : > { %10676 = vadd.xlane.f32.xlu1 %v10675_v51  ;;  %v16774_v51 = vsub.f32 %v16752_v1, %v16759_v11  ;;  %13727 = vmatprep.subr.mxu0 %v16759_v11 }
 0x8ba   : > { %v10672_v53 = vsel %vm17491_vm9, %v10670_v49, 0.0  ;;  %13728 = vmatpush3.msra.mxu0 %v16759_v11  ;;  %vm17510_vm9 = vmmov %vm17493_vm1 }
 0x8bb   : > { %10673 = vadd.xlane.f32.xlu0 %v10672_v53  ;;  %v16784_v53 = vld [vmem:[%s17402_s3 + $0x18] sm:$0xff]  ;;  %13729 = vmatprep.subr.mxu0 %v16777_v22 }
 0x8bc   : > { %13730 = vmatpush3.msra.mxu0 %v16777_v22 }
 0x942   : > { %v10677_v12 = vpop.xlane.xlu1 %10676 }
 0x943   : > { %v10680_v40 = vmul.f32 0.03125, %v10677_v12 }
 0x944   : > { %v10674_v58 = vpop.xlane.xlu0 %10673 }
 0x945   : > { %v10679_v14 = vmul.f32 0.03125, %v10674_v58  ;;  %v16635_v16 = vsub.f32 %v10671_v3, %v10680_v40  ;;  %v16770_v3 = vand.u32 4294901760, %v16756_v30  ;;  %v16790_v40 = vand.u32 4294901760, %v16774_v51 }
 0x946   : > { %v16794_v58 = vsub.f32 %v16766_v4, %v16777_v22 }
 0x947   : > { %v16637_v2 = vsub.f32 %v10670_v49, %v10679_v14  ;;  %v10684_v63 = vmul.f32 %v16635_v16, %v16635_v16  ;;  %v10702_v49 = vrot.slane %v16628_v7, %v10701_v45  ;;  %v10927_v12 = vsub.f32 %v16756_v30, %v16770_v3 }
 0x948   : > { %v16797_v14 = vand.u32 4294901760, %v16784_v53  ;;  %v10934_v32 = vsub.f32 %v16774_v51, %v16790_v40  ;;  %v16811_v42 = vand.u32 4294901760, %v16794_v58 }
 0x949   : > { %v10683_v18 = vmul.f32 %v16637_v2, %v16637_v2  ;;  %v10688_v60 = vsel %vm17493_vm1, %v10684_v63, 0.0  ;;  %v16804_v63 = vld [vmem:[%s17402_s3 + $0x10] sm:$0xff]  ;;  %v10928_v47 = vand.u32 4294901760, %v10927_v12 }
 0x94a   : > { %13731 = vmatprep.subr.mxu0 %v16797_v14  ;;  %v16816_v34 = vsub.f32 %v16784_v53, %v16797_v14  ;;  %v16819_v29 = vand.u32 4294901760, %v16804_v63  ;;  %v10935_v61 = vand.u32 4294901760, %v10934_v32  ;;  %v10941_v43 = vsub.f32 %v16794_v58, %v16811_v42 }
 0x94b   : > { %v10685_v52 = vsel %vm17492_vm7, %v10683_v18, 0.0  ;;  %13732 = vmatpush3.msra.mxu0 %v16797_v14  ;;  %13752 = vmatprep.subr.mxu1 %v10928_v47  ;;  %vm17511_vm7 = vmmov %vm17493_vm1 }
 0x94c   : > { %10686 = vadd.xlane.f32.xlu0 %v10685_v52  ;;  %v10708_v52 = vrot.slane %v16628_v7, %v10707_v62  ;;  %13753 = vmatpush3.msra.mxu1 %v10928_v47 }
 0x94d   : > { %13733 = vmatprep.subr.mxu0 %v16819_v29  ;;  %13754 = vmatprep.subr.mxu1 %v10935_v61 }
 0x94e   : > { %13734 = vmatpush3.msra.mxu0 %v16819_v29  ;;  %13755 = vmatpush3.msra.mxu1 %v10935_v61 }
 0x950   : > { %10689 = vadd.xlane.f32.xlu0 %v10688_v60 }
 0x9d5   : > { %v10687_v50 = vpop.xlane.xlu0 %10686 }
 0x9d6   : > { %v10691_v13 = vmul.f32 0.03125, %v10687_v50  ;;  %v16833_v50 = vand.u32 4294901760, %v16816_v34 }
 0x9d8   : > { %v10693_v24 = vadd.f32 1e-05, %v10691_v13  ;;  %v16837_v13 = vsub.f32 %v16804_v63, %v16819_v29  ;;  %v10948_v62 = vsub.f32 %v16816_v34, %v16833_v50 }
 0x9d9   : > { %v10690_v31 = vpop.xlane.xlu0 %10689 }
 0x9da   : > { %14206 = vrsqrt.f32 %v10693_v24  ;;  %v10692_v25 = vmul.f32 0.03125, %v10690_v31  ;;  %v16842_v24 = vld [vmem:[%s17402_s3] sm:$0xff]  ;;  %v16856_v12 = vand.u32 4294901760, %v16837_v13 }
 0x9db   : > { %17494 = vst [vmem:[#allocation8_spill] sm:$0xff] %v16842_v24 }
 0x9dc   : > { %v10694_v6 = vadd.f32 1e-05, %v10692_v25  ;;  %v10955_v61 = vsub.f32 %v16837_v13, %v16856_v12 }
 0x9de   : > { %14208 = vrsqrt.f32 %v10694_v6  ;;  %v10942_v6 = vand.u32 4294901760, %v10941_v43 }
 0x9e0   : > { %13756 = vmatprep.subr.mxu1 %v10942_v6 }
 0x9e1   : > { %13757 = vmatpush3.msra.mxu1 %v10942_v6 }
 0x9e7   : > { %v14207_v18 = vpop.eup %14206 }
 0x9e8   : > { %v10697_v60 = vmul.f32 %v14207_v18, %v16637_v2  ;;  %v16824_v2 = vld [vmem:[%s17402_s3 + $0x8] sm:$0xff]  ;;  %v16859_v18 = vand.u32 4294901760, %v16842_v24 }
 0x9e9   : > { %v16830_v33 = vand.u32 4294901760, %v16824_v2 }
 0x9ea   : > { %v10703_v44 = vmul.f32 %v10702_v49, %v10697_v60  ;;  %v16873_v43 = vsub.f32 %v16842_v24, %v16859_v18 }
 0x9eb   : > { %v14209_v57 = vpop.eup %14208  ;;  %v16850_v45 = vsub.f32 %v16824_v2, %v16830_v33  ;;  %13735 = vmatprep.subr.mxu0 %v16830_v33 }
 0x9ec   : > { %v16845_v31 = vadd.f32 %v10708_v52, %v10703_v44  ;;  %v10698_v25 = vmul.f32 %v14209_v57, %v16635_v16  ;;  %v10724_v16 = vadd.s32 1, %v14576_v38  ;;  %13736 = vmatpush3.msra.mxu0 %v16830_v33  ;;  %v10949_v44 = vand.u32 4294901760, %v10948_v62 }
 0x9ed   : > { %v16866_v32 = vand.u32 4294901760, %v16850_v45  ;;  %13737 = vmatprep.subr.mxu0 %v16859_v18  ;;  %v10956_v57 = vand.u32 4294901760, %v10955_v61 }
 0x9ee   : > { %17495 = vst [vmem:[#allocation9_spill] sm:$0xff] %v16845_v31  ;;  %v10735_v60 = vmul.f32 %v16845_v31, %v14934_v36  ;;  %v10704_v47 = vmul.f32 %v10702_v49, %v10698_v25  ;;  %13738 = vmatpush3.msra.mxu0 %v16859_v18  ;;  %13758 = vmatprep.subr.mxu1 %v10949_v44  ;;  %v16883_v25 = vand.u32 4294901760, %v16873_v43  ;;  %vm10728_vm8 = vcmp.lt.s32.totalorder %v10724_v16, 16 }
 0x9ef   : > { %v10962_v49 = vsub.f32 %v16850_v45, %v16866_v32  ;;  %13769 = vmatprep.subr.mxu0 %v16687_v26  ;;  %13759 = vmatpush3.msra.mxu1 %v10949_v44  ;;  %v14302_v16 = vmov 0.0  }
 0x9f0   : > { %10753 = vrot.lane.b32.xlu1 %v10735_v60, %s14298_s16  ;;  %v16877_v38 = vadd.f32 %v10708_v52, %v10704_v47  ;;  %13760 = vmatprep.subr.mxu1 %v10956_v57  ;;  %v10969_v52 = vsub.f32 %v16873_v43, %v16883_v25  ;;  %v10744_v47 = vrot.slane %v10735_v60, 1  ;;  %v10737_v31 = vrot.slane %v10735_v60, 7 }
 0x9f1   : > { %v10963_v62 = vand.u32 4294901760, %v10962_v49  ;;  %13761 = vmatpush3.msra.mxu1 %v10956_v57  ;;  %v16893_v36 = vsel %vm10728_vm8, 1.0, %v14302_v16 }
 0x9f2   : > { %17496 = vst [vmem:[#allocation10_spill] sm:$0xff] %v16877_v38  ;;  %v10736_v6 = vmul.f32 %v16877_v38, %v14944_v23  ;;  %v10970_v44 = vand.u32 4294901760, %v10969_v52 }
 0x9f3   : > { %13762 = vmatprep.subr.mxu1 %v10963_v62 }
 0x9f4   : > { %10755 = vrot.lane.b32.xlu0 %v10736_v6, %s14298_s16  ;;  %v10745_v61 = vrot.slane %v10736_v6, 1  ;;  %v10738_v24 = vrot.slane %v10736_v6, 7  ;;  %13763 = vmatpush3.msra.mxu1 %v10963_v62 }
 0x9f5   : > { %13764 = vmatprep.subr.mxu1 %v10970_v44 }
 0x9f6   : > { %v10747_v49 = vsel %vm10746_vm12, %v10744_v47, %v10745_v61  ;;  %v10748_v38 = vsel %vm10746_vm12, %v10745_v61, %v10744_v47  ;;  %v10741_v23 = vsel %vm10739_vm0, %v10738_v24, %v10737_v31  ;;  %v10740_v7 = vsel %vm10739_vm0, %v10737_v31, %v10738_v24  ;;  %13765 = vmatpush3.msra.mxu1 %v10970_v44 }
 0x9f7   : > { %10761 = vrot.lane.b32.xlu1 %v10747_v49, %s14288_s13  ;;  %v10750_v60 = vmul.f32 %v16893_v36, %v10748_v38  ;;  %13796 = vmatprep.subr.mxu1 %v16661_v28 }
 0x9f8   : > { %11489 = vrot.lane.b32.xlu0 %v16648_v15, %s14285_s11  ;;  %v10711_v15 = vadd.s32 4294967295, %v14571_v37 }
 0x9fa   : > { %vm10713_vm14 = vcmp.ge.s32.totalorder %v10711_v15, 0 }
 0x9fb   : > { %10763 = vrot.lane.b32.xlu1 %v10750_v60, %s14288_s13 }
 0x9fc   : > { %11485 = vrot.lane.b32.xlu0 %v16658_v48, %s14285_s11 }
 0x9ff   : > { %11487 = vrot.lane.b32.xlu1 %v16653_v35, %s14285_s11  ;;  %v16930_v35 = vsel %vm10713_vm14, 1.0, %v14302_v16 }
 0xa00   : > { %11481 = vrot.lane.b32.xlu0 %v16677_v17, %s14285_s11 }
 0xa03   : > { %11483 = vrot.lane.b32.xlu1 %v16672_v21, %s14285_s11  ;;  %v10742_v21 = vmul.f32 %v16930_v35, %v10741_v23 }
 0xa04   : > { %11477 = vrot.lane.b32.xlu0 %v16752_v1, %s14285_s11 }
 0xa07   : > { %11479 = vrot.lane.b32.xlu1 %v16743_v59, %s14285_s11 }
 0xa08   : > { %11473 = vrot.lane.b32.xlu0 %v16784_v53, %s14285_s11 }
 0xa0b   : > { %11475 = vrot.lane.b32.xlu1 %v16766_v4, %s14285_s11 }
 0xa0f   : > { %11471 = vrot.lane.b32.xlu1 %v16804_v63, %s14285_s11 }
 0xa13   : > { %11469 = vrot.lane.b32.xlu1 %v16824_v2, %s14285_s11 }
 0xa62   : > { %v10754_v48 = vpop.permute.xlu1 %10753 }
 0xa63   : > { %v10767_v17 = vsel %vm17497_vm4, %v10742_v21, %v10754_v48 }
 0xa66   : > { %v10756_v1 = vpop.permute.xlu0 %10755 }
 0xa67   : > { %v10768_v2 = vsel %vm17498_vm5, %v10740_v7, %v10756_v1 }
 0xa69   : > { %v10762_v59 = vpop.permute.xlu1 %10761 }
 0xa6a   : > { %v10770_v4 = vsel %vm10769_vm15, %v10767_v17, %v10762_v59 }
 0xa6b   : > { %v10778_v53 = vsel %vm10776_vm2, %v10770_v4, 0 }
 0xa6c   : > { %v16936_v63 = vand.u32 4294901760, %v10778_v53 }
 0xa6d   : > { %v10764_v24 = vpop.permute.xlu1 %10763 }
 0xa6e   : > { %v10861_v31 = vsub.f32 %v10778_v53, %v16936_v63  ;;  %v10771_v38 = vsel %vm10769_vm15, %v10768_v2, %v10764_v24  ;;  %13766 = vmatprep.mubr.f32.mxu1 %v16936_v63 }
 0xa6f   : > { %v10781_v23 = vsel %vm10776_vm2, %v10771_v38, 0 }
 0xa70   : > { %v16943_v57 = vand.u32 4294901760, %v10781_v23  ;;  %v10862_v6 = vand.u32 4294901760, %v10861_v31 }
 0xa72   : > { %v16946_v62 = vsub.f32 %v10781_v23, %v16943_v57  ;;  %13767 = vmatmul.mubr.f32.vlgmr.msra.gmra.mxu1 %v16943_v57  ;;  %v10863_v52 = vsub.f32 %v10861_v31, %v10862_v6  ;;  %v17499_v23 = vld [vmem:[#allocation7_spill] sm:$0xff] }
 0xa73   : > { %13797 = vmatpush3.msra.mxu1 %v16661_v28  ;;  %13820 = vmatprep.mubr.f32.mxu1 %v10862_v6 }
 0xa74   : > { %v10872_v7 = vand.u32 4294901760, %v16946_v62  ;;  %13798 = vmatprep.subr.mxu1 %v16664_v5  ;;  %v10864_v47 = vand.u32 4294901760, %v10863_v52 }
 0xa75   : > { %13799 = vmatpush3.msra.mxu1 %v16664_v5 }
 0xa76   : > { %13800 = vmatprep.subr.mxu1 %v16667_v0  ;;  %13739 = vmatprep.mubr.f32.mxu0 %v10864_v47  ;;  %v10873_v61 = vsub.f32 %v16946_v62, %v10872_v7 }
 0xa77   : > { %13801 = vmatpush3.msra.mxu1 %v16667_v0 }
 0xa78   : > { %13802 = vmatprep.subr.mxu1 %v16680_v19  ;;  %v10874_v16 = vand.u32 4294901760, %v10873_v61 }
 0xa79   : > { %13803 = vmatpush3.msra.mxu1 %v16680_v19 }
 0xa7a   : > { %13804 = vmatprep.subr.mxu1 %v16683_v46  ;;  %13740 = vmatmul.mubr.f32.vlgmr.msra.gmra.mxu0 %v10874_v16 }
 0xa7b   : > { %13770 = vmatpush3.msra.mxu0 %v16687_v26  ;;  %13805 = vmatpush3.msra.mxu1 %v16683_v46 }
 0xa7c   : > { %13771 = vmatprep.subr.mxu0 %v16691_v20  ;;  %13793 = vmatprep.mubr.f32.mxu0 %v10861_v31  ;;  %v10774_v31 = vsub.s32 1, %v14571_v37 }
 0xa7d   : > { %13806 = vmatprep.subr.mxu1 %v16746_v9  ;;  %13772 = vmatpush3.msra.mxu0 %v16691_v20 }
 0xa7e   : > { %13807 = vmatpush3.msra.mxu1 %v16746_v9  ;;  %13773 = vmatprep.subr.mxu0 %v16695_v27 }
 0xa7f   : > { %13808 = vmatprep.subr.mxu1 %v16759_v11  ;;  %13774 = vmatpush3.msra.mxu0 %v16695_v27 }
 0xa80   : > { %13809 = vmatpush3.msra.mxu1 %v16759_v11  ;;  %13775 = vmatprep.subr.mxu0 %v16700_v55 }
 0xa81   : > { %13810 = vmatprep.subr.mxu1 %v16777_v22  ;;  %13776 = vmatpush3.msra.mxu0 %v16700_v55 }
 0xa82   : > { %13811 = vmatpush3.msra.mxu1 %v16777_v22  ;;  %13777 = vmatprep.subr.mxu0 %v16704_v39 }
 0xa83   : > { %13812 = vmatprep.subr.mxu1 %v16797_v14  ;;  %13778 = vmatpush3.msra.mxu0 %v16704_v39 }
 0xa84   : > { %13813 = vmatpush3.msra.mxu1 %v16797_v14  ;;  %13779 = vmatprep.subr.mxu0 %v16756_v30 }
 0xa85   : > { %13814 = vmatprep.subr.mxu1 %v16819_v29  ;;  %13780 = vmatpush3.msra.mxu0 %v16756_v30 }
 0xa86   : > { %13815 = vmatpush3.msra.mxu1 %v16819_v29  ;;  %13781 = vmatprep.subr.mxu0 %v16774_v51 }
 0xa87   : > { %13816 = vmatprep.subr.mxu1 %v16830_v33  ;;  %13782 = vmatpush3.msra.mxu0 %v16774_v51 }
 0xa88   : > { %13817 = vmatpush3.msra.mxu1 %v16830_v33  ;;  %13783 = vmatprep.subr.mxu0 %v16794_v58 }
 0xa89   : > { %13818 = vmatprep.subr.mxu1 %v16859_v18  ;;  %13784 = vmatpush3.msra.mxu0 %v16794_v58 }
 0xa8a   : > { %13819 = vmatpush3.msra.mxu1 %v16859_v18  ;;  %13785 = vmatprep.subr.mxu0 %v16816_v34 }
 0xa8b   : > { %13821 = vmatmul.mubr.f32.vlgmr.msra.gmra.mxu1 %v10872_v7  ;;  %13850 = vmatprep.subr.mxu1 %v16661_v28 }
 0xa8c   : > { %13786 = vmatpush3.msra.mxu0 %v16816_v34  ;;  %13851 = vmatpush3.msra.mxu1 %v16661_v28  ;;  %v11490_v28 = vpop.permute.xlu0 %11489 }
 0xa8d   : > { %13874 = vmatprep.mubr.f32.mxu1 %v16936_v63  ;;  %13787 = vmatprep.subr.mxu0 %v16837_v13 }
 0xa8e   : > { %13852 = vmatprep.subr.mxu1 %v16664_v5  ;;  %13788 = vmatpush3.msra.mxu0 %v16837_v13 }
 0xa8f   : > { %13853 = vmatpush3.msra.mxu1 %v16664_v5  ;;  %13789 = vmatprep.subr.mxu0 %v16850_v45  ;;  %v11488_v5 = vpop.permute.xlu1 %11487 }
 0xa90   : > { %13854 = vmatprep.subr.mxu1 %v16667_v0  ;;  %13790 = vmatpush3.msra.mxu0 %v16850_v45  ;;  %v11486_v20 = vpop.permute.xlu0 %11485 }
 0xa91   : > { %13855 = vmatpush3.msra.mxu1 %v16667_v0  ;;  %13791 = vmatprep.subr.mxu0 %v16873_v43  ;;  %v17050_v0 = vand.u32 4294901760, %v11490_v28  ;;  %v17062_v55 = vand.u32 4294901760, %v11486_v20 }
 0xa92   : > { %13856 = vmatprep.subr.mxu1 %v16680_v19  ;;  %13792 = vmatpush3.msra.mxu0 %v16873_v43 }
 0xa93   : > { %13857 = vmatpush3.msra.mxu1 %v16680_v19  ;;  %13794 = vmatmul.mubr.f32.vlgmr.msra.gmra.mxu0 %v16946_v62  ;;  %v17052_v19 = vand.u32 4294901760, %v11488_v5  ;;  %v11484_v27 = vpop.permute.xlu1 %11483 }
 0xa94   : > { %13823 = vmatprep.subr.mxu0 %v16708_v8  ;;  %13858 = vmatprep.subr.mxu1 %v16683_v46  ;;  %v17064_v39 = vand.u32 4294901760, %v11484_v27  ;;  %v11482_v30 = vpop.permute.xlu0 %11481 }
 0xa95   : > { %13824 = vmatpush3.msra.mxu0 %v16708_v8  ;;  %13847 = vmatprep.mubr.f32.mxu0 %v16936_v63  ;;  %v17058_v26 = vsub.f32 %v11488_v5, %v17052_v19 }
 0xa96   : > { %13859 = vmatpush3.msra.mxu1 %v16683_v46  ;;  %13825 = vmatprep.subr.mxu0 %v16711_v54  ;;  %v17055_v46 = vsub.f32 %v11490_v28, %v17050_v0 }
 0xa97   : > { %13860 = vmatprep.subr.mxu1 %v16746_v9  ;;  %13826 = vmatpush3.msra.mxu0 %v16711_v54  ;;  %v17071_v54 = vand.u32 4294901760, %v17058_v26 }
 0xa98   : > { %13861 = vmatpush3.msra.mxu1 %v16746_v9  ;;  %13827 = vmatprep.subr.mxu0 %v16714_v10  ;;  %v17068_v8 = vand.u32 4294901760, %v17055_v46 }
 0xa99   : > { %13862 = vmatprep.subr.mxu1 %v16759_v11  ;;  %13828 = vmatpush3.msra.mxu0 %v16714_v10  ;;  %v17075_v10 = vsub.f32 %v11486_v20, %v17062_v55  ;;  %v11625_v9 = vsub.f32 %v17058_v26, %v17071_v54 }
 0xa9a   : > { %13863 = vmatpush3.msra.mxu1 %v16759_v11  ;;  %13829 = vmatprep.subr.mxu0 %v16718_v41  ;;  %v11480_v11 = vpop.permute.xlu1 %11479 }
 0xa9b   : > { %13864 = vmatprep.subr.mxu1 %v16777_v22  ;;  %13830 = vmatpush3.msra.mxu0 %v16718_v41  ;;  %v17078_v41 = vsub.f32 %v11484_v27, %v17064_v39  ;;  %v17088_v51 = vand.u32 4294901760, %v11480_v11  ;;  %v17093_v58 = vand.u32 4294901760, %v17075_v10 }
 0xa9c   : > { %13865 = vmatpush3.msra.mxu1 %v16777_v22  ;;  %13831 = vmatprep.subr.mxu0 %v16728_v56 }
 0xa9d   : > { %13866 = vmatprep.subr.mxu1 %v16797_v14  ;;  %13832 = vmatpush3.msra.mxu0 %v16728_v56  ;;  %v11618_v56 = vsub.f32 %v17055_v46, %v17068_v8  ;;  %v17102_v34 = vsub.f32 %v11480_v11, %v17088_v51 }
 0xa9e   : > { %13867 = vmatpush3.msra.mxu1 %v16797_v14  ;;  %13833 = vmatprep.subr.mxu0 %v16770_v3  ;;  %v17096_v14 = vand.u32 4294901760, %v17078_v41 }
 0xa9f   : > { %13868 = vmatprep.subr.mxu1 %v16819_v29  ;;  %13834 = vmatpush3.msra.mxu0 %v16770_v3  ;;  %v17086_v3 = vand.u32 4294901760, %v11482_v30  ;;  %v11619_v22 = vand.u32 4294901760, %v11618_v56 }
 0xaa0   : > { %13869 = vmatpush3.msra.mxu1 %v16819_v29  ;;  %13835 = vmatprep.subr.mxu0 %v16790_v40  ;;  %v11478_v29 = vpop.permute.xlu0 %11477  ;;  %v11639_v13 = vsub.f32 %v17078_v41, %v17096_v14 }
 0xaa1   : > { %13870 = vmatprep.subr.mxu1 %v16830_v33  ;;  %13836 = vmatpush3.msra.mxu0 %v16790_v40  ;;  %v11626_v40 = vand.u32 4294901760, %v11625_v9  ;;  %v17110_v45 = vand.u32 4294901760, %v11478_v29 }
 0xaa2   : > { %13871 = vmatpush3.msra.mxu1 %v16830_v33  ;;  %13837 = vmatprep.subr.mxu0 %v16811_v42  ;;  %v11476_v33 = vpop.permute.xlu1 %11475  ;;  %v11640_v43 = vand.u32 4294901760, %v11639_v13 }
 0xaa3   : > { %13872 = vmatprep.subr.mxu1 %v16859_v18  ;;  %13838 = vmatpush3.msra.mxu0 %v16811_v42  ;;  %v17099_v42 = vsub.f32 %v11482_v30, %v17086_v3  ;;  %v17123_v44 = vand.u32 4294901760, %v11476_v33 }
 0xaa4   : > { %13873 = vmatpush3.msra.mxu1 %v16859_v18  ;;  %13839 = vmatprep.subr.mxu0 %v16833_v50  ;;  %v17117_v18 = vand.u32 4294901760, %v17102_v34  ;;  %v11474_v15 = vpop.permute.xlu0 %11473 }
 0xaa5   : > { %13875 = vmatmul.mubr.f32.vlgmr.msra.gmra.mxu1 %v16943_v57  ;;  %13840 = vmatpush3.msra.mxu0 %v16833_v50  ;;  %v11632_v50 = vsub.f32 %v17075_v10, %v17093_v58  ;;  %v17131_v21 = vand.u32 4294901760, %v11474_v15  ;;  %v17153_v47 = vsub.f32 %v11476_v33, %v17123_v44 }
 0xaa6   : > { %13841 = vmatprep.subr.mxu0 %v16856_v12  ;;  %13904 = vmatprep.subr.mxu1 %v11619_v22  ;;  %v11653_v60 = vsub.f32 %v17102_v34, %v17117_v18  ;;  %v11472_v48 = vpop.permute.xlu1 %11471 }
 0xaa7   : > { %13842 = vmatpush3.msra.mxu0 %v16856_v12  ;;  %13905 = vmatpush3.msra.mxu1 %v11619_v22  ;;  %v17114_v12 = vand.u32 4294901760, %v17099_v42  ;;  %v17138_v4 = vand.u32 4294901760, %v11472_v48  ;;  %v17156_v28 = vsub.f32 %v11474_v15, %v17131_v21  ;;  %v17162_v9 = vand.u32 4294901760, %v17153_v47 }
 0xaa8   : > { %13843 = vmatprep.subr.mxu0 %v16866_v32  ;;  %13906 = vmatprep.subr.mxu1 %v11626_v40  ;;  %v11654_v59 = vand.u32 4294901760, %v11653_v60 }
 0xaa9   : > { %13844 = vmatpush3.msra.mxu0 %v16866_v32  ;;  %13907 = vmatpush3.msra.mxu1 %v11626_v40  ;;  %v11633_v32 = vand.u32 4294901760, %v11632_v50  ;;  %v11646_v49 = vsub.f32 %v17099_v42, %v17114_v12  ;;  %v17159_v56 = vsub.f32 %v11472_v48, %v17138_v4  ;;  %v11667_v22 = vsub.f32 %v17153_v47, %v17162_v9 }
 0xaaa   : > { %13845 = vmatprep.subr.mxu0 %v16883_v25  ;;  %v11470_v53 = vpop.permute.xlu1 %11469  ;;  %v17167_v40 = vand.u32 4294901760, %v17156_v28 }
 0xaab   : > { %13846 = vmatpush3.msra.mxu0 %v16883_v25  ;;  %v17121_v25 = vsub.f32 %v11478_v29, %v17110_v45  ;;  %13908 = vmatprep.subr.mxu1 %v11633_v32  ;;  %v11647_v17 = vand.u32 4294901760, %v11646_v49  ;;  %v17144_v2 = vand.u32 4294901760, %v11470_v53  ;;  %v11668_v13 = vand.u32 4294901760, %v11667_v22 }
 0xaac   : > { %13848 = vmatmul.mubr.f32.vlgmr.msra.gmra.mxu0 %v16943_v57  ;;  %13877 = vmatprep.subr.mxu0 %v17050_v0  ;;  %v10775_v57 = vrot.slane %v17499_v23, %v10774_v31 }
 0xaad   : > { %13878 = vmatpush3.msra.mxu0 %v17050_v0  ;;  %13909 = vmatpush3.msra.mxu1 %v11633_v32  ;;  %v17136_v1 = vand.u32 4294901760, %v17121_v25  ;;  %v17170_v50 = vsub.f32 %v11470_v53, %v17144_v2  ;;  %v11674_v32 = vsub.f32 %v17156_v28, %v17167_v40 }
 0xaae   : > { %13879 = vmatprep.subr.mxu0 %v17052_v19  ;;  %13910 = vmatprep.subr.mxu1 %v11640_v43 }
 0xaaf   : > { %13880 = vmatpush3.msra.mxu0 %v17052_v19  ;;  %13911 = vmatpush3.msra.mxu1 %v11640_v43  ;;  %v11660_v63 = vsub.f32 %v17121_v25, %v17136_v1  ;;  %v17175_v43 = vand.u32 4294901760, %v17159_v56  ;;  %v11675_v48 = vand.u32 4294901760, %v11674_v32  ;;  %v17180_v31 = vand.u32 4294901760, %v17170_v50 }
 0xab0   : > { %13881 = vmatprep.subr.mxu0 %v17062_v55  ;;  %13912 = vmatprep.subr.mxu1 %v11647_v17 }
 0xab1   : > { %13882 = vmatpush3.msra.mxu0 %v17062_v55  ;;  %13913 = vmatpush3.msra.mxu1 %v11647_v17  ;;  %v11661_v24 = vand.u32 4294901760, %v11660_v63  ;;  %v11681_v17 = vsub.f32 %v17159_v56, %v17175_v43 }
 0xab2   : > { %13883 = vmatprep.subr.mxu0 %v17064_v39  ;;  %13914 = vmatprep.subr.mxu1 %v11654_v59 }
 0xab3   : > { %13884 = vmatpush3.msra.mxu0 %v17064_v39  ;;  %13915 = vmatpush3.msra.mxu1 %v11654_v59 }
 0xab4   : > { %13885 = vmatprep.subr.mxu0 %v17086_v3  ;;  %13916 = vmatprep.subr.mxu1 %v11661_v24 }
 0xab5   : > { %13886 = vmatpush3.msra.mxu0 %v17086_v3  ;;  %13917 = vmatpush3.msra.mxu1 %v11661_v24  ;;  %v11682_v24 = vand.u32 4294901760, %v11681_v17 }
 0xab6   : > { %13887 = vmatprep.subr.mxu0 %v17088_v51  ;;  %13918 = vmatprep.subr.mxu1 %v11668_v13 }
 0xab7   : > { %13888 = vmatpush3.msra.mxu0 %v17088_v51  ;;  %13919 = vmatpush3.msra.mxu1 %v11668_v13 }
 0xab8   : > { %13889 = vmatprep.subr.mxu0 %v17110_v45  ;;  %13920 = vmatprep.subr.mxu1 %v11675_v48 }
 0xab9   : > { %13890 = vmatpush3.msra.mxu0 %v17110_v45  ;;  %13921 = vmatpush3.msra.mxu1 %v11675_v48 }
 0xaba   : > { %13891 = vmatprep.subr.mxu0 %v17123_v44  ;;  %13922 = vmatprep.subr.mxu1 %v11682_v24 }
 0xabb   : > { %13892 = vmatpush3.msra.mxu0 %v17123_v44  ;;  %13923 = vmatpush3.msra.mxu1 %v11682_v24 }
 0xabc   : > { %13893 = vmatprep.subr.mxu0 %v17131_v21 }
 0xabd   : > { %13894 = vmatpush3.msra.mxu0 %v17131_v21 }
 0xabe   : > { %13895 = vmatprep.subr.mxu0 %v17138_v4 }
 0xabf   : > { %13896 = vmatpush3.msra.mxu0 %v17138_v4 }
 0xac0   : > { %13897 = vmatprep.subr.mxu0 %v17144_v2 }
 0xac1   : > { %13898 = vmatpush3.msra.mxu0 %v17144_v2 }
 0xb32   : > { %v13768_v6 = vpop.f32.mrf.mxu1 }
 0xb34   : > { %v11007_v16 = vpop.f32.mrf.mxu1 }
 0xb3a   : > { %v13741_v38 = vpop.f32.mrf.mxu0 }
 0xb3b   : > { %v10877_v52 = vadd.f32 %v13741_v38, %v10775_v57 }
 0xb3c   : > { %v10866_v62 = vpop.f32.mrf.mxu0 }
 0xb3d   : > { %v10867_v61 = vadd.f32 %v10866_v62, %v10775_v57  ;;  %v11014_v5 = vadd.f32 %v13768_v6, %v10877_v52  ;;  %v11688_v6 = vsub.f32 %v17170_v50, %v17180_v31 }
 0xb3f   : > { %v11008_v11 = vadd.f32 %v11007_v16, %v10867_v61  ;;  %v17500_v61 = vld [vmem:[#allocation6_spill] sm:$0xff] }
 0xb4b   : > { %v13822_v20 = vpop.f32.mrf.mxu1 }
 0xb4d   : > { %v11201_v33 = vpop.f32.mrf.mxu1 }
 0xb53   : > { %v13795_v7 = vpop.f32.mrf.mxu0 }
 0xb54   : > { %v11117_v30 = vadd.f32 %v13795_v7, %v11014_v5  ;;  %v11689_v7 = vand.u32 4294901760, %v11688_v6 }
 0xb55   : > { %v11109_v27 = vpop.f32.mrf.mxu0 }
 0xb56   : > { %v11110_v29 = vadd.f32 %v11109_v27, %v11008_v11  ;;  %v11210_v49 = vadd.f32 %v13822_v20, %v11117_v30  ;;  %13924 = vmatprep.subr.mxu1 %v11689_v7  ;;  %v17501_v20 = vld [vmem:[#allocation5_spill] sm:$0xff] }
 0xb57   : > { %13925 = vmatpush3.msra.mxu1 %v11689_v7 }
 0xb58   : > { %v11202_v63 = vadd.f32 %v11201_v33, %v11110_v29  ;;  %v17502_v33 = vld [vmem:[#allocation8_spill] sm:$0xff] }
 0xb65   : > { %v13876_v60 = vpop.f32.mrf.mxu1 }
 0xb67   : > { %v11405_v57 = vpop.f32.mrf.mxu1 }
 0xb6c   : > { %v13849_v15 = vpop.f32.mrf.mxu0 }
 0xb6d   : > { %v11323_v59 = vadd.f32 %v13849_v15, %v11210_v49 }
 0xb6e   : > { %v11316_v53 = vpop.f32.mrf.mxu0 }
 0xb6f   : > { %v11412_v38 = vadd.f32 %v13876_v60, %v11323_v59  ;;  %v11317_v23 = vadd.f32 %v11316_v53, %v11202_v63 }
 0xb71   : > { %v11416_v62 = vmax.f32 %v11412_v38, 0.0  ;;  %v11406_v52 = vadd.f32 %v11405_v57, %v11317_v23 }
 0xb73   : > { %v11418_v16 = vmul.f32 %v11416_v62, %v17500_v61  ;;  %v11415_v5 = vmax.f32 %v11406_v52, 0.0 }
 0xb75   : > { %v11417_v27 = vmul.f32 %v11415_v5, %v17501_v20  ;;  %11435 = vrot.lane.b32.xlu1 %v11418_v16, %s14298_s16  ;;  %v11426_v11 = vrot.slane %v11418_v16, 1  ;;  %v11420_v29 = vrot.slane %v11418_v16, 7 }
 0xb77   : > { %11433 = vrot.lane.b32.xlu0 %v11417_v27, %s14298_s16  ;;  %v11425_v30 = vrot.slane %v11417_v27, 1  ;;  %v11419_v22 = vrot.slane %v11417_v27, 7  ;;  %s254_s16 = sand.u32 1, %s14273_s22  }
 0xb78   : > { %s12274_s18 = sshll.u32 %s254_s16, 4  ;;  %s17358_s14 = scalar_lea.sflag [#allocation3], %s254_s16 }
 0xb79   : > { %11467 = vrot.lane.b32.xlu1 %v17502_v33, %s14285_s11  ;;  %v11427_v13 = vsel %vm10746_vm12, %v11425_v30, %v11426_v11  ;;  %v11421_v32 = vsel %vm10739_vm0, %v11419_v22, %v11420_v29  ;;  %v11422_v49 = vsel %vm10739_vm0, %v11420_v29, %v11419_v22  ;;  %v11428_v60 = vsel %vm10746_vm12, %v11426_v11, %v11425_v30  ;;  %s256_s20 = scalar_lea.vmem [#allocation2], %s12274_s18 }
 0xb7a   : > { %v11430_v15 = vmul.f32 %v16893_v36, %v11428_v60  ;;  %v11423_v59 = vmul.f32 %v16930_v35, %v11422_v49  ;;  %s12199_s29 = sshll.u32 %s256_s20, 4  ;;  %s17355_s29 = int_to_ptr.vmem [resolvable:$true] %s12199_s29 }
 0xb7b   : > { %11441 = vrot.lane.b32.xlu0 %v11427_v13, %s14288_s13  ;;  %s14221_s25 = scalar_lea.vmem %s17355_s29, 256  ;;  %p14228_p1 = scmp.lt.s32.totalorder %s17355_s29, %s14226_s26 }
 0xb7c   : > { %p14222_p12 = scmp.ne.s32.totalorder %s17355_s29, %s14221_s25  ;;  %p14229_p2 = scmp.lt.s32.totalorder %s14227_s17, %s14221_s25 }
 0xb7e   : > { %p14223_p13 = pnand %p14222_p12, %p14378_p5  ;;  %p14230_p3 = por %p14229_p2, %p14228_p1 }
 0xb7f   : > { %11443 = vrot.lane.b32.xlu0 %v11430_v15, %s14288_s13 }
 0xb80   : > { %p14224_p0 = pneg %p14223_p13 }
 0xb82   : > { %p14231_p4 = pnand %p14230_p3, %p14224_p0 }
 0xbe7   : > { %v11436_v48 = vpop.permute.xlu1 %11435 }
 0xbe8   : > { %v11448_v62 = vsel %vm17504_vm11, %v11421_v32, %v11436_v48 }
 0xbe9   : > { %v11434_v17 = vpop.permute.xlu0 %11433 }
 0xbea   : > { %v11447_v24 = vsel %vm17503_vm6, %v11423_v59, %v11434_v17 }
 0xbeb   : > { %v11468_v63 = vpop.permute.xlu1 %11467 }
 0xbec   : > { %v17202_v53 = vand.u32 4294901760, %v11468_v63 }
 0xbed   : > { %v11442_v38 = vpop.permute.xlu0 %11441 }
 0xbee   : > { %v17206_v23 = vsub.f32 %v11468_v63, %v17202_v53  ;;  %v11449_v57 = vsel %vm10769_vm15, %v11447_v24, %v11442_v38  ;;  %13899 = vmatprep.subr.mxu0 %v17202_v53 }
 0xbef   : > { %v11504_v36 = vsel %vm10776_vm2, %v11449_v57, 0  ;;  %13900 = vmatpush3.msra.mxu0 %v17202_v53 }
 0xbf0   : > { %v17212_v6 = vand.u32 4294901760, %v11504_v36  ;;  %13931 = vmatprep.subr.mxu0 %v17055_v46  ;;  %v17216_v35 = vand.u32 4294901760, %v17206_v23 }
 0xbf1   : > { %v11444_v52 = vpop.permute.xlu0 %11443 }
 0xbf2   : > { %v11587_v7 = vsub.f32 %v11504_v36, %v17212_v6  ;;  %v11450_v16 = vsel %vm10769_vm15, %v11448_v62, %v11444_v52  ;;  %13928 = vmatprep.mubr.f32.mxu1 %v17212_v6  ;;  %v11695_v5 = vsub.f32 %v17206_v23, %v17216_v35 }
 0xbf3   : > { %v11507_v27 = vsel %vm10776_vm2, %v11450_v16, 0  ;;  %v12173_v16 = vsub.s32 5, %v14571_v37 }
 0xbf4   : > { %v17225_v30 = vand.u32 4294901760, %v11507_v27  ;;  %v11696_v11 = vand.u32 4294901760, %v11695_v5  ;;  %v11588_v22 = vand.u32 4294901760, %v11587_v7  ;;  %v12179_v5 = vsub.s32 6, %v14571_v37 }
 0xbf6   : > { %v17228_v29 = vsub.f32 %v11507_v27, %v17225_v30  ;;  %13926 = vmatprep.subr.mxu1 %v11696_v11  ;;  %v11589_v33 = vsub.f32 %v11587_v7, %v11588_v22 }
 0xbf7   : > { %13927 = vmatpush3.msra.mxu1 %v11696_v11 }
 0xbf8   : > { %v11598_v13 = vand.u32 4294901760, %v17228_v29  ;;  %13929 = vmatmul.mubr.f32.vlgmr.msra.gmra.mxu1 %v17225_v30  ;;  %13958 = vmatprep.subr.mxu1 %v17050_v0  ;;  %v11590_v32 = vand.u32 4294901760, %v11589_v33 }
 0xbf9   : > { %13959 = vmatpush3.msra.mxu1 %v17050_v0  ;;  %13982 = vmatprep.mubr.f32.mxu1 %v11588_v22 }
 0xbfa   : > { %v11599_v49 = vsub.f32 %v17228_v29, %v11598_v13  ;;  %13901 = vmatprep.mubr.f32.mxu0 %v11590_v32  ;;  %13960 = vmatprep.subr.mxu1 %v17052_v19 }
 0xbfb   : > { %13961 = vmatpush3.msra.mxu1 %v17052_v19 }
 0xbfc   : > { %v11600_v60 = vand.u32 4294901760, %v11599_v49  ;;  %13962 = vmatprep.subr.mxu1 %v17062_v55 }
 0xbfd   : > { %13963 = vmatpush3.msra.mxu1 %v17062_v55 }
 0xbfe   : > { %13902 = vmatmul.mubr.f32.vlgmr.msra.gmra.mxu0 %v11600_v60  ;;  %13964 = vmatprep.subr.mxu1 %v17064_v39 }
 0xbff   : > { %13932 = vmatpush3.msra.mxu0 %v17055_v46  ;;  %13955 = vmatprep.mubr.f32.mxu0 %v11587_v7  ;;  %v14220_v46 = vld [vmem:[%s17404_s5] sm:$0x7f] }
 0xc00   : > { %13933 = vmatprep.subr.mxu0 %v17058_v26  ;;  %13965 = vmatpush3.msra.mxu1 %v17064_v39  ;;  %v12174_v27 = vrot.slane %v14220_v46, %v12173_v16  ;;  %v12180_v22 = vrot.slane %v14220_v46, %v12179_v5 }
 0xc01   : > { %13934 = vmatpush3.msra.mxu0 %v17058_v26  ;;  %13966 = vmatprep.subr.mxu1 %v17086_v3 }
 0xc02   : > { %13935 = vmatprep.subr.mxu0 %v17075_v10  ;;  %13967 = vmatpush3.msra.mxu1 %v17086_v3 }
 0xc03   : > { %13936 = vmatpush3.msra.mxu0 %v17075_v10  ;;  %13968 = vmatprep.subr.mxu1 %v17088_v51 }
 0xc04   : > { %13937 = vmatprep.subr.mxu0 %v17078_v41  ;;  %13969 = vmatpush3.msra.mxu1 %v17088_v51 }
 0xc05   : > { %13938 = vmatpush3.msra.mxu0 %v17078_v41  ;;  %13970 = vmatprep.subr.mxu1 %v17110_v45 }
 0xc06   : > { %13939 = vmatprep.subr.mxu0 %v17099_v42  ;;  %13971 = vmatpush3.msra.mxu1 %v17110_v45 }
 0xc07   : > { %13940 = vmatpush3.msra.mxu0 %v17099_v42  ;;  %13972 = vmatprep.subr.mxu1 %v17123_v44 }
 0xc08   : > { %13941 = vmatprep.subr.mxu0 %v17102_v34  ;;  %13973 = vmatpush3.msra.mxu1 %v17123_v44 }
 0xc09   : > { %13942 = vmatpush3.msra.mxu0 %v17102_v34  ;;  %13974 = vmatprep.subr.mxu1 %v17131_v21 }
 0xc0a   : > { %13943 = vmatprep.subr.mxu0 %v17121_v25  ;;  %13975 = vmatpush3.msra.mxu1 %v17131_v21 }
 0xc0b   : > { %13944 = vmatpush3.msra.mxu0 %v17121_v25  ;;  %13976 = vmatprep.subr.mxu1 %v17138_v4 }
 0xc0c   : > { %13945 = vmatprep.subr.mxu0 %v17153_v47  ;;  %13977 = vmatpush3.msra.mxu1 %v17138_v4 }
 0xc0d   : > { %13946 = vmatpush3.msra.mxu0 %v17153_v47  ;;  %13978 = vmatprep.subr.mxu1 %v17144_v2 }
 0xc0e   : > { %13947 = vmatprep.subr.mxu0 %v17156_v28  ;;  %13979 = vmatpush3.msra.mxu1 %v17144_v2 }
 0xc0f   : > { %13948 = vmatpush3.msra.mxu0 %v17156_v28  ;;  %13980 = vmatprep.subr.mxu1 %v17202_v53 }
 0xc10   : > { %13949 = vmatprep.subr.mxu0 %v17159_v56  ;;  %13981 = vmatpush3.msra.mxu1 %v17202_v53 }
 0xc11   : > { %13950 = vmatpush3.msra.mxu0 %v17159_v56  ;;  %13983 = vmatmul.mubr.f32.vlgmr.msra.gmra.mxu1 %v11598_v13 }
 0xc12   : > { %14012 = vmatprep.subr.mxu1 %v17050_v0  ;;  %13951 = vmatprep.subr.mxu0 %v17170_v50 }
 0xc13   : > { %14013 = vmatpush3.msra.mxu1 %v17050_v0  ;;  %14036 = vmatprep.mubr.f32.mxu1 %v17212_v6  ;;  %v11453_v0 = vsub.s32 2, %v14571_v37 }
 0xc14   : > { %13952 = vmatpush3.msra.mxu0 %v17170_v50  ;;  %14014 = vmatprep.subr.mxu1 %v17052_v19 }
 0xc15   : > { %13953 = vmatprep.subr.mxu0 %v17206_v23  ;;  %14015 = vmatpush3.msra.mxu1 %v17052_v19  ;;  %v11454_v26 = vrot.slane %v14220_v46, %v11453_v0 }
 0xc16   : > { %13954 = vmatpush3.msra.mxu0 %v17206_v23  ;;  %14016 = vmatprep.subr.mxu1 %v17062_v55 }
 0xc17   : > { %13956 = vmatmul.mubr.f32.vlgmr.msra.gmra.mxu0 %v17228_v29  ;;  %13985 = vmatprep.subr.mxu0 %v17068_v8 }
 0xc18   : > { %14017 = vmatpush3.msra.mxu1 %v17062_v55  ;;  %13986 = vmatpush3.msra.mxu0 %v17068_v8 }
 0xc19   : > { %14009 = vmatprep.mubr.f32.mxu0 %v17212_v6  ;;  %14018 = vmatprep.subr.mxu1 %v17064_v39 }
 0xc1a   : > { %13987 = vmatprep.subr.mxu0 %v17071_v54  ;;  %14019 = vmatpush3.msra.mxu1 %v17064_v39 }
 0xc1b   : > { %13988 = vmatpush3.msra.mxu0 %v17071_v54  ;;  %14020 = vmatprep.subr.mxu1 %v17086_v3 }
 0xc1c   : > { %13989 = vmatprep.subr.mxu0 %v17093_v58  ;;  %14021 = vmatpush3.msra.mxu1 %v17086_v3 }
 0xc1d   : > { %13990 = vmatpush3.msra.mxu0 %v17093_v58  ;;  %14022 = vmatprep.subr.mxu1 %v17088_v51 }
 0xc1e   : > { %13991 = vmatprep.subr.mxu0 %v17096_v14  ;;  %14023 = vmatpush3.msra.mxu1 %v17088_v51 }
 0xc1f   : > { %13992 = vmatpush3.msra.mxu0 %v17096_v14  ;;  %14024 = vmatprep.subr.mxu1 %v17110_v45 }
 0xc20   : > { %13993 = vmatprep.subr.mxu0 %v17114_v12  ;;  %14025 = vmatpush3.msra.mxu1 %v17110_v45 }
 0xc21   : > { %13994 = vmatpush3.msra.mxu0 %v17114_v12  ;;  %14026 = vmatprep.subr.mxu1 %v17123_v44 }
 0xc22   : > { %13995 = vmatprep.subr.mxu0 %v17117_v18  ;;  %14027 = vmatpush3.msra.mxu1 %v17123_v44 }
 0xc23   : > { %13996 = vmatpush3.msra.mxu0 %v17117_v18  ;;  %14028 = vmatprep.subr.mxu1 %v17131_v21 }
 0xc24   : > { %13997 = vmatprep.subr.mxu0 %v17136_v1  ;;  %14029 = vmatpush3.msra.mxu1 %v17131_v21 }
 0xc25   : > { %13998 = vmatpush3.msra.mxu0 %v17136_v1  ;;  %14030 = vmatprep.subr.mxu1 %v17138_v4 }
 0xc26   : > { %13999 = vmatprep.subr.mxu0 %v17162_v9  ;;  %14031 = vmatpush3.msra.mxu1 %v17138_v4 }
 0xc27   : > { %14000 = vmatpush3.msra.mxu0 %v17162_v9  ;;  %14032 = vmatprep.subr.mxu1 %v17144_v2 }
 0xc28   : > { %14001 = vmatprep.subr.mxu0 %v17167_v40  ;;  %14033 = vmatpush3.msra.mxu1 %v17144_v2 }
 0xc29   : > { %14002 = vmatpush3.msra.mxu0 %v17167_v40  ;;  %14034 = vmatprep.subr.mxu1 %v17202_v53  ;;  %v17505_v40 = vld [vmem:[#allocation10_spill] sm:$0xff] }
 0xc2a   : > { %14003 = vmatprep.subr.mxu0 %v17175_v43  ;;  %14035 = vmatpush3.msra.mxu1 %v17202_v53 }
 0xc2b   : > { %14004 = vmatpush3.msra.mxu0 %v17175_v43  ;;  %14037 = vmatmul.mubr.f32.vlgmr.msra.gmra.mxu1 %v17225_v30 }
 0xc2c   : > { %14005 = vmatprep.subr.mxu0 %v17180_v31 }
 0xc2d   : > { %14006 = vmatpush3.msra.mxu0 %v17180_v31  ;;  %v17507_v31 = vld [vmem:[#allocation9_spill] sm:$0xff] }
 0xc2e   : > { %14007 = vmatprep.subr.mxu0 %v17216_v35 }
 0xc2f   : > { %14008 = vmatpush3.msra.mxu0 %v17216_v35 }
 0xc30   : > { %14010 = vmatmul.mubr.f32.vlgmr.msra.gmra.mxu0 %v17225_v30 }
 0xcb8   : > { %v13930_v55 = vpop.f32.mrf.mxu1 }
 0xcba   : > { %v11733_v41 = vpop.f32.mrf.mxu1 }
 0xcbe   : > { %v13903_v19 = vpop.f32.mrf.mxu0 }
 0xcbf   : > { %v11603_v8 = vadd.f32 %v13903_v19, %v11454_v26 }
 0xcc0   : > { %v11592_v39 = vpop.f32.mrf.mxu0 }
 0xcc1   : > { %v11593_v10 = vadd.f32 %v11592_v39, %v11454_v26  ;;  %v11740_v3 = vadd.f32 %v13930_v55, %v11603_v8 }
 0xcc3   : > { %v11734_v42 = vadd.f32 %v11733_v41, %v11593_v10 }
 0xcd1   : > { %v13984_v51 = vpop.f32.mrf.mxu1 }
 0xcd3   : > { %v11927_v45 = vpop.f32.mrf.mxu1 }
 0xcd7   : > { %v13957_v54 = vpop.f32.mrf.mxu0 }
 0xcd8   : > { %v11843_v14 = vadd.f32 %v13957_v54, %v11740_v3 }
 0xcd9   : > { %v11835_v58 = vpop.f32.mrf.mxu0 }
 0xcda   : > { %v11836_v34 = vadd.f32 %v11835_v58, %v11734_v42  ;;  %v11936_v12 = vadd.f32 %v13984_v51, %v11843_v14 }
 0xcdc   : > { %v11928_v21 = vadd.f32 %v11927_v45, %v11836_v34 }
 0xceb   : > { %v14038_v18 = vpop.f32.mrf.mxu1 }
 0xced   : > { %v12131_v47 = vpop.f32.mrf.mxu1 }
 0xcf0   : > { %v14011_v25 = vpop.f32.mrf.mxu0 }
 0xcf1   : > { %v12049_v44 = vadd.f32 %v14011_v25, %v11936_v12 }
 0xcf2   : > { %v12042_v1 = vpop.f32.mrf.mxu0 }
 0xcf3   : > { %v12138_v4 = vadd.f32 %v14038_v18, %v12049_v44  ;;  %v12043_v2 = vadd.f32 %v12042_v1, %v11928_v21 }
 0xcf5   : > { %v12142_v28 = vmul.f32 %v12138_v4, %v17500_v61  ;;  %v12132_v56 = vadd.f32 %v12131_v47, %v12043_v2 }
 0xcf7   : > { %v12141_v9 = vmul.f32 %v12132_v56, %v17501_v20  ;;  %v12144_v50 = vadd.f32 %v12142_v28, %v17505_v40 }
 0xcf9   : > { %v12148_v43 = vsel %vm17506_vm3, %v12144_v50, 0.0  ;;  %v12143_v15 = vadd.f32 %v12141_v9, %v17507_v31 }
 0xcfa   : > { %12149 = vadd.xlane.f32.xlu1 %v12148_v43 }
 0xcfb   : > { %v12145_v48 = vsel %vm17508_vm10, %v12143_v15, 0.0 }
 0xcfc   : > { %12146 = vadd.xlane.f32.xlu0 %v12145_v48 }
 0xd83   : > { %v12150_v17 = vpop.xlane.xlu1 %12149 }
 0xd84   : > { %v12152_v59 = vmul.f32 0.03125, %v12150_v17 }
 0xd85   : > { %v12147_v63 = vpop.xlane.xlu0 %12146 }
 0xd86   : > { %v12151_v53 = vmul.f32 0.03125, %v12147_v63  ;;  %v12154_v24 = vsub.f32 %v12144_v50, %v12152_v59 }
 0xd88   : > { %v12153_v38 = vsub.f32 %v12143_v15, %v12151_v53  ;;  %v12156_v23 = vmul.f32 %v12154_v24, %v12154_v24 }
 0xd8a   : > { %v12155_v61 = vmul.f32 %v12153_v38, %v12153_v38  ;;  %v12160_v57 = vsel %vm17510_vm9, %v12156_v23, 0.0 }
 0xd8c   : > { %v12157_v20 = vsel %vm17509_vm13, %v12155_v61, 0.0 }
 0xd8d   : > { %12158 = vadd.xlane.f32.xlu0 %v12157_v20 }
 0xd91   : > { %12161 = vadd.xlane.f32.xlu0 %v12160_v57 }
 0xe16   : > { %v12159_v36 = vpop.xlane.xlu0 %12158 }
 0xe17   : > { %v12163_v6 = vmul.f32 0.03125, %v12159_v36 }
 0xe19   : > { %v12165_v35 = vadd.f32 1e-05, %v12163_v6 }
 0xe1a   : > { %v12162_v62 = vpop.xlane.xlu0 %12161 }
 0xe1b   : > { %14210 = vrsqrt.f32 %v12165_v35  ;;  %v12164_v52 = vmul.f32 0.03125, %v12162_v62 }
 0xe1d   : > { %v12166_v7 = vadd.f32 1e-05, %v12164_v52 }
 0xe1f   : > { %14212 = vrsqrt.f32 %v12166_v7 }
 0xe28   : > { %v14211_v30 = vpop.eup %14210 }
 0xe29   : > { %v12169_v11 = vmul.f32 %v14211_v30, %v12153_v38 }
 0xe2b   : > { %v12175_v29 = vmul.f32 %v12174_v27, %v12169_v11 }
 0xe2c   : > { %v14213_v33 = vpop.eup %14212 }
 0xe2d   : > { %v12170_v13 = vmul.f32 %v14213_v33, %v12154_v24  ;;  %v12181_v32 = vadd.f32 %v12180_v22, %v12175_v29 }
 0xe2f   : > { %v12176_v49 = vmul.f32 %v12174_v27, %v12170_v13  ;;  %12183 = vst.msk [vmem:[%s256_s20] sm:$0xff] %vm17511_vm7, %v12181_v32 }
 0xe31   : > { %v12182_v37 = vadd.f32 %v12180_v22, %v12176_v49 }
 0xe33   : > { %12184 = vst.msk [vmem:[%s256_s20 + $0x8] sm:$0xff] %vm17493_vm1, %v12182_v37 }
 0xe34   : > { %14234 = shalt.err (!%p14231_p4)
}
 0xe35   : > { %s14235_s11 = scalar_lea.hbm %s17353_s12, 256  ;;  %s14239_s18 = scalar_lea.hbm %s17405_s6, 512 }
 0xe36   : > { %p14236_p7 = scmp.ne.s32.totalorder %s17353_s12, %s14235_s11  ;;  %p14240_p10 = scmp.lt.s32.totalorder %s17353_s12, %s17405_s6 }
 0xe37   : > { %p14241_p11 = scmp.lt.s32.totalorder %s14239_s18, %s14235_s11 }
 0xe38   : > { %p14237_p8 = pnand %p14236_p7, %p14378_p5 }
 0xe39   : > { %p14242_p12 = por %p14241_p11, %p14240_p10 }
 0xe3a   : > { %p14238_p9 = pneg %p14237_p8 }
 0xe3c   : > { %p14243_p13 = pnand %p14242_p12, %p14238_p9 }
 0xe3e   : > { %14246 = shalt.err (!%p14243_p13)
}
 0xe3f   : > { %s14304_s9 = smov 128  }
 0xe40   : > { %14039 = dma.vmem_to_hbm [thread:$0]  (%p14378_p5), %s17355_s29, 256, %s17353_s12, %s17358_s14, %s14304_s9, %s14304_s9, %s14299_s28  }
 0xe41 PF: > { %p14045_p0 = scmp.ge.s32.totalorder %s14281_s24, 2  ;;  %s12214_s10 = sand.u32 1, %s14269_s21  }
 0xe42   : > { %s12215_s25 = scalar_lea.sflag [#allocation3], %s12214_s10 }
 0xe43   : > { %p14042_p1 = pnand %p14045_p0, %p14382_p6 }
 0xe45   : > { %p14043_p2 = pneg %p14042_p1 }
 0xe47   : > { %14264 = dma.done.wait (%p14043_p2), %s12215_s25, 256  }
 0xe48   : > { %14266 = vsyncadd (%p14043_p2), %s12215_s25, 4294967040  ;;  %p16_p3 = scmp.ge.s32.totalorder %s14365_s27, 4   ;;  %s17512_s21 = smov %s14273_s22 }
 0xe49   : > { %s17513_s22 = smov %s14277_s23  ;;  %s17514_s23 = smov %s14376_s30 }
 0xe4a   : > { %s17515_s24 = smov %s14365_s27  ;;  %18 = sbr.rel (!%p16_p3) target bundleno = 3 (0x3), region = 82 }
 0xe4f   :  { %12220 = vsyncpa [#allocation3], 1 }
 0xe50   :  { %12222 = vsyncpa [#allocation3 + $0x1], 1 }

</bundles_post_ra>
